<compile_context>
chip_gen: v5e
topology: v5e:2x2
jax: 0.10.0
libtpu: 0.0.40
codegen_flags: <defaults>
</compile_context>

<pallas_src>
import numpy as np
import jax
import jax.numpy as jnp
from jax.experimental import pallas as pl
from jax.experimental.pallas import tpu as pltpu


def _make_kernel(Bt, L):
    """Kernel body closed over the static batch tile / sequence length."""
    L3 = L // 8

    def kernel(x_ref,
               w1p_ref, w1c_ref, w1n_ref, b1_ref,
               w2p_ref, w2c_ref, w2n_ref, b2_ref,
               w3p_ref, w3c_ref, w3n_ref, b3_ref,
               fw1_ref, fb1_ref, fw2_ref, fb2_ref,
               out_ref,
               tap1_scr, y1_scr, tap2_scr, y2_scr, tap3_scr, y3_scr, flat_scr):

        def conv_relu(h2, Lc, tap_scr, wp_ref, wc_ref, wn_ref, b_ref):
            """Conv1d(kernel=3, padding=1) + ReLU on (M, C) rows, M = Bt * Lc."""
            M, C = h2.shape
            zero_row = jnp.zeros((1, C), jnp.float32)
            # Stage the rows (sublane-aligned, at offset 8) with a zero row on
            # each side and read the +/-1 shifted views straight from VMEM.
            tap_scr[7:8, :] = zero_row
            tap_scr[M + 8:M + 9, :] = zero_row
            tap_scr[8:M + 8, :] = h2
            hp = tap_scr[7:M + 7, :]        # hp[m] = h2[m-1]   (0 at m == 0)
            hn = tap_scr[9:M + 9, :]        # hn[m] = h2[m+1]   (0 at m == M-1)
            if Bt > 1:
                # Zero the single rows that crossed a sample boundary.  One
                # per-position iota compare instead of v2's Bt-term OR chain.
                pos = jax.lax.broadcasted_iota(
                    jnp.int32, (Bt, Lc, C), 1).reshape(M, C)
                hp = jnp.where(pos == 0, jnp.zeros_like(hp), hp)
                hn = jnp.where(pos == Lc - 1, jnp.zeros_like(hn), hn)
            # Three accumulated MXU matmuls (bf16 inputs, f32 accumulation).
            y = (jnp.dot(h2.astype(jnp.bfloat16), wc_ref[...],
                         preferred_element_type=jnp.float32)
                 + jnp.dot(hp.astype(jnp.bfloat16), wp_ref[...],
                           preferred_element_type=jnp.float32)
                 + jnp.dot(hn.astype(jnp.bfloat16), wn_ref[...],
                           preferred_element_type=jnp.float32)
                 + b_ref[...])
            return jnp.maximum(y, 0.0)                        # (M, Cout) f32

        def maxpool2(y_scr, y):
            """MaxPool1d(kernel=2, stride=2) along rows via stride-2 VMEM reads.

            Pool pairs never straddle samples (per-sample length is even)."""
            M, _ = y.shape
            y_scr[...] = y
            even = y_scr[pl.ds(0, M // 2, stride=2), :]
            odd = y_scr[pl.ds(1, M // 2, stride=2), :]
            return jnp.maximum(even, odd)                     # (M // 2, C) f32

        # (Bt, L, Cin) bf16 block -> (Bt*L, Cin) f32 rows (free leading merge).
        x = x_ref[...].astype(jnp.float32).reshape(Bt * L, -1)
        h = maxpool2(y1_scr, conv_relu(x, L, tap1_scr,
                                       w1p_ref, w1c_ref, w1n_ref, b1_ref))
        h = maxpool2(y2_scr, conv_relu(h, L // 2, tap2_scr,
                                       w2p_ref, w2c_ref, w2n_ref, b2_ref))
        p3 = maxpool2(y3_scr, conv_relu(h, L // 4, tap3_scr,
                                        w3p_ref, w3c_ref, w3n_ref, b3_ref))
        # p3: (Bt*L3, 128), rows ordered sample-major / length-minor.

        # Flatten to (Bt, L3*128) with flat[b, l*128 + c] = p3[b*L3 + l, c]:
        # one staging store + L3 stride-L3 row gathers + a 128-aligned lane
        # concat.  fw1 is pre-permuted in the wrapper so this matches PyTorch's
        # channel-major x.view(B, -1) flatten.
        flat_scr[...] = p3
        flat = jnp.concatenate(
            [flat_scr[pl.ds(l, Bt, stride=L3), :] for l in range(L3)], axis=-1)

        z = jnp.dot(flat.astype(jnp.bfloat16), fw1_ref[...],
                    preferred_element_type=jnp.float32) + fb1_ref[...]
        z = jnp.maximum(z, 0.0)                               # ReLU(fc1)
        out_ref[...] = jnp.dot(z.astype(jnp.bfloat16), fw2_ref[...],
                               preferred_element_type=jnp.float32) + fb2_ref[...]

    return kernel


def _pick_block_b(B, L):
    """Largest 8-aligned divisor of B under a VMEM-aware cap (prefer grid >= 2)."""
    # Rough per-sample VMEM cost of the lane-padded f32 activations + scratch.
    per_sample_bytes = 2400 * L
    cap = max(8, min(256, (20 * 1024 * 1024) // max(per_sample_bytes, 1)))
    divisors = [bt for bt in range(8, min(B, cap) + 1, 8) if B % bt == 0]
    if not divisors:
        return B                      # B < 8 or not 8-divisible: single block
    bt = divisors[-1]
    if bt == B and len(divisors) > 1:
        bt = divisors[-2]             # keep >= 2 grid steps (v7x has 2 cores)
    return bt


def simple_cnn_forward(x_ncl, params, block_b=None):
    """x_ncl: (B, Cin, L) float32 (PyTorch NCL layout) -> (B, num_classes)."""
    w1, b1, w2, b2, w3, b3, fc1_w, fc1_b, fc2_w, fc2_b = params
    B, Cin, L = x_ncl.shape
    assert L % 8 == 0, "sequence length must be divisible by 8 (3 pools of 2)"
    # TODO(synk): the original model uses L=749 (odd); PyTorch MaxPool1d floors
    # odd lengths per stage, which would need per-stage truncation masks here.
    L3 = L // 8
    num_classes = fc2_w.shape[0]
    n_hidden = fc1_w.shape[0]
    assert fc1_w.shape[1] == 128 * L3

    Bt = block_b if block_b is not None else _pick_block_b(B, L)
    assert B % Bt == 0 and (Bt % 8 == 0 or Bt == B)
    grid_b = B // Bt

    # ---- plain-JAX glue: layout conversion of inputs / params --------------
    # Input as (B, L, Cin) bf16: length-major rows for the conv matmuls, and a
    # 2x cheaper HBM->VMEM DMA than f32.
    # TODO(synk): pack 32 length positions per 128-lane row to remove the
    # Cin=4 lane padding entirely (per perf review).
    x3d = jnp.transpose(x_ncl, (0, 2, 1)).astype(jnp.bfloat16)

    def split_conv_w(w):     # (Cout, Cin, 3) -> three (Cin, Cout) bf16 tap mats
        wt = jnp.transpose(w, (2, 1, 0)).astype(jnp.bfloat16)
        return wt[0], wt[1], wt[2]

    w1p, w1c, w1n = split_conv_w(w1)
    w2p, w2c, w2n = split_conv_w(w2)
    w3p, w3c, w3n = split_conv_w(w3)
    b1r = b1.reshape(1, -1).astype(jnp.float32)
    b2r = b2.reshape(1, -1).astype(jnp.float32)
    b3r = b3.reshape(1, -1).astype(jnp.float32)

    # fw1[l*128 + c, o] == fc1_w[o, c*L3 + l]  (PyTorch channel-major flatten).
    fw1 = jnp.transpose(fc1_w.reshape(n_hidden, 128, L3), (2, 1, 0))
    fw1 = fw1.reshape(L3 * 128, n_hidden).astype(jnp.bfloat16)
    fb1 = fc1_b.reshape(1, -1).astype(jnp.float32)

    # fc2: pad classes to a lane-dense multiple of 128 with zero columns.
    Ncls = ((num_classes + 127) // 128) * 128
    fw2 = jnp.zeros((n_hidden, Ncls), jnp.float32)
    fw2 = fw2.at[:, :num_classes].set(fc2_w.T.astype(jnp.float32)).astype(jnp.bfloat16)
    fb2 = jnp.zeros((1, Ncls), jnp.float32).at[:, :num_classes].set(
        fc2_b.reshape(1, -1).astype(jnp.float32))

    # Grid-invariant params: whole-array blocks with a constant index_map (the
    # pipeline only re-copies a block when its index changes).
    # TODO(synk): single-buffer these (pl.Buffered(1)) to also halve their VMEM
    # footprint once that pipeline_mode is robust (fw1 ~11.6 MiB at prod size).
    full = lambda a: pl.BlockSpec(a.shape, lambda i: (0,) * a.ndim)

    flops = 2 * B * (L * (3 * Cin) * 32 + (L // 2) * (3 * 32) * 64
                     + (L // 4) * (3 * 64) * 128
                     + (L3 * 128) * n_hidden + n_hidden * num_classes)
    bytes_accessed = (B * L * Cin * 2
                      + (3 * Cin * 32 + 3 * 32 * 64 + 3 * 64 * 128
                         + L3 * 128 * n_hidden + n_hidden * Ncls) * 2
                      + (32 + 64 + 128 + n_hidden + Ncls) * 4
                      + B * Ncls * 4)

    kernel = _make_kernel(Bt, L)
    out = pl.pallas_call(
        kernel,
        out_shape=jax.ShapeDtypeStruct((B, Ncls), jnp.float32),
        grid_spec=pltpu.PrefetchScalarGridSpec(
            num_scalar_prefetch=0,
            grid=(grid_b,),
            in_specs=[
                pl.BlockSpec((Bt, L, Cin), lambda i: (i, 0, 0)),
                full(w1p), full(w1c), full(w1n), full(b1r),
                full(w2p), full(w2c), full(w2n), full(b2r),
                full(w3p), full(w3c), full(w3n), full(b3r),
                full(fw1), full(fb1), full(fw2), full(fb2),
            ],
            out_specs=pl.BlockSpec((Bt, Ncls), lambda i: (i, 0)),
            scratch_shapes=[
                pltpu.VMEM((Bt * L + 16, Cin), jnp.float32),       # conv1 tap staging
                pltpu.VMEM((Bt * L, 32), jnp.float32),             # conv1 pre-pool rows
                pltpu.VMEM((Bt * L // 2 + 16, 32), jnp.float32),   # conv2 tap staging
                pltpu.VMEM((Bt * L // 2, 64), jnp.float32),        # conv2 pre-pool rows
                pltpu.VMEM((Bt * L // 4 + 16, 64), jnp.float32),   # conv3 tap staging
                pltpu.VMEM((Bt * L // 4, 128), jnp.float32),       # conv3 pre-pool rows
                pltpu.VMEM((Bt * L3, 128), jnp.float32),           # flatten staging
            ]),
        compiler_params=pltpu.CompilerParams(
            dimension_semantics=("parallel",),
            vmem_limit_bytes=48 * 1024 * 1024),
        cost_estimate=pl.CostEstimate(flops=int(flops), transcendentals=0,
                                      bytes_accessed=int(bytes_accessed)),
    )(x3d, w1p, w1c, w1n, b1r, w2p, w2c, w2n, b2r,
      w3p, w3c, w3n, b3r, fw1, fb1, fw2, fb2)
    return out[:, :num_classes]                                    # (B, num_classes)


def reference_forward(x_ncl, params):
    """Pure-JAX f32 reference mirroring the PyTorch forward (NCL layout)."""
    w1, b1, w2, b2, w3, b3, fc1_w, fc1_b, fc2_w, fc2_b = params

    def conv(x, w, b):
        y = jax.lax.conv_general_dilated(
            x, w, window_strides=(1,), padding=((1, 1),),
            dimension_numbers=('NCH', 'OIH', 'NCH'))
        return y + b[None, :, None]

    def pool(x):
        B, C, L = x.shape
        return jnp.max(x[:, :, :(L // 2) * 2].reshape(B, C, L // 2, 2), axis=-1)

    h = pool(jax.nn.relu(conv(x_ncl, w1, b1)))
    h = pool(jax.nn.relu(conv(h, w2, b2)))
    h = pool(jax.nn.relu(conv(h, w3, b3)))
    flat = h.reshape(h.shape[0], -1)                               # channel-major
    z = jax.nn.relu(flat @ fc1_w.T + fc1_b)
    return z @ fc2_w.T + fc2_b


def init_params(key, input_channels, num_classes, flattened_size):
    """Deterministic synthetic parameters in PyTorch shapes."""
    ks = jax.random.split(key, 10)
    s = 0.1
    w1 = s * jax.random.normal(ks[0], (32, input_channels, 3), jnp.float32)
    b1 = s * jax.random.normal(ks[1], (32,), jnp.float32)
    w2 = s * jax.random.normal(ks[2], (64, 32, 3), jnp.float32)
    b2 = s * jax.random.normal(ks[3], (64,), jnp.float32)
    w3 = s * jax.random.normal(ks[4], (128, 64, 3), jnp.float32)
    b3 = s * jax.random.normal(ks[5], (128,), jnp.float32)
    fc1_w = s * jax.random.normal(ks[6], (512, flattened_size), jnp.float32)
    fc1_b = s * jax.random.normal(ks[7], (512,), jnp.float32)
    fc2_w = s * jax.random.normal(ks[8], (num_classes, 512), jnp.float32)
    fc2_b = s * jax.random.normal(ks[9], (num_classes,), jnp.float32)
    return (w1, b1, w2, b2, w3, b3, fc1_w, fc1_b, fc2_w, fc2_b)


if __name__ == "__main__":
    # Small shapes consistent with the module (original uses L=749; we use
    # L=64 so the three /2 pools stay exact -> flattened = 128 * 8 = 1024).
    # B=16 so the batch-tiled grid (Bt=8, 2 steps) is actually exercised.
    B, Cin, L, num_classes = 16, 4, 64, 5
    flattened_size = 128 * (L // 8)

    key = jax.random.PRNGKey(0)
    kx, kp = jax.random.split(key)
    x = jax.random.normal(kx, (B, Cin, L), jnp.float32)            # NCL like PyTorch
    params = init_params(kp, Cin, num_classes, flattened_size)

    out = simple_cnn_forward(x, params)
    out = jax.block_until_ready(out)
    assert out.shape == (B, num_classes)

    ref = reference_forward(x, params)
    # bf16 MXU inputs (and bf16 input DMA) with f32 accumulation -> looser
    # tolerance than an all-f32 implementation.
    np.testing.assert_allclose(np.asarray(out), np.asarray(ref),
                               rtol=4e-2, atol=4e-2)
    print("KERNEL_OK")
</pallas_src>

<mosaic_0001>
module attributes {stable_mosaic.version = 11 : i64} {
  func.func @kernel(%arg0: i32, %arg1: memref<8x64x4xbf16, #tpu.memory_space<vmem>>, %arg2: memref<4x32xbf16, #tpu.memory_space<vmem>>, %arg3: memref<4x32xbf16, #tpu.memory_space<vmem>>, %arg4: memref<4x32xbf16, #tpu.memory_space<vmem>>, %arg5: memref<1x32xf32, #tpu.memory_space<vmem>>, %arg6: memref<32x64xbf16, #tpu.memory_space<vmem>>, %arg7: memref<32x64xbf16, #tpu.memory_space<vmem>>, %arg8: memref<32x64xbf16, #tpu.memory_space<vmem>>, %arg9: memref<1x64xf32, #tpu.memory_space<vmem>>, %arg10: memref<64x128xbf16, #tpu.memory_space<vmem>>, %arg11: memref<64x128xbf16, #tpu.memory_space<vmem>>, %arg12: memref<64x128xbf16, #tpu.memory_space<vmem>>, %arg13: memref<1x128xf32, #tpu.memory_space<vmem>>, %arg14: memref<1024x512xbf16, #tpu.memory_space<vmem>>, %arg15: memref<1x512xf32, #tpu.memory_space<vmem>>, %arg16: memref<512x128xbf16, #tpu.memory_space<vmem>>, %arg17: memref<1x128xf32, #tpu.memory_space<vmem>>, %arg18: memref<8x128xf32, #tpu.memory_space<vmem>>, %arg19: memref<528x4xf32, #tpu.memory_space<vmem>>, %arg20: memref<512x32xf32, #tpu.memory_space<vmem>>, %arg21: memref<272x32xf32, #tpu.memory_space<vmem>>, %arg22: memref<256x64xf32, #tpu.memory_space<vmem>>, %arg23: memref<144x64xf32, #tpu.memory_space<vmem>>, %arg24: memref<128x128xf32, #tpu.memory_space<vmem>>, %arg25: memref<64x128xf32, #tpu.memory_space<vmem>>) attributes {dimension_semantics = [#tpu.dimension_semantics<parallel>], iteration_bounds = array<i64: 2>, scalar_prefetch = 0 : i64, scratch_operands = 7 : i64, tpu.core_type = #tpu.core_type<tc>, window_params = [{transform_indices = @transform_0, window_bounds = array<i64: 8, 64, 4>}, {pipeline_mode = #tpu.pipeline_mode<synchronous>, transform_indices = @transform_1, window_bounds = array<i64: 4, 32>}, {pipeline_mode = #tpu.pipeline_mode<synchronous>, transform_indices = @transform_2, window_bounds = array<i64: 4, 32>}, {pipeline_mode = #tpu.pipeline_mode<synchronous>, transform_indices = @transform_3, window_bounds = array<i64: 4, 32>}, {pipeline_mode = #tpu.pipeline_mode<synchronous>, transform_indices = @transform_4, window_bounds = array<i64: 1, 32>}, {pipeline_mode = #tpu.pipeline_mode<synchronous>, transform_indices = @transform_5, window_bounds = array<i64: 32, 64>}, {pipeline_mode = #tpu.pipeline_mode<synchronous>, transform_indices = @transform_6, window_bounds = array<i64: 32, 64>}, {pipeline_mode = #tpu.pipeline_mode<synchronous>, transform_indices = @transform_7, window_bounds = array<i64: 32, 64>}, {pipeline_mode = #tpu.pipeline_mode<synchronous>, transform_indices = @transform_8, window_bounds = array<i64: 1, 64>}, {pipeline_mode = #tpu.pipeline_mode<synchronous>, transform_indices = @transform_9, window_bounds = array<i64: 64, 128>}, {pipeline_mode = #tpu.pipeline_mode<synchronous>, transform_indices = @transform_10, window_bounds = array<i64: 64, 128>}, {pipeline_mode = #tpu.pipeline_mode<synchronous>, transform_indices = @transform_11, window_bounds = array<i64: 64, 128>}, {pipeline_mode = #tpu.pipeline_mode<synchronous>, transform_indices = @transform_12, window_bounds = array<i64: 1, 128>}, {pipeline_mode = #tpu.pipeline_mode<synchronous>, transform_indices = @transform_13, window_bounds = array<i64: 1024, 512>}, {pipeline_mode = #tpu.pipeline_mode<synchronous>, transform_indices = @transform_14, window_bounds = array<i64: 1, 512>}, {pipeline_mode = #tpu.pipeline_mode<synchronous>, transform_indices = @transform_15, window_bounds = array<i64: 512, 128>}, {pipeline_mode = #tpu.pipeline_mode<synchronous>, transform_indices = @transform_16, window_bounds = array<i64: 1, 128>}, {transform_indices = @transform_17, window_bounds = array<i64: 8, 128>}]} {
    %c0 = arith.constant 0 : index
    %c0_0 = arith.constant 0 : index
    %c0_1 = arith.constant 0 : index
    %0 = vector.load %arg1[%c0, %c0_0, %c0_1] : memref<8x64x4xbf16, #tpu.memory_space<vmem>>, vector<8x64x4xbf16>
    %1 = arith.extf %0 : vector<8x64x4xbf16> to vector<8x64x4xf32>
    %2 = vector.shape_cast %1 : vector<8x64x4xf32> to vector<512x4xf32>
    %cst = arith.constant 0.000000e+00 : f32
    %3 = vector.broadcast %cst : f32 to vector<1x4xf32>
    %c7 = arith.constant 7 : index
    %c0_2 = arith.constant 0 : index
    %4 = vector.load %arg19[%c7, %c0_2] : memref<528x4xf32, #tpu.memory_space<vmem>>, vector<1x4xf32>
    tpu.vector_store %arg19[%c7, %c0_2], %3 {strides = array<i32>} : memref<528x4xf32, #tpu.memory_space<vmem>>, vector<1x4xf32>,
    %c520 = arith.constant 520 : index
    %c0_3 = arith.constant 0 : index
    %5 = vector.load %arg19[%c520, %c0_3] : memref<528x4xf32, #tpu.memory_space<vmem>>, vector<1x4xf32>
    tpu.vector_store %arg19[%c520, %c0_3], %3 {strides = array<i32>} : memref<528x4xf32, #tpu.memory_space<vmem>>, vector<1x4xf32>,
    %c8 = arith.constant 8 : index
    %c0_4 = arith.constant 0 : index
    %6 = vector.load %arg19[%c8, %c0_4] : memref<528x4xf32, #tpu.memory_space<vmem>>, vector<512x4xf32>
    tpu.vector_store %arg19[%c8, %c0_4], %2 {strides = array<i32>} : memref<528x4xf32, #tpu.memory_space<vmem>>, vector<512x4xf32>,
    %c7_5 = arith.constant 7 : index
    %c0_6 = arith.constant 0 : index
    %7 = vector.load %arg19[%c7_5, %c0_6] : memref<528x4xf32, #tpu.memory_space<vmem>>, vector<512x4xf32>
    %c9 = arith.constant 9 : index
    %c0_7 = arith.constant 0 : index
    %8 = vector.load %arg19[%c9, %c0_7] : memref<528x4xf32, #tpu.memory_space<vmem>>, vector<512x4xf32>
    %9 = tpu.iota {dimensions = array<i32: 1>} : vector<8x64x4xi32>
    %10 = vector.shape_cast %9 : vector<8x64x4xi32> to vector<512x4xi32>
    %c0_i32 = arith.constant 0 : i32
    %11 = vector.broadcast %c0_i32 : i32 to vector<512x4xi32>
    %12 = arith.cmpi eq, %10, %11 : vector<512x4xi32>
    %cst_8 = arith.constant 0.000000e+00 : f32
    %13 = vector.broadcast %cst_8 : f32 to vector<512x4xf32>
    %14 = arith.select %12, %13, %7 : vector<512x4xi1>, vector<512x4xf32>
    %c63_i32 = arith.constant 63 : i32
    %15 = vector.broadcast %c63_i32 : i32 to vector<512x4xi32>
    %16 = arith.cmpi eq, %10, %15 : vector<512x4xi32>
    %cst_9 = arith.constant 0.000000e+00 : f32
    %17 = vector.broadcast %cst_9 : f32 to vector<512x4xf32>
    %18 = arith.select %16, %17, %8 : vector<512x4xi1>, vector<512x4xf32>
    %19 = arith.truncf %2 : vector<512x4xf32> to vector<512x4xbf16>
    %c0_10 = arith.constant 0 : index
    %c0_11 = arith.constant 0 : index
    %20 = vector.load %arg3[%c0_10, %c0_11] : memref<4x32xbf16, #tpu.memory_space<vmem>>, vector<4x32xbf16>
    %cst_12 = arith.constant dense<0.000000e+00> : vector<512x32xf32>
    %21 = tpu.matmul %19, %20, %cst_12 {dimension_numbers = #tpu.dot_dimension_numbers<[1], [0], [0], [1], [0, 0, 1, 1], [], []>} : vector<512x4xbf16>, vector<4x32xbf16>, vector<512x32xf32> -> vector<512x32xf32>
    %22 = arith.truncf %14 : vector<512x4xf32> to vector<512x4xbf16>
    %c0_13 = arith.constant 0 : index
    %c0_14 = arith.constant 0 : index
    %23 = vector.load %arg2[%c0_13, %c0_14] : memref<4x32xbf16, #tpu.memory_space<vmem>>, vector<4x32xbf16>
    %cst_15 = arith.constant dense<0.000000e+00> : vector<512x32xf32>
    %24 = tpu.matmul %22, %23, %cst_15 {dimension_numbers = #tpu.dot_dimension_numbers<[1], [0], [0], [1], [0, 0, 1, 1], [], []>} : vector<512x4xbf16>, vector<4x32xbf16>, vector<512x32xf32> -> vector<512x32xf32>
    %25 = arith.addf %21, %24 : vector<512x32xf32>
    %26 = arith.truncf %18 : vector<512x4xf32> to vector<512x4xbf16>
    %c0_16 = arith.constant 0 : index
    %c0_17 = arith.constant 0 : index
    %27 = vector.load %arg4[%c0_16, %c0_17] : memref<4x32xbf16, #tpu.memory_space<vmem>>, vector<4x32xbf16>
    %cst_18 = arith.constant dense<0.000000e+00> : vector<512x32xf32>
    %28 = tpu.matmul %26, %27, %cst_18 {dimension_numbers = #tpu.dot_dimension_numbers<[1], [0], [0], [1], [0, 0, 1, 1], [], []>} : vector<512x4xbf16>, vector<4x32xbf16>, vector<512x32xf32> -> vector<512x32xf32>
    %29 = arith.addf %25, %28 : vector<512x32xf32>
    %c0_19 = arith.constant 0 : index
    %c0_20 = arith.constant 0 : index
    %30 = vector.load %arg5[%c0_19, %c0_20] : memref<1x32xf32, #tpu.memory_space<vmem>>, vector<1x32xf32>
    %31 = vector.broadcast %30 : vector<1x32xf32> to vector<512x32xf32>
    %32 = arith.addf %29, %31 : vector<512x32xf32>
    %cst_21 = arith.constant 0.000000e+00 : f32
    %33 = vector.broadcast %cst_21 : f32 to vector<512x32xf32>
    %34 = arith.maximumf %32, %33 : vector<512x32xf32>
    %c0_22 = arith.constant 0 : index
    %c0_23 = arith.constant 0 : index
    %35 = vector.load %arg20[%c0_22, %c0_23] : memref<512x32xf32, #tpu.memory_space<vmem>>, vector<512x32xf32>
    tpu.vector_store %arg20[%c0_22, %c0_23], %34 {strides = array<i32>} : memref<512x32xf32, #tpu.memory_space<vmem>>, vector<512x32xf32>,
    %c0_24 = arith.constant 0 : index
    %c0_25 = arith.constant 0 : index
    %36 = tpu.strided_load %arg20[%c0_24, %c0_25] {strides = array<i32: 2, 1>} : memref<512x32xf32, #tpu.memory_space<vmem>>, vector<256x32xf32>
    %c1 = arith.constant 1 : index
    %c0_26 = arith.constant 0 : index
    %37 = tpu.strided_load %arg20[%c1, %c0_26] {strides = array<i32: 2, 1>} : memref<512x32xf32, #tpu.memory_space<vmem>>, vector<256x32xf32>
    %38 = arith.maximumf %36, %37 : vector<256x32xf32>
    %cst_27 = arith.constant 0.000000e+00 : f32
    %39 = vector.broadcast %cst_27 : f32 to vector<1x32xf32>
    %c7_28 = arith.constant 7 : index
    %c0_29 = arith.constant 0 : index
    %40 = vector.load %arg21[%c7_28, %c0_29] : memref<272x32xf32, #tpu.memory_space<vmem>>, vector<1x32xf32>
    tpu.vector_store %arg21[%c7_28, %c0_29], %39 {strides = array<i32>} : memref<272x32xf32, #tpu.memory_space<vmem>>, vector<1x32xf32>,
    %c264 = arith.constant 264 : index
    %c0_30 = arith.constant 0 : index
    %41 = vector.load %arg21[%c264, %c0_30] : memref<272x32xf32, #tpu.memory_space<vmem>>, vector<1x32xf32>
    tpu.vector_store %arg21[%c264, %c0_30], %39 {strides = array<i32>} : memref<272x32xf32, #tpu.memory_space<vmem>>, vector<1x32xf32>,
    %c8_31 = arith.constant 8 : index
    %c0_32 = arith.constant 0 : index
    %42 = vector.load %arg21[%c8_31, %c0_32] : memref<272x32xf32, #tpu.memory_space<vmem>>, vector<256x32xf32>
    tpu.vector_store %arg21[%c8_31, %c0_32], %38 {strides = array<i32>} : memref<272x32xf32, #tpu.memory_space<vmem>>, vector<256x32xf32>,
    %c7_33 = arith.constant 7 : index
    %c0_34 = arith.constant 0 : index
    %43 = vector.load %arg21[%c7_33, %c0_34] : memref<272x32xf32, #tpu.memory_space<vmem>>, vector<256x32xf32>
    %c9_35 = arith.constant 9 : index
    %c0_36 = arith.constant 0 : index
    %44 = vector.load %arg21[%c9_35, %c0_36] : memref<272x32xf32, #tpu.memory_space<vmem>>, vector<256x32xf32>
    %45 = tpu.iota {dimensions = array<i32: 1>} : vector<8x32x32xi32>
    %46 = vector.shape_cast %45 : vector<8x32x32xi32> to vector<256x32xi32>
    %c0_i32_37 = arith.constant 0 : i32
    %47 = vector.broadcast %c0_i32_37 : i32 to vector<256x32xi32>
    %48 = arith.cmpi eq, %46, %47 : vector<256x32xi32>
    %cst_38 = arith.constant 0.000000e+00 : f32
    %49 = vector.broadcast %cst_38 : f32 to vector<256x32xf32>
    %50 = arith.select %48, %49, %43 : vector<256x32xi1>, vector<256x32xf32>
    %c31_i32 = arith.constant 31 : i32
    %51 = vector.broadcast %c31_i32 : i32 to vector<256x32xi32>
    %52 = arith.cmpi eq, %46, %51 : vector<256x32xi32>
    %cst_39 = arith.constant 0.000000e+00 : f32
    %53 = vector.broadcast %cst_39 : f32 to vector<256x32xf32>
    %54 = arith.select %52, %53, %44 : vector<256x32xi1>, vector<256x32xf32>
    %55 = arith.truncf %38 : vector<256x32xf32> to vector<256x32xbf16>
    %c0_40 = arith.constant 0 : index
    %c0_41 = arith.constant 0 : index
    %56 = vector.load %arg7[%c0_40, %c0_41] : memref<32x64xbf16, #tpu.memory_space<vmem>>, vector<32x64xbf16>
    %cst_42 = arith.constant dense<0.000000e+00> : vector<256x64xf32>
    %57 = tpu.matmul %55, %56, %cst_42 {dimension_numbers = #tpu.dot_dimension_numbers<[1], [0], [0], [1], [0, 0, 1, 1], [], []>} : vector<256x32xbf16>, vector<32x64xbf16>, vector<256x64xf32> -> vector<256x64xf32>
    %58 = arith.truncf %50 : vector<256x32xf32> to vector<256x32xbf16>
    %c0_43 = arith.constant 0 : index
    %c0_44 = arith.constant 0 : index
    %59 = vector.load %arg6[%c0_43, %c0_44] : memref<32x64xbf16, #tpu.memory_space<vmem>>, vector<32x64xbf16>
    %cst_45 = arith.constant dense<0.000000e+00> : vector<256x64xf32>
    %60 = tpu.matmul %58, %59, %cst_45 {dimension_numbers = #tpu.dot_dimension_numbers<[1], [0], [0], [1], [0, 0, 1, 1], [], []>} : vector<256x32xbf16>, vector<32x64xbf16>, vector<256x64xf32> -> vector<256x64xf32>
    %61 = arith.addf %57, %60 : vector<256x64xf32>
    %62 = arith.truncf %54 : vector<256x32xf32> to vector<256x32xbf16>
    %c0_46 = arith.constant 0 : index
    %c0_47 = arith.constant 0 : index
    %63 = vector.load %arg8[%c0_46, %c0_47] : memref<32x64xbf16, #tpu.memory_space<vmem>>, vector<32x64xbf16>
    %cst_48 = arith.constant dense<0.000000e+00> : vector<256x64xf32>
    %64 = tpu.matmul %62, %63, %cst_48 {dimension_numbers = #tpu.dot_dimension_numbers<[1], [0], [0], [1], [0, 0, 1, 1], [], []>} : vector<256x32xbf16>, vector<32x64xbf16>, vector<256x64xf32> -> vector<256x64xf32>
    %65 = arith.addf %61, %64 : vector<256x64xf32>
    %c0_49 = arith.constant 0 : index
    %c0_50 = arith.constant 0 : index
    %66 = vector.load %arg9[%c0_49, %c0_50] : memref<1x64xf32, #tpu.memory_space<vmem>>, vector<1x64xf32>
    %67 = vector.broadcast %66 : vector<1x64xf32> to vector<256x64xf32>
    %68 = arith.addf %65, %67 : vector<256x64xf32>
    %cst_51 = arith.constant 0.000000e+00 : f32
    %69 = vector.broadcast %cst_51 : f32 to vector<256x64xf32>
    %70 = arith.maximumf %68, %69 : vector<256x64xf32>
    %c0_52 = arith.constant 0 : index
    %c0_53 = arith.constant 0 : index
    %71 = vector.load %arg22[%c0_52, %c0_53] : memref<256x64xf32, #tpu.memory_space<vmem>>, vector<256x64xf32>
    tpu.vector_store %arg22[%c0_52, %c0_53], %70 {strides = array<i32>} : memref<256x64xf32, #tpu.memory_space<vmem>>, vector<256x64xf32>,
    %c0_54 = arith.constant 0 : index
    %c0_55 = arith.constant 0 : index
    %72 = tpu.strided_load %arg22[%c0_54, %c0_55] {strides = array<i32: 2, 1>} : memref<256x64xf32, #tpu.memory_space<vmem>>, vector<128x64xf32>
    %c1_56 = arith.constant 1 : index
    %c0_57 = arith.constant 0 : index
    %73 = tpu.strided_load %arg22[%c1_56, %c0_57] {strides = array<i32: 2, 1>} : memref<256x64xf32, #tpu.memory_space<vmem>>, vector<128x64xf32>
    %74 = arith.maximumf %72, %73 : vector<128x64xf32>
    %cst_58 = arith.constant 0.000000e+00 : f32
    %75 = vector.broadcast %cst_58 : f32 to vector<1x64xf32>
    %c7_59 = arith.constant 7 : index
    %c0_60 = arith.constant 0 : index
    %76 = vector.load %arg23[%c7_59, %c0_60] : memref<144x64xf32, #tpu.memory_space<vmem>>, vector<1x64xf32>
    tpu.vector_store %arg23[%c7_59, %c0_60], %75 {strides = array<i32>} : memref<144x64xf32, #tpu.memory_space<vmem>>, vector<1x64xf32>,
    %c136 = arith.constant 136 : index
    %c0_61 = arith.constant 0 : index
    %77 = vector.load %arg23[%c136, %c0_61] : memref<144x64xf32, #tpu.memory_space<vmem>>, vector<1x64xf32>
    tpu.vector_store %arg23[%c136, %c0_61], %75 {strides = array<i32>} : memref<144x64xf32, #tpu.memory_space<vmem>>, vector<1x64xf32>,
    %c8_62 = arith.constant 8 : index
    %c0_63 = arith.constant 0 : index
    %78 = vector.load %arg23[%c8_62, %c0_63] : memref<144x64xf32, #tpu.memory_space<vmem>>, vector<128x64xf32>
    tpu.vector_store %arg23[%c8_62, %c0_63], %74 {strides = array<i32>} : memref<144x64xf32, #tpu.memory_space<vmem>>, vector<128x64xf32>,
    %c7_64 = arith.constant 7 : index
    %c0_65 = arith.constant 0 : index
    %79 = vector.load %arg23[%c7_64, %c0_65] : memref<144x64xf32, #tpu.memory_space<vmem>>, vector<128x64xf32>
    %c9_66 = arith.constant 9 : index
    %c0_67 = arith.constant 0 : index
    %80 = vector.load %arg23[%c9_66, %c0_67] : memref<144x64xf32, #tpu.memory_space<vmem>>, vector<128x64xf32>
    %81 = tpu.iota {dimensions = array<i32: 1>} : vector<8x16x64xi32>
    %82 = vector.shape_cast %81 : vector<8x16x64xi32> to vector<128x64xi32>
    %c0_i32_68 = arith.constant 0 : i32
    %83 = vector.broadcast %c0_i32_68 : i32 to vector<128x64xi32>
    %84 = arith.cmpi eq, %82, %83 : vector<128x64xi32>
    %cst_69 = arith.constant 0.000000e+00 : f32
    %85 = vector.broadcast %cst_69 : f32 to vector<128x64xf32>
    %86 = arith.select %84, %85, %79 : vector<128x64xi1>, vector<128x64xf32>
    %c15_i32 = arith.constant 15 : i32
    %87 = vector.broadcast %c15_i32 : i32 to vector<128x64xi32>
    %88 = arith.cmpi eq, %82, %87 : vector<128x64xi32>
    %cst_70 = arith.constant 0.000000e+00 : f32
    %89 = vector.broadcast %cst_70 : f32 to vector<128x64xf32>
    %90 = arith.select %88, %89, %80 : vector<128x64xi1>, vector<128x64xf32>
    %91 = arith.truncf %74 : vector<128x64xf32> to vector<128x64xbf16>
    %c0_71 = arith.constant 0 : index
    %c0_72 = arith.constant 0 : index
    %92 = vector.load %arg11[%c0_71, %c0_72] : memref<64x128xbf16, #tpu.memory_space<vmem>>, vector<64x128xbf16>
    %cst_73 = arith.constant dense<0.000000e+00> : vector<128x128xf32>
    %93 = tpu.matmul %91, %92, %cst_73 {dimension_numbers = #tpu.dot_dimension_numbers<[1], [0], [0], [1], [0, 0, 1, 1], [], []>} : vector<128x64xbf16>, vector<64x128xbf16>, vector<128x128xf32> -> vector<128x128xf32>
    %94 = arith.truncf %86 : vector<128x64xf32> to vector<128x64xbf16>
    %c0_74 = arith.constant 0 : index
    %c0_75 = arith.constant 0 : index
    %95 = vector.load %arg10[%c0_74, %c0_75] : memref<64x128xbf16, #tpu.memory_space<vmem>>, vector<64x128xbf16>
    %cst_76 = arith.constant dense<0.000000e+00> : vector<128x128xf32>
    %96 = tpu.matmul %94, %95, %cst_76 {dimension_numbers = #tpu.dot_dimension_numbers<[1], [0], [0], [1], [0, 0, 1, 1], [], []>} : vector<128x64xbf16>, vector<64x128xbf16>, vector<128x128xf32> -> vector<128x128xf32>
    %97 = arith.addf %93, %96 : vector<128x128xf32>
    %98 = arith.truncf %90 : vector<128x64xf32> to vector<128x64xbf16>
    %c0_77 = arith.constant 0 : index
    %c0_78 = arith.constant 0 : index
    %99 = vector.load %arg12[%c0_77, %c0_78] : memref<64x128xbf16, #tpu.memory_space<vmem>>, vector<64x128xbf16>
    %cst_79 = arith.constant dense<0.000000e+00> : vector<128x128xf32>
    %100 = tpu.matmul %98, %99, %cst_79 {dimension_numbers = #tpu.dot_dimension_numbers<[1], [0], [0], [1], [0, 0, 1, 1], [], []>} : vector<128x64xbf16>, vector<64x128xbf16>, vector<128x128xf32> -> vector<128x128xf32>
    %101 = arith.addf %97, %100 : vector<128x128xf32>
    %c0_80 = arith.constant 0 : index
    %c0_81 = arith.constant 0 : index
    %102 = vector.load %arg13[%c0_80, %c0_81] : memref<1x128xf32, #tpu.memory_space<vmem>>, vector<1x128xf32>
    %103 = vector.broadcast %102 : vector<1x128xf32> to vector<128x128xf32>
    %104 = arith.addf %101, %103 : vector<128x128xf32>
    %cst_82 = arith.constant 0.000000e+00 : f32
    %105 = vector.broadcast %cst_82 : f32 to vector<128x128xf32>
    %106 = arith.maximumf %104, %105 : vector<128x128xf32>
    %c0_83 = arith.constant 0 : index
    %c0_84 = arith.constant 0 : index
    %107 = vector.load %arg24[%c0_83, %c0_84] : memref<128x128xf32, #tpu.memory_space<vmem>>, vector<128x128xf32>
    tpu.vector_store %arg24[%c0_83, %c0_84], %106 {strides = array<i32>} : memref<128x128xf32, #tpu.memory_space<vmem>>, vector<128x128xf32>,
    %c0_85 = arith.constant 0 : index
    %c0_86 = arith.constant 0 : index
    %108 = tpu.strided_load %arg24[%c0_85, %c0_86] {strides = array<i32: 2, 1>} : memref<128x128xf32, #tpu.memory_space<vmem>>, vector<64x128xf32>
    %c1_87 = arith.constant 1 : index
    %c0_88 = arith.constant 0 : index
    %109 = tpu.strided_load %arg24[%c1_87, %c0_88] {strides = array<i32: 2, 1>} : memref<128x128xf32, #tpu.memory_space<vmem>>, vector<64x128xf32>
    %110 = arith.maximumf %108, %109 : vector<64x128xf32>
    %c0_89 = arith.constant 0 : index
    %c0_90 = arith.constant 0 : index
    %111 = vector.load %arg25[%c0_89, %c0_90] : memref<64x128xf32, #tpu.memory_space<vmem>>, vector<64x128xf32>
    tpu.vector_store %arg25[%c0_89, %c0_90], %110 {strides = array<i32>} : memref<64x128xf32, #tpu.memory_space<vmem>>, vector<64x128xf32>,
    %c0_91 = arith.constant 0 : index
    %c0_92 = arith.constant 0 : index
    %112 = tpu.strided_load %arg25[%c0_91, %c0_92] {strides = array<i32: 8, 1>} : memref<64x128xf32, #tpu.memory_space<vmem>>, vector<8x128xf32>
    %c1_93 = arith.constant 1 : index
    %c0_94 = arith.constant 0 : index
    %113 = tpu.strided_load %arg25[%c1_93, %c0_94] {strides = array<i32: 8, 1>} : memref<64x128xf32, #tpu.memory_space<vmem>>, vector<8x128xf32>
    %c2 = arith.constant 2 : index
    %c0_95 = arith.constant 0 : index
    %114 = tpu.strided_load %arg25[%c2, %c0_95] {strides = array<i32: 8, 1>} : memref<64x128xf32, #tpu.memory_space<vmem>>, vector<8x128xf32>
    %c3 = arith.constant 3 : index
    %c0_96 = arith.constant 0 : index
    %115 = tpu.strided_load %arg25[%c3, %c0_96] {strides = array<i32: 8, 1>} : memref<64x128xf32, #tpu.memory_space<vmem>>, vector<8x128xf32>
    %c4 = arith.constant 4 : index
    %c0_97 = arith.constant 0 : index
    %116 = tpu.strided_load %arg25[%c4, %c0_97] {strides = array<i32: 8, 1>} : memref<64x128xf32, #tpu.memory_space<vmem>>, vector<8x128xf32>
    %c5 = arith.constant 5 : index
    %c0_98 = arith.constant 0 : index
    %117 = tpu.strided_load %arg25[%c5, %c0_98] {strides = array<i32: 8, 1>} : memref<64x128xf32, #tpu.memory_space<vmem>>, vector<8x128xf32>
    %c6 = arith.constant 6 : index
    %c0_99 = arith.constant 0 : index
    %118 = tpu.strided_load %arg25[%c6, %c0_99] {strides = array<i32: 8, 1>} : memref<64x128xf32, #tpu.memory_space<vmem>>, vector<8x128xf32>
    %c7_100 = arith.constant 7 : index
    %c0_101 = arith.constant 0 : index
    %119 = tpu.strided_load %arg25[%c7_100, %c0_101] {strides = array<i32: 8, 1>} : memref<64x128xf32, #tpu.memory_space<vmem>>, vector<8x128xf32>
    %120 = tpu.concatenate %112, %113, %114, %115, %116, %117, %118, %119 in 1 : vector<8x128xf32>, vector<8x128xf32>, vector<8x128xf32>, vector<8x128xf32>, vector<8x128xf32>, vector<8x128xf32>, vector<8x128xf32>, vector<8x128xf32> -> vector<8x1024xf32>
    %121 = arith.truncf %120 : vector<8x1024xf32> to vector<8x1024xbf16>
    %c0_102 = arith.constant 0 : index
    %c0_103 = arith.constant 0 : index
    %122 = vector.load %arg14[%c0_102, %c0_103] : memref<1024x512xbf16, #tpu.memory_space<vmem>>, vector<1024x512xbf16>
    %cst_104 = arith.constant dense<0.000000e+00> : vector<8x512xf32>
    %123 = tpu.matmul %121, %122, %cst_104 {dimension_numbers = #tpu.dot_dimension_numbers<[1], [0], [0], [1], [0, 0, 1, 1], [], []>} : vector<8x1024xbf16>, vector<1024x512xbf16>, vector<8x512xf32> -> vector<8x512xf32>
    %c0_105 = arith.constant 0 : index
    %c0_106 = arith.constant 0 : index
    %124 = vector.load %arg15[%c0_105, %c0_106] : memref<1x512xf32, #tpu.memory_space<vmem>>, vector<1x512xf32>
    %125 = vector.broadcast %124 : vector<1x512xf32> to vector<8x512xf32>
    %126 = arith.addf %123, %125 : vector<8x512xf32>
    %cst_107 = arith.constant 0.000000e+00 : f32
    %127 = vector.broadcast %cst_107 : f32 to vector<8x512xf32>
    %128 = arith.maximumf %126, %127 : vector<8x512xf32>
    %129 = arith.truncf %128 : vector<8x512xf32> to vector<8x512xbf16>
    %c0_108 = arith.constant 0 : index
    %c0_109 = arith.constant 0 : index
    %130 = vector.load %arg16[%c0_108, %c0_109] : memref<512x128xbf16, #tpu.memory_space<vmem>>, vector<512x128xbf16>
    %cst_110 = arith.constant dense<0.000000e+00> : vector<8x128xf32>
    %131 = tpu.matmul %129, %130, %cst_110 {dimension_numbers = #tpu.dot_dimension_numbers<[1], [0], [0], [1], [0, 0, 1, 1], [], []>} : vector<8x512xbf16>, vector<512x128xbf16>, vector<8x128xf32> -> vector<8x128xf32>
    %c0_111 = arith.constant 0 : index
    %c0_112 = arith.constant 0 : index
    %132 = vector.load %arg17[%c0_111, %c0_112] : memref<1x128xf32, #tpu.memory_space<vmem>>, vector<1x128xf32>
    %133 = vector.broadcast %132 : vector<1x128xf32> to vector<8x128xf32>
    %134 = arith.addf %131, %133 : vector<8x128xf32>
    %c0_113 = arith.constant 0 : index
    %c0_114 = arith.constant 0 : index
    %135 = vector.load %arg18[%c0_113, %c0_114] : memref<8x128xf32, #tpu.memory_space<vmem>>, vector<8x128xf32>
    tpu.vector_store %arg18[%c0_113, %c0_114], %134 {strides = array<i32>} : memref<8x128xf32, #tpu.memory_space<vmem>>, vector<8x128xf32>,
    return
  }
  func.func @transform_0(%arg0: i32) -> (i32, i32, i32) {
    %c0_i32 = arith.constant 0 : i32
    %c0_i32_0 = arith.constant 0 : i32
    %c0_i32_1 = arith.constant 0 : i32
    return %arg0, %c0_i32, %c0_i32_0 : i32, i32, i32
  }
  func.func @transform_1(%arg0: i32) -> (i32, i32) {
    %c0_i32 = arith.constant 0 : i32
    %c0_i32_0 = arith.constant 0 : i32
    %c0_i32_1 = arith.constant 0 : i32
    return %c0_i32, %c0_i32_0 : i32, i32
  }
  func.func @transform_2(%arg0: i32) -> (i32, i32) {
    %c0_i32 = arith.constant 0 : i32
    %c0_i32_0 = arith.constant 0 : i32
    %c0_i32_1 = arith.constant 0 : i32
    return %c0_i32, %c0_i32_0 : i32, i32
  }
  func.func @transform_3(%arg0: i32) -> (i32, i32) {
    %c0_i32 = arith.constant 0 : i32
    %c0_i32_0 = arith.constant 0 : i32
    %c0_i32_1 = arith.constant 0 : i32
    return %c0_i32, %c0_i32_0 : i32, i32
  }
  func.func @transform_4(%arg0: i32) -> (i32, i32) {
    %c0_i32 = arith.constant 0 : i32
    %c0_i32_0 = arith.constant 0 : i32
    %c0_i32_1 = arith.constant 0 : i32
    return %c0_i32, %c0_i32_0 : i32, i32
  }
  func.func @transform_5(%arg0: i32) -> (i32, i32) {
    %c0_i32 = arith.constant 0 : i32
    %c0_i32_0 = arith.constant 0 : i32
    %c0_i32_1 = arith.constant 0 : i32
    return %c0_i32, %c0_i32_0 : i32, i32
  }
  func.func @transform_6(%arg0: i32) -> (i32, i32) {
    %c0_i32 = arith.constant 0 : i32
    %c0_i32_0 = arith.constant 0 : i32
    %c0_i32_1 = arith.constant 0 : i32
    return %c0_i32, %c0_i32_0 : i32, i32
  }
  func.func @transform_7(%arg0: i32) -> (i32, i32) {
    %c0_i32 = arith.constant 0 : i32
    %c0_i32_0 = arith.constant 0 : i32
    %c0_i32_1 = arith.constant 0 : i32
    return %c0_i32, %c0_i32_0 : i32, i32
  }
  func.func @transform_8(%arg0: i32) -> (i32, i32) {
    %c0_i32 = arith.constant 0 : i32
    %c0_i32_0 = arith.constant 0 : i32
    %c0_i32_1 = arith.constant 0 : i32
    return %c0_i32, %c0_i32_0 : i32, i32
  }
  func.func @transform_9(%arg0: i32) -> (i32, i32) {
    %c0_i32 = arith.constant 0 : i32
    %c0_i32_0 = arith.constant 0 : i32
    %c0_i32_1 = arith.constant 0 : i32
    return %c0_i32, %c0_i32_0 : i32, i32
  }
  func.func @transform_10(%arg0: i32) -> (i32, i32) {
    %c0_i32 = arith.constant 0 : i32
    %c0_i32_0 = arith.constant 0 : i32
    %c0_i32_1 = arith.constant 0 : i32
    return %c0_i32, %c0_i32_0 : i32, i32
  }
  func.func @transform_11(%arg0: i32) -> (i32, i32) {
    %c0_i32 = arith.constant 0 : i32
    %c0_i32_0 = arith.constant 0 : i32
    %c0_i32_1 = arith.constant 0 : i32
    return %c0_i32, %c0_i32_0 : i32, i32
  }
  func.func @transform_12(%arg0: i32) -> (i32, i32) {
    %c0_i32 = arith.constant 0 : i32
    %c0_i32_0 = arith.constant 0 : i32
    %c0_i32_1 = arith.constant 0 : i32
    return %c0_i32, %c0_i32_0 : i32, i32
  }
  func.func @transform_13(%arg0: i32) -> (i32, i32) {
    %c0_i32 = arith.constant 0 : i32
    %c0_i32_0 = arith.constant 0 : i32
    %c0_i32_1 = arith.constant 0 : i32
    return %c0_i32, %c0_i32_0 : i32, i32
  }
  func.func @transform_14(%arg0: i32) -> (i32, i32) {
    %c0_i32 = arith.constant 0 : i32
    %c0_i32_0 = arith.constant 0 : i32
    %c0_i32_1 = arith.constant 0 : i32
    return %c0_i32, %c0_i32_0 : i32, i32
  }
  func.func @transform_15(%arg0: i32) -> (i32, i32) {
    %c0_i32 = arith.constant 0 : i32
    %c0_i32_0 = arith.constant 0 : i32
    %c0_i32_1 = arith.constant 0 : i32
    return %c0_i32, %c0_i32_0 : i32, i32
  }
  func.func @transform_16(%arg0: i32) -> (i32, i32) {
    %c0_i32 = arith.constant 0 : i32
    %c0_i32_0 = arith.constant 0 : i32
    %c0_i32_1 = arith.constant 0 : i32
    return %c0_i32, %c0_i32_0 : i32, i32
  }
  func.func @transform_17(%arg0: i32) -> (i32, i32) {
    %c0_i32 = arith.constant 0 : i32
    %c0_i32_0 = arith.constant 0 : i32
    return %arg0, %c0_i32 : i32, i32
  }
}

</mosaic_0001>

<bundles_post_ra>
// kernel: tpu_custom_call.1
= control target key start
LH: loop header
LB: loop body
LE: loop exit
PB: predicated region body
PF: predicated region fallthrough
CT: control target
= control target key end

     0   :  { %s9754_s0 = inlined_call_operand.vmem [shape: bf16[16,64,4], index: 0, kind: input, shape index: {}]   ;;  %s9755_s1 = inlined_call_operand.vmem [shape: bf16[4,32], index: 1, kind: input, shape index: {}]   ;;  %s9756_s2 = inlined_call_operand.vmem [shape: bf16[4,32], index: 2, kind: input, shape index: {}]   ;;  %s9757_s3 = inlined_call_operand.vmem [shape: bf16[4,32], index: 3, kind: input, shape index: {}]   ;;  %s9758_s4 = inlined_call_operand.vmem [shape: f32[1,32], index: 4, kind: input, shape index: {}]   ;;  %s9759_s5 = inlined_call_operand.vmem [shape: bf16[32,64], index: 5, kind: input, shape index: {}]   ;;  %s9760_s6 = inlined_call_operand.vmem [shape: bf16[32,64], index: 6, kind: input, shape index: {}]   ;;  %s9761_s7 = inlined_call_operand.vmem [shape: bf16[32,64], index: 7, kind: input, shape index: {}]   ;;  %s9762_s8 = inlined_call_operand.vmem [shape: f32[1,64], index: 8, kind: input, shape index: {}]   ;;  %s9763_s9 = inlined_call_operand.vmem [shape: bf16[64,128], index: 9, kind: input, shape index: {}]   ;;  %s9764_s10 = inlined_call_operand.vmem [shape: bf16[64,128], index: 10, kind: input, shape index: {}]   ;;  %s9765_s11 = inlined_call_operand.vmem [shape: bf16[64,128], index: 11, kind: input, shape index: {}]   ;;  %s9766_s12 = inlined_call_operand.vmem [shape: f32[1,128], index: 12, kind: input, shape index: {}]   ;;  %s9767_s13 = inlined_call_operand.hbm [shape: bf16[1024,512], index: 13, kind: input, shape index: {}]   ;;  %s9768_s14 = inlined_call_operand.vmem [shape: f32[1,512], index: 14, kind: input, shape index: {}]   ;;  %s9769_s15 = inlined_call_operand.vmem [shape: bf16[512,128], index: 15, kind: input, shape index: {}]   ;;  %s9770_s16 = inlined_call_operand.vmem [shape: f32[1,128], index: 16, kind: input, shape index: {}]   ;;  %s9771_s17 = inlined_call_operand.hbm [shape: f32[16,128], index: 17, kind: output, shape index: {}]  }
   0x1   :  { %9777 = sst [smem:[#allocation21_spill]] %s9754_s0 }
   0x2   :  { %9778 = sst [smem:[#allocation22_spill]] %s9755_s1 }
   0x3   :  { %9779 = sst [smem:[#allocation23_spill]] %s9756_s2 }
   0x4   :  { %9780 = sst [smem:[#allocation24_spill]] %s9767_s13 }
   0x5   :  { %22 = vsyncpa [#allocation10], 0 }
   0x6   :  { %23 = vsyncpa [#allocation11], 0 }
   0x7   :  { %25 = vsyncpa [#allocation11 + $0x1], 0  ;;  %s8328_s24 = smov 0   ;;  %s8330_s25 = smov 0  }
   0x8   :  { %s8332_s26 = smov 0   ;;  %s8334_s27 = smov 0  }
   0x9 LB: > { %9781 = sst [smem:[#allocation15_spill]] %s8228_s26  ;;  %s8349_s28 = sadd.s32 4294967295, %s8232_s27   ;;  %s8232_s27 = sphi %s8334_s27, %s9811_s27   ;;  %s8228_s26 = sphi %s8332_s26, %s9813_s26   ;;  %s8224_s25 = sphi %s8330_s25, %s9815_s25   ;;  %s8220_s24 = sphi %s8328_s24, %s9814_s24  }
   0xa   : > { %s6205_s29 = sadd.s32 4294967294, %s8232_s27   ;;  %s8353_s0 = sadd.s32 1, %s8232_s27  }
   0xb   : > { %9782 = sst [smem:[#allocation16_spill]] %s8353_s0  ;;  %s400_s30 = sadd.s32 1, %s8228_s26 }
   0xc   : > { %s397_s18 = ssub.s32 %s8232_s27, %s8353_s0  ;;  %p410_p0 = scmp.ne.s32.totalorder %s8228_s26, %s8224_s25 }
   0xd   : > { %p398_p1 = scmp.eq.s32.totalorder %s397_s18, 0  ;;  %p411_p2 = scmp.eq.s32.totalorder %s8349_s28, 1 }
   0xe   : > { %p416_p3 = scmp.ne.s32.totalorder %s8224_s25, %s8220_s24  ;;  %p417_p4 = scmp.eq.s32.totalorder %s6205_s29, 1 }
   0xf   : > { %s8364_s19 = scalar_select %p398_p1, %s8228_s26, %s400_s30  }
  0x10   : > { %p8366_p5 = por %p411_p2, %p410_p0  ;;  %p8370_p6 = por %p417_p4, %p416_p3 }
  0x11   : > { %9783 = sst [smem:[#allocation17_spill]] %s8364_s19  ;;  %p6206_p7 = scmp.ge.s32.totalorder %s8232_s27, 1 }
  0x12   : > { %p424_p8 = scmp.lt.s32.totalorder %s8232_s27, 3  ;;  %p8091_p9 = scmp.eq.s32.totalorder %s8349_s28, 0 }
  0x13   : > { %s9786_s13 = sld [smem:[#allocation24_spill]]  ;;  %s8234_s29 = smov [#allocation9]  }
  0x14   : > { %p425_p10 = pnand %p6206_p7, %p424_p8  ;;  %s473_s30 = sshll.u32 %s8234_s29, 4  ;;  %s474_s30 = int_to_ptr.vmem [resolvable:$true] %s473_s30 }
  0x15   : > { %s8235_s18 = smov 256   ;;  %s8236_s19 = smov 16  }
  0x16   : > { %p8083_p11 = pneg %p425_p10  ;;  %508 = sbr.rel (%p425_p10) target bundleno = 1812 (0x714), region = 88 }
  0x18   : > { %p8084_p12 = pnand %p8091_p9, %p8083_p11 }
  0x19   : > { %s471_s23 = sshll.u32 %s9786_s13, 4  ;;  %s472_s23 = int_to_ptr.hbm [resolvable:$true] %s471_s23 }
  0x1a   : > { %8086 = dma.hbm_to_vmem [thread:$0]  (!%p8084_p12), %s472_s23, 32768, %s474_s30, [#allocation10], %s8235_s18, %s8235_s18, %s8236_s19  }
  0x1b   : > { %8211 = dma.done.wait (%p8091_p9), [#allocation10], 32768  }
  0x1c   : > { %8213 = vsyncadd (%p8091_p9), [#allocation10], 4294934528  ;;  %s8387_s21 = sshll.u32 %s8349_s28, 3  ;;  %vm698_vm0 = vcmask 24576   ;;  %v9775_v0 = vmov 0.0   ;;  %vm1209_vm1 = vcmask 1041408   ;;  %v894_v4 = vlaneseq }
  0x1d   : > { %p563_p13 = scmp.lt.s32.totalorder %s8387_s21, 15  ;;  %699 = vst.msk [vmem:[#allocation2 + $0x7] sm:$0x1] %vm698_vm0, %v9775_v0  ;;  %s9787_s30 = sld [smem:[#allocation21_spill]]  ;;  %vm701_vm2 = vcmask 31744   ;;  %vm2371_vm5 = vcmask 253952  }
  0x1e   : > { %700 = vst.msk [vmem:[#allocation2 + $0x208] sm:$0x1] %vm698_vm0, %v9775_v0  ;;  %s9788_s2 = sld [smem:[#allocation23_spill]]  ;;  %v1682_v3 = vld [vmem:[%s9757_s3] sm:$0x3]  ;;  %v8416_v17 = vshrl.u32 %v894_v4, 7 }
  0x1f   : > { %s564_s22 = scalar_select %p563_p13, %s8387_s21, 15  ;;  %v1780_v8 = vsel %vm1209_vm1, %v1682_v3, 0  ;;  %2372 = vst.msk [vmem:[#allocation4 + $0x7] sm:$0x1] %vm2371_vm5, %v9775_v0  ;;  %vm2147_vm6 = vcmask 261120   ;;  %vm3257_vm8 = vcmask 516096  }
  0x20   : > { %1789 = vmatpush.bf16.msra.mxu2 %v1780_v8  ;;  %vm903_vm3 = vcmp.eq.s32.totalorder %v8416_v17, 0  ;;  %v8442_v45 = vadd.s32 56, %v8416_v17  ;;  %2373 = vst.msk [vmem:[#allocation4 + $0x108] sm:$0x1] %vm2371_vm5, %v9775_v0  ;;  %vm3145_vm9 = vcmask 523264  }
  0x21   : > { %s7611_s19 = sshll.u32 %s564_s22, 5 }
  0x22   : > { %vm982_vm4 = vcmp.eq.s32.totalorder %v8442_v45, 63 }
  0x23   : > { %s8396_s18 = scalar_lea.vmem %s9787_s30, %s7611_s19  ;;  %s9789_s19 = sld [smem:[#allocation22_spill]] }
  0x24   : > { %v1079_v1 = vld [vmem:[%s9788_s2] sm:$0x3]  ;;  %v8046_v10 = vld [vmem:[%s8396_s18 + $0x8] sm:$0xff]   ;;  %v8047_v11 = vld [vmem:[%s8396_s18 + $0x10] sm:$0xff]   ;;  %s559_s30 = sand.u32 1, %s8224_s25  }
  0x25   : > { %v7919_v2 = vld [vmem:[%s8396_s18] sm:$0xff]   ;;  %v1479_v5 = vsel %vm1209_vm1, %v1079_v1, 0  ;;  %v7924_v13 = vunpack.c.l.bf16 %v8046_v10  ;;  %v7925_v14 = vunpack.c.h.bf16 %v8046_v10  ;;  %v8048_v15 = vld [vmem:[%s8396_s18 + $0x18] sm:$0xff]   ;;  %v7928_v16 = vunpack.c.l.bf16 %v8047_v11  ;;  %v8050_v36 = vld [vmem:[%s8396_s18 + $0x28] sm:$0xff]   ;;  %s6211_s28 = sshll.u32 %s559_s30, 3  ;;  %s6119_s23 = scalar_lea.sflag [#allocation11], %s559_s30 }
  0x26   : > { %v7920_v6 = vunpack.c.l.bf16 %v7919_v2  ;;  %v7921_v7 = vunpack.c.h.bf16 %v7919_v2  ;;  %1488 = vmatpush.bf16.msra.mxu1 %v1479_v5  ;;  %v7929_v18 = vunpack.c.h.bf16 %v8047_v11  ;;  %v7932_v19 = vunpack.c.l.bf16 %v8048_v15  ;;  %v8049_v27 = vld [vmem:[%s8396_s18 + $0x20] sm:$0xff]   ;;  %v8051_v46 = vld [vmem:[%s8396_s18 + $0x30] sm:$0xff]   ;;  %v8052_v56 = vld [vmem:[%s8396_s18 + $0x38] sm:$0xff]   ;;  %s561_s26 = scalar_lea.vmem [#allocation12], %s6211_s28 }
  0x27   : > { %704 = vst.msk [vmem:[#allocation2 + $0x18] sm:$0xff] %vm701_vm2, %v7924_v13  ;;  %v7933_v28 = vunpack.c.h.bf16 %v8048_v15  ;;  %v7936_v29 = vunpack.c.l.bf16 %v8049_v27  ;;  %v7937_v37 = vunpack.c.h.bf16 %v8049_v27  ;;  %v7940_v38 = vunpack.c.l.bf16 %v8050_v36  ;;  %v8053_v3 = vld [vmem:[%s8396_s18 + $0x40] sm:$0xff]  }
  0x28   : > { %702 = vst.msk [vmem:[#allocation2 + $0x8] sm:$0xff] %vm701_vm2, %v7920_v6  ;;  %v7941_v47 = vunpack.c.h.bf16 %v8050_v36  ;;  %v7944_v48 = vunpack.c.l.bf16 %v8051_v46  ;;  %v7945_v57 = vunpack.c.h.bf16 %v8051_v46  ;;  %v7948_v58 = vunpack.c.l.bf16 %v8052_v56 }
  0x29   : > { %v1112_v9 = vld [vmem:[%s9789_s19] sm:$0x3]  ;;  %703 = vst.msk [vmem:[#allocation2 + $0x10] sm:$0xff] %vm701_vm2, %v7921_v7  ;;  %6247 = vmatmul.msk.bf16.vlgmr.msra.gmra.mxu1 %vm701_vm2, %v7919_v2  ;;  %v7949_v4 = vunpack.c.h.bf16 %v8052_v56  ;;  %v7952_v5 = vunpack.c.l.bf16 %v8053_v3  ;;  %v7953_v13 = vunpack.c.h.bf16 %v8053_v3  ;;  %s6129_s19 = scalar_lea.hbm %s9771_s17, %s8387_s21  ;;  %s8186_s21 = scalar_lea.hbm %s9771_s17, 16 }
  0x2a   : > { %v1211_v12 = vsel %vm1209_vm1, %v1112_v9, 0  ;;  %705 = vst.msk [vmem:[#allocation2 + $0x20] sm:$0xff] %vm701_vm2, %v7925_v14  ;;  %s6133_s0 = sshll.u32 %s6129_s19, 4  ;;  %s6134_s0 = int_to_ptr.hbm [resolvable:$true] %s6133_s0 }
  0x2b   : > { %1220 = vmatpush.bf16.msra.mxu0 %v1211_v12  ;;  %706 = vst.msk [vmem:[#allocation2 + $0x28] sm:$0xff] %vm701_vm2, %v7928_v16  ;;  %v8054_v12 = vld [vmem:[%s8396_s18 + $0x48] sm:$0xff]   ;;  %s8180_s29 = sshra.s32 %s6134_s0, 4  ;;  %s8181_s29 = int_to_ptr.hbm [resolvable:$true] %s8180_s29 }
  0x2c   : > { %707 = vst.msk [vmem:[#allocation2 + $0x30] sm:$0xff] %vm701_vm2, %v7929_v18  ;;  %v7956_v14 = vunpack.c.l.bf16 %v8054_v12  ;;  %s8182_s2 = scalar_lea.hbm %s8181_s29, 8  ;;  %p8187_p3 = scmp.lt.s32.totalorder %s8181_s29, %s9771_s17 }
  0x2d   : > { %708 = vst.msk [vmem:[#allocation2 + $0x38] sm:$0xff] %vm701_vm2, %v7932_v19  ;;  %p8183_p0 = scmp.ne.s32.totalorder %s8181_s29, %s8182_s2  ;;  %p8188_p4 = scmp.lt.s32.totalorder %s8186_s21, %s8182_s2 }
  0x2e   : > { %709 = vst.msk [vmem:[#allocation2 + $0x40] sm:$0xff] %vm701_vm2, %v7933_v28 }
  0x2f   : > { %v766_v20 = vld [vmem:[#allocation2 + $0x7] sm:$0xff]  ;;  %710 = vst.msk [vmem:[#allocation2 + $0x48] sm:$0xff] %vm701_vm2, %v7936_v29  ;;  %p8184_p1 = pnand %p8183_p0, %p8366_p5  ;;  %p8189_p7 = por %p8188_p4, %p8187_p3 }
  0x30   : > { %v830_v21 = vld [vmem:[#allocation2 + $0x9] sm:$0xff]  ;;  %v911_v23 = vsel %vm903_vm3, 0.0, %v766_v20  ;;  %v831_v24 = vld [vmem:[#allocation2 + $0x11] sm:$0xff]  ;;  %711 = vst.msk [vmem:[#allocation2 + $0x50] sm:$0xff] %vm701_vm2, %v7937_v37 }
  0x31   : > { %v767_v22 = vld [vmem:[#allocation2 + $0xf] sm:$0xff]  ;;  %v1650_v26 = vpack.c.bf16 %v831_v24, %v830_v21  ;;  %v768_v30 = vld [vmem:[#allocation2 + $0x17] sm:$0xff]  ;;  %v769_v31 = vld [vmem:[#allocation2 + $0x1f] sm:$0xff]  ;;  %712 = vst.msk [vmem:[#allocation2 + $0x58] sm:$0xff] %vm701_vm2, %v7940_v38  ;;  %p8185_p2 = pneg %p8184_p1 }
  0x32   : > { %v1080_v25 = vpack.c.bf16 %v767_v22, %v911_v23  ;;  %v832_v32 = vld [vmem:[#allocation2 + $0x19] sm:$0xff]  ;;  %v833_v33 = vld [vmem:[#allocation2 + $0x21] sm:$0xff]  ;;  %v1081_v34 = vpack.c.bf16 %v769_v31, %v768_v30  ;;  %713 = vst.msk [vmem:[#allocation2 + $0x60] sm:$0xff] %vm701_vm2, %v7941_v47  ;;  %v8474_v22 = vld [vmem:[%s8396_s18 + $0x50] sm:$0xff]   ;;  %v7957_v23 = vunpack.c.h.bf16 %v8054_v12 }
  0x33   : > { %6279 = vmatmul.msk.bf16.vlgmr.msra.gmra.mxu2 %vm701_vm2, %v1650_v26  ;;  %v1651_v35 = vpack.c.bf16 %v833_v33, %v832_v32  ;;  %v770_v39 = vld [vmem:[#allocation2 + $0x27] sm:$0xff]  ;;  %v771_v40 = vld [vmem:[#allocation2 + $0x2f] sm:$0xff]  ;;  %714 = vst.msk [vmem:[#allocation2 + $0x68] sm:$0xff] %vm701_vm2, %v7944_v48  ;;  %v7960_v24 = vunpack.c.l.bf16 %v8474_v22  ;;  %v8485_v33 = vld [vmem:[%s8396_s18 + $0x58] sm:$0xff]   ;;  %p8190_p8 = pnand %p8189_p7, %p8185_p2 }
  0x34   : > { %6215 = vmatmul.msk.bf16.vlgmr.msra.gmra.mxu0 %vm701_vm2, %v1080_v25  ;;  %v834_v41 = vld [vmem:[#allocation2 + $0x29] sm:$0xff]  ;;  %v835_v42 = vld [vmem:[#allocation2 + $0x31] sm:$0xff]  ;;  %v1082_v43 = vpack.c.bf16 %v771_v40, %v770_v39  ;;  %715 = vst.msk [vmem:[#allocation2 + $0x70] sm:$0xff] %vm701_vm2, %v7945_v57  ;;  %v8501_v47 = vld [vmem:[%s9758_s4] ss:$0 sm:$0xff] }
  0x35   : > { %v1652_v44 = vpack.c.bf16 %v835_v42, %v834_v41  ;;  %v772_v50 = vld [vmem:[#allocation2 + $0x37] sm:$0xff]  ;;  %v773_v51 = vld [vmem:[#allocation2 + $0x3f] sm:$0xff]  ;;  %716 = vst.msk [vmem:[#allocation2 + $0x78] sm:$0xff] %vm701_vm2, %v7948_v58 }
  0x36   : > { %v837_v49 = vld [vmem:[#allocation2 + $0x41] sm:$0xff]  ;;  %v836_v52 = vld [vmem:[#allocation2 + $0x39] sm:$0xff]  ;;  %v1083_v54 = vpack.c.bf16 %v773_v51, %v772_v50  ;;  %717 = vst.msk [vmem:[#allocation2 + $0x80] sm:$0xff] %vm701_vm2, %v7949_v4  ;;  %v7965_v51 = vunpack.c.h.bf16 %v8485_v33 }
  0x37   : > { %v990_v53 = vsel %vm982_vm4, 0.0, %v837_v49  ;;  %v774_v59 = vld [vmem:[#allocation2 + $0x47] sm:$0xff]  ;;  %v775_v60 = vld [vmem:[#allocation2 + $0x4f] sm:$0xff]  ;;  %718 = vst.msk [vmem:[#allocation2 + $0x88] sm:$0xff] %vm701_vm2, %v7952_v5 }
  0x38   : > { %v1653_v55 = vpack.c.bf16 %v990_v53, %v836_v52  ;;  %v919_v61 = vsel %vm903_vm3, 0.0, %v774_v59  ;;  %v838_v62 = vld [vmem:[#allocation2 + $0x49] sm:$0xff]  ;;  %v839_v63 = vld [vmem:[#allocation2 + $0x51] sm:$0xff]  ;;  %719 = vst.msk [vmem:[#allocation2 + $0x90] sm:$0xff] %vm701_vm2, %v7953_v13  ;;  %v8504_v48 = vld [vmem:[%s8396_s18 + $0x60] sm:$0xff]  }
  0x39   : > { %6248 = vmatmul.msk.bf16.gmra.mxu1 %vm701_vm2, %v8046_v10  ;;  %v1084_v1 = vpack.c.bf16 %v775_v60, %v919_v61  ;;  %v1654_v2 = vpack.c.bf16 %v839_v63, %v838_v62  ;;  %v776_v6 = vld [vmem:[#allocation2 + $0x57] sm:$0xff]  ;;  %v777_v7 = vld [vmem:[#allocation2 + $0x5f] sm:$0xff]  ;;  %720 = vst.msk [vmem:[#allocation2 + $0x98] sm:$0xff] %vm701_vm2, %v7956_v14  ;;  %v7968_v52 = vunpack.c.l.bf16 %v8504_v48  ;;  %v7615_v5 = vld [vmem:[%s9759_s5 + $0x8] sm:$0xff] }
  0x3a   : > { %v840_v8 = vld [vmem:[#allocation2 + $0x59] sm:$0xff]  ;;  %v841_v9 = vld [vmem:[#allocation2 + $0x61] sm:$0xff]  ;;  %v1085_v10 = vpack.c.bf16 %v777_v7, %v776_v6  ;;  %721 = vst.msk [vmem:[#allocation2 + $0xa0] sm:$0xff] %vm701_vm2, %v7957_v23  ;;  %2644 = vmatpush.bf16.msra.mxu3 %v7615_v5 }
  0x3b   : > { %v779_v16 = vld [vmem:[#allocation2 + $0x6f] sm:$0xff]  ;;  %722 = vst.msk [vmem:[#allocation2 + $0xa8] sm:$0xff] %vm701_vm2, %v7960_v24 }
  0x3c   : > { %v842_v18 = vld [vmem:[#allocation2 + $0x69] sm:$0xff]  ;;  %v843_v19 = vld [vmem:[#allocation2 + $0x71] sm:$0xff]  ;;  %725 = vst.msk [vmem:[#allocation2 + $0xc0] sm:$0xff] %vm701_vm2, %v7965_v51 }
  0x3d   : > { %v1656_v21 = vpack.c.bf16 %v843_v19, %v842_v18  ;;  %v780_v26 = vld [vmem:[#allocation2 + $0x77] sm:$0xff]  ;;  %726 = vst.msk [vmem:[#allocation2 + $0xc8] sm:$0xff] %vm701_vm2, %v7968_v52 }
  0x3e   : > { %v845_v25 = vld [vmem:[#allocation2 + $0x81] sm:$0xff]  ;;  %v844_v28 = vld [vmem:[#allocation2 + $0x79] sm:$0xff] }
  0x3f   : > { %v998_v29 = vsel %vm982_vm4, 0.0, %v845_v25  ;;  %v783_v37 = vld [vmem:[#allocation2 + $0x8f] sm:$0xff] }
  0x40   : > { %v1657_v31 = vpack.c.bf16 %v998_v29, %v844_v28  ;;  %v846_v39 = vld [vmem:[#allocation2 + $0x89] sm:$0xff]  ;;  %v847_v40 = vld [vmem:[#allocation2 + $0x91] sm:$0xff] }
  0x41   : > { %v784_v57 = vld [vmem:[#allocation2 + $0x97] sm:$0xff]  ;;  %v785_v58 = vld [vmem:[#allocation2 + $0x9f] sm:$0xff] }
  0x42   : > { %v848_v59 = vld [vmem:[#allocation2 + $0x99] sm:$0xff]  ;;  %v849_v60 = vld [vmem:[#allocation2 + $0xa1] sm:$0xff]  ;;  %v1089_v63 = vpack.c.bf16 %v785_v58, %v784_v57 }
  0x43   : > { %6280 = vmatmul.msk.bf16.gmra.mxu2 %vm701_vm2, %v1651_v35  ;;  %v7964_v35 = vunpack.c.l.bf16 %v8485_v33  ;;  %v1659_v4 = vpack.c.bf16 %v849_v60, %v848_v59 }
  0x44   : > { %6216 = vmatmul.msk.bf16.gmra.mxu0 %vm701_vm2, %v1081_v34  ;;  %v7961_v34 = vunpack.c.h.bf16 %v8474_v22 }
  0x45   : > { %724 = vst.msk [vmem:[#allocation2 + $0xb8] sm:$0xff] %vm701_vm2, %v7964_v35 }
  0x46   : > { %723 = vst.msk [vmem:[#allocation2 + $0xb0] sm:$0xff] %vm701_vm2, %v7961_v34 }
  0x49   : > { %6249 = vmatmul.msk.bf16.gmra.mxu1 %vm701_vm2, %v8047_v11  ;;  %v1655_v11 = vpack.c.bf16 %v841_v9, %v840_v8  ;;  %v7614_v9 = vld [vmem:[%s9759_s5] sm:$0xff] }
  0x4a   : > { %2645 = vmatpush.bf16.msra.mxu3 %v7614_v9 }
  0x4c   : > { %v789_v52 = vld [vmem:[#allocation2 + $0xbf] sm:$0xff] }
  0x4d   : > { %v787_v23 = vld [vmem:[#allocation2 + $0xaf] sm:$0xff]  ;;  %v788_v51 = vld [vmem:[#allocation2 + $0xb7] sm:$0xff] }
  0x4e   : > { %v1091_v59 = vpack.c.bf16 %v789_v52, %v788_v51 }
  0x53   : > { %6281 = vmatmul.msk.bf16.gmra.mxu2 %vm701_vm2, %v1652_v44  ;;  %v1658_v44 = vpack.c.bf16 %v847_v40, %v846_v39  ;;  %v8543_v40 = vld [vmem:[%s8396_s18 + $0x70] sm:$0xff]  }
  0x54   : > { %6217 = vmatmul.msk.bf16.gmra.mxu0 %vm701_vm2, %v1082_v43 }
  0x59   : > { %6250 = vmatmul.msk.bf16.gmra.mxu1 %vm701_vm2, %v8048_v15  ;;  %v778_v15 = vld [vmem:[#allocation2 + $0x67] sm:$0xff] }
  0x5a   : > { %v1086_v20 = vpack.c.bf16 %v779_v16, %v778_v15  ;;  %v7969_v15 = vunpack.c.h.bf16 %v8504_v48 }
  0x5c   : > { %727 = vst.msk [vmem:[#allocation2 + $0xd0] sm:$0xff] %vm701_vm2, %v7969_v15  ;;  %v7977_v15 = vunpack.c.h.bf16 %v8543_v40 }
  0x5e   : > { %731 = vst.msk [vmem:[#allocation2 + $0xf0] sm:$0xff] %vm701_vm2, %v7977_v15 }
  0x63   : > { %6282 = vmatmul.msk.bf16.gmra.mxu2 %vm701_vm2, %v1653_v55 }
  0x64   : > { %6218 = vmatmul.msk.bf16.gmra.mxu0 %vm701_vm2, %v1083_v54 }
  0x69   : > { %6251 = vmatmul.msk.bf16.gmra.mxu1 %vm701_vm2, %v8049_v27  ;;  %v781_v27 = vld [vmem:[#allocation2 + $0x7f] sm:$0xff] }
  0x6a   : > { %v1087_v30 = vpack.c.bf16 %v781_v27, %v780_v26  ;;  %v851_v26 = vld [vmem:[#allocation2 + $0xb1] sm:$0xff] }
  0x73   : > { %6283 = vmatmul.msk.bf16.gmra.mxu2 %vm701_vm2, %v1654_v2 }
  0x74   : > { %6219 = vmatmul.msk.bf16.gmra.mxu0 %vm701_vm2, %v1084_v1 }
  0x79   : > { %6252 = vmatmul.msk.bf16.gmra.mxu1 %vm701_vm2, %v8050_v36  ;;  %v782_v36 = vld [vmem:[#allocation2 + $0x87] sm:$0xff] }
  0x7a   : > { %v927_v38 = vsel %vm903_vm3, 0.0, %v782_v36 }
  0x7b   : > { %v1088_v41 = vpack.c.bf16 %v783_v37, %v927_v38 }
  0x83   : > { %6284 = vmatmul.msk.bf16.gmra.mxu2 %vm701_vm2, %v1655_v11 }
  0x84   : > { %6220 = vmatmul.msk.bf16.gmra.mxu0 %vm701_vm2, %v1085_v10 }
  0x89   : > { %6253 = vmatmul.msk.bf16.gmra.mxu1 %vm701_vm2, %v8051_v46 }
  0x93   : > { %6285 = vmatmul.msk.bf16.gmra.mxu2 %vm701_vm2, %v1656_v21  ;;  %v786_v21 = vld [vmem:[#allocation2 + $0xa7] sm:$0xff] }
  0x94   : > { %6221 = vmatmul.msk.bf16.gmra.mxu0 %vm701_vm2, %v1086_v20  ;;  %v850_v20 = vld [vmem:[#allocation2 + $0xa9] sm:$0xff] }
  0x95   : > { %v1660_v34 = vpack.c.bf16 %v851_v26, %v850_v20 }
  0x99   : > { %6254 = vmatmul.msk.bf16.gmra.mxu1 %vm701_vm2, %v8052_v56 }
  0xa3   : > { %6286 = vmatmul.msk.bf16.gmra.mxu2 %vm701_vm2, %v1657_v31 }
  0xa4   : > { %6222 = vmatmul.msk.bf16.gmra.mxu0 %vm701_vm2, %v1087_v30  ;;  %v1090_v30 = vpack.c.bf16 %v787_v23, %v786_v21  ;;  %v854_v21 = vld [vmem:[#allocation2 + $0xc9] sm:$0xff] }
  0xa5   : > { %v791_v23 = vld [vmem:[#allocation2 + $0xcf] sm:$0xff] }
  0xa6   : > { %v1490_v32 = vpop.f32.mrf.mxu1 }
  0xa9   : > { %6255 = vmatmul.msk.bf16.gmra.mxu1 %vm701_vm2, %v8053_v3 }
  0xae   : > { %v1492_v42 = vpop.f32.mrf.mxu1 }
  0xb1   : > { %v1222_v43 = vpop.f32.mrf.mxu0 }
  0xb2   : > { %v1491_v46 = vadd.f32 %v1490_v32, %v1222_v43 }
  0xb3   : > { %6287 = vmatmul.msk.bf16.gmra.mxu2 %vm701_vm2, %v1658_v44  ;;  %v7976_v44 = vunpack.c.l.bf16 %v8543_v40 }
  0xb4   : > { %6223 = vmatmul.msk.bf16.gmra.mxu0 %vm701_vm2, %v1088_v41 }
  0xb5   : > { %730 = vst.msk [vmem:[#allocation2 + $0xe8] sm:$0xff] %vm701_vm2, %v7976_v44 }
  0xb6   : > { %v1791_v49 = vpop.f32.mrf.mxu2  ;;  %v1495_v50 = vpop.f32.mrf.mxu1 }
  0xb7   : > { %v1951_v53 = vadd.f32 %v1791_v49, %v1491_v46  ;;  %v853_v49 = vld [vmem:[#allocation2 + $0xc1] sm:$0xff] }
  0xb9   : > { %v1224_v54 = vpop.f32.mrf.mxu0  ;;  %v2019_v55 = vadd.f32 %v8501_v47, %v1951_v53  ;;  %6256 = vmatmul.msk.bf16.gmra.mxu1 %vm701_vm2, %v8054_v12  ;;  %v8524_v12 = vld [vmem:[%s8396_s18 + $0x68] sm:$0xff]  }
  0xba   : > { %v1493_v61 = vadd.f32 %v1492_v42, %v1224_v54  ;;  %v7972_v16 = vunpack.c.l.bf16 %v8524_v12  ;;  %v7973_v43 = vunpack.c.h.bf16 %v8524_v12 }
  0xbb   : > { %v2083_v56 = vmax.f32 %v2019_v55, 0.0  ;;  %v852_v55 = vld [vmem:[#allocation2 + $0xb9] sm:$0xff] }
  0xbc   : > { %728 = vst.msk [vmem:[#allocation2 + $0xd8] sm:$0xff] %vm701_vm2, %v7972_v16 }
  0xbd   : > { %2148 = vst.msk [vmem:[#allocation3] sm:$0xff] %vm2147_vm6, %v2083_v56  ;;  %v1006_v56 = vsel %vm982_vm4, 0.0, %v853_v49 }
  0xbe   : > { %v1793_v62 = vpop.f32.mrf.mxu2  ;;  %v1497_v1 = vpop.f32.mrf.mxu1  ;;  %729 = vst.msk [vmem:[#allocation2 + $0xe0] sm:$0xff] %vm701_vm2, %v7973_v43 }
  0xbf   : > { %v1952_v2 = vadd.f32 %v1793_v62, %v1493_v61 }
  0xc1   : > { %v1227_v3 = vpop.f32.mrf.mxu0  ;;  %v2020_v6 = vadd.f32 %v8501_v47, %v1952_v2 }
  0xc2   : > { %v1496_v8 = vadd.f32 %v1495_v50, %v1227_v3 }
  0xc3   : > { %v2084_v7 = vmax.f32 %v2020_v6, 0.0  ;;  %6288 = vmatmul.msk.bf16.gmra.mxu2 %vm701_vm2, %v1659_v4 }
  0xc4   : > { %6224 = vmatmul.msk.bf16.gmra.mxu0 %vm701_vm2, %v1089_v63  ;;  %v1661_v63 = vpack.c.bf16 %v1006_v56, %v852_v55 }
  0xc5   : > { %2149 = vst.msk [vmem:[#allocation3 + $0x8] sm:$0xff] %vm2147_vm6, %v2084_v7  ;;  %v856_v52 = vld [vmem:[#allocation2 + $0xd9] sm:$0xff] }
  0xc6   : > { %v1796_v10 = vpop.f32.mrf.mxu2  ;;  %v1500_v11 = vpop.f32.mrf.mxu1 }
  0xc7   : > { %v1953_v13 = vadd.f32 %v1796_v10, %v1496_v8  ;;  %v8568_v10 = vld [vmem:[%s8396_s18 + $0x78] sm:$0xff]  }
  0xc8   : > { %v7980_v16 = vunpack.c.l.bf16 %v8568_v10  ;;  %v7981_v43 = vunpack.c.h.bf16 %v8568_v10 }
  0xc9   : > { %v1229_v14 = vpop.f32.mrf.mxu0  ;;  %v2021_v18 = vadd.f32 %v8501_v47, %v1953_v13  ;;  %6257 = vmatmul.msk.bf16.gmra.mxu1 %vm701_vm2, %v8474_v22 }
  0xca   : > { %v1498_v27 = vadd.f32 %v1497_v1, %v1229_v14  ;;  %732 = vst.msk [vmem:[#allocation2 + $0xf8] sm:$0xff] %vm701_vm2, %v7980_v16 }
  0xcb   : > { %v2085_v19 = vmax.f32 %v2021_v18, 0.0  ;;  %v790_v18 = vld [vmem:[#allocation2 + $0xc7] sm:$0xff]  ;;  %733 = vst.msk [vmem:[#allocation2 + $0x100] sm:$0xff] %vm701_vm2, %v7981_v43 }
  0xcc   : > { %v2212_v24 = vld [vmem:[#allocation3] ss:$2 sm:$0xff]  ;;  %v2276_v25 = vld [vmem:[#allocation3 + $0x1] ss:$2 sm:$0xff] }
  0xcd   : > { %2150 = vst.msk [vmem:[#allocation3 + $0x10] sm:$0xff] %vm2147_vm6, %v2085_v19  ;;  %v8534_v28 = vmax.f32 %v2212_v24, %v2276_v25  ;;  %v935_v24 = vsel %vm903_vm3, 0.0, %v790_v18 }
  0xce   : > { %v1798_v29 = vpop.f32.mrf.mxu2  ;;  %v1502_v22 = vpop.f32.mrf.mxu1 }
  0xcf   : > { %v1954_v31 = vadd.f32 %v1798_v29, %v1498_v27  ;;  %2374 = vst.msk [vmem:[#allocation4 + $0x8] sm:$0xff] %vm2147_vm6, %v8534_v28  ;;  %v855_v27 = vld [vmem:[#allocation2 + $0xd1] sm:$0xff] }
  0xd1   : > { %v1232_v32 = vpop.f32.mrf.mxu0  ;;  %v2022_v35 = vadd.f32 %v8501_v47, %v1954_v31 }
  0xd2   : > { %v1501_v37 = vadd.f32 %v1500_v11, %v1232_v32 }
  0xd3   : > { %v2086_v36 = vmax.f32 %v2022_v35, 0.0  ;;  %6289 = vmatmul.msk.bf16.gmra.mxu2 %vm701_vm2, %v1660_v34  ;;  %v1662_v35 = vpack.c.bf16 %v855_v27, %v854_v21 }
  0xd4   : > { %6225 = vmatmul.msk.bf16.gmra.mxu0 %vm701_vm2, %v1090_v30 }
  0xd5   : > { %2151 = vst.msk [vmem:[#allocation3 + $0x18] sm:$0xff] %vm2147_vm6, %v2086_v36 }
  0xd6   : > { %v1801_v38 = vpop.f32.mrf.mxu2  ;;  %v1505_v39 = vpop.f32.mrf.mxu1  ;;  %v2406_v5 = vld [vmem:[#allocation4 + $0x7] sm:$0xff] }
  0xd7   : > { %v1955_v41 = vadd.f32 %v1801_v38, %v1501_v37  ;;  %v2470_v8 = vsel %vm903_vm3, 0.0, %v2406_v5 }
  0xd9   : > { %v1234_v42 = vpop.f32.mrf.mxu0  ;;  %v2023_v46 = vadd.f32 %v8501_v47, %v1955_v41  ;;  %6258 = vmatmul.msk.bf16.gmra.mxu1 %vm701_vm2, %v8485_v33 }
  0xda   : > { %v1503_v57 = vadd.f32 %v1502_v22, %v1234_v42  ;;  %v1092_v22 = vpack.c.bf16 %v791_v23, %v935_v24  ;;  %v858_v23 = vld [vmem:[#allocation2 + $0xe9] sm:$0xff] }
  0xdb   : > { %v2087_v50 = vmax.f32 %v2023_v46, 0.0  ;;  %v794_v24 = vld [vmem:[#allocation2 + $0xe7] sm:$0xff] }
  0xdc   : > { %v2214_v53 = vld [vmem:[#allocation3 + $0x10] ss:$2 sm:$0xff]  ;;  %v2278_v54 = vld [vmem:[#allocation3 + $0x11] ss:$2 sm:$0xff] }
  0xdd   : > { %2152 = vst.msk [vmem:[#allocation3 + $0x20] sm:$0xff] %vm2147_vm6, %v2087_v50  ;;  %v8555_v58 = vmax.f32 %v2214_v53, %v2278_v54  ;;  %v792_v53 = vld [vmem:[#allocation2 + $0xd7] sm:$0xff]  ;;  %v793_v54 = vld [vmem:[#allocation2 + $0xdf] sm:$0xff] }
  0xde   : > { %v1803_v33 = vpop.f32.mrf.mxu2  ;;  %v1507_v60 = vpop.f32.mrf.mxu1 }
  0xdf   : > { %v1956_v61 = vadd.f32 %v1803_v33, %v1503_v57  ;;  %2375 = vst.msk [vmem:[#allocation4 + $0x10] sm:$0xff] %vm2147_vm6, %v8555_v58  ;;  %v2538_v1 = vpack.c.bf16 %v8555_v58, %v8534_v28  ;;  %v857_v57 = vld [vmem:[#allocation2 + $0xe1] sm:$0xff] }
  0xe1   : > { %v1237_v62 = vpop.f32.mrf.mxu0  ;;  %v2024_v2 = vadd.f32 %v8501_v47, %v1956_v61  ;;  %v1093_v61 = vpack.c.bf16 %v793_v54, %v792_v53 }
  0xe2   : > { %v1506_v4 = vadd.f32 %v1505_v39, %v1237_v62  ;;  %v8590_v39 = vld [vmem:[%s8396_s18 + $0x80] sm:$0xff]  }
  0xe3   : > { %v2088_v3 = vmax.f32 %v2024_v2, 0.0  ;;  %6290 = vmatmul.msk.bf16.gmra.mxu2 %vm701_vm2, %v1661_v63  ;;  %v7984_v44 = vunpack.c.l.bf16 %v8590_v39  ;;  %v1663_v2 = vpack.c.bf16 %v857_v57, %v856_v52  ;;  %v7985_v18 = vunpack.c.h.bf16 %v8590_v39  ;;  %v797_v57 = vld [vmem:[#allocation2 + $0xff] sm:$0xff] }
  0xe4   : > { %6226 = vmatmul.msk.bf16.gmra.mxu0 %vm701_vm2, %v1091_v59 }
  0xe5   : > { %2153 = vst.msk [vmem:[#allocation3 + $0x28] sm:$0xff] %vm2147_vm6, %v2088_v3 }
  0xe6   : > { %v1806_v6 = vpop.f32.mrf.mxu2  ;;  %v2407_v7 = vld [vmem:[#allocation4 + $0xf] sm:$0xff]  ;;  %v1510_v9 = vpop.f32.mrf.mxu1  ;;  %734 = vst.msk [vmem:[#allocation2 + $0x108] sm:$0xff] %vm701_vm2, %v7984_v44  ;;  %v8631_v44 = vld [vmem:[%s8396_s18 + $0x90] sm:$0xff]  }
  0xe7   : > { %v1957_v11 = vadd.f32 %v1806_v6, %v1506_v4  ;;  %v2558_v14 = vpack.c.bf16 %v2407_v7, %v2470_v8  ;;  %735 = vst.msk [vmem:[#allocation2 + $0x110] sm:$0xff] %vm701_vm2, %v7985_v18 }
  0xe9   : > { %v1239_v13 = vpop.f32.mrf.mxu0  ;;  %v2025_v19 = vadd.f32 %v8501_v47, %v1957_v11  ;;  %6319 = vmatmul.msk.bf16.vlgmr.msra.gmra.mxu3 %vm2147_vm6, %v2558_v14  ;;  %6259 = vmatmul.msk.bf16.gmra.mxu1 %vm701_vm2, %v8504_v48 }
  0xea   : > { %v1508_v29 = vadd.f32 %v1507_v60, %v1239_v13  ;;  %v8611_v13 = vld [vmem:[%s8396_s18 + $0x88] sm:$0xff]  }
  0xeb   : > { %v2089_v20 = vmax.f32 %v2025_v19, 0.0  ;;  %v7988_v19 = vunpack.c.l.bf16 %v8611_v13 }
  0xec   : > { %v2216_v25 = vld [vmem:[#allocation3 + $0x20] ss:$2 sm:$0xff]  ;;  %v2280_v26 = vld [vmem:[#allocation3 + $0x21] ss:$2 sm:$0xff] }
  0xed   : > { %2154 = vst.msk [vmem:[#allocation3 + $0x30] sm:$0xff] %vm2147_vm6, %v2089_v20  ;;  %v8581_v30 = vmax.f32 %v2216_v25, %v2280_v26  ;;  %v795_v25 = vld [vmem:[#allocation2 + $0xef] sm:$0xff]  ;;  %v861_v53 = vld [vmem:[#allocation2 + $0x101] sm:$0xff] }
  0xee   : > { %v1808_v48 = vpop.f32.mrf.mxu2  ;;  %v1512_v31 = vpop.f32.mrf.mxu1  ;;  %736 = vst.msk [vmem:[#allocation2 + $0x118] sm:$0xff] %vm701_vm2, %v7988_v19 }
  0xef   : > { %v1958_v32 = vadd.f32 %v1808_v48, %v1508_v29  ;;  %2376 = vst.msk [vmem:[#allocation4 + $0x18] sm:$0xff] %vm2147_vm6, %v8581_v30  ;;  %v859_v29 = vld [vmem:[#allocation2 + $0xf1] sm:$0xff] }
  0xf1   : > { %v1242_v34 = vpop.f32.mrf.mxu0  ;;  %v2026_v36 = vadd.f32 %v8501_v47, %v1958_v32  ;;  %v1094_v32 = vpack.c.bf16 %v795_v25, %v794_v24 }
  0xf2   : > { %v1511_v38 = vadd.f32 %v1510_v9, %v1242_v34 }
  0xf3   : > { %v2090_v37 = vmax.f32 %v2026_v36, 0.0  ;;  %6291 = vmatmul.msk.bf16.gmra.mxu2 %vm701_vm2, %v1662_v35  ;;  %v1664_v36 = vpack.c.bf16 %v859_v29, %v858_v23  ;;  %v798_v29 = vld [vmem:[#allocation2 + $0x107] sm:$0xff] }
  0xf4   : > { %6227 = vmatmul.msk.bf16.gmra.mxu0 %vm701_vm2, %v1092_v22 }
  0xf5   : > { %2155 = vst.msk [vmem:[#allocation3 + $0x38] sm:$0xff] %vm2147_vm6, %v2090_v37 }
  0xf6   : > { %v1811_v41 = vpop.f32.mrf.mxu2  ;;  %v1515_v42 = vpop.f32.mrf.mxu1  ;;  %v2408_v8 = vld [vmem:[#allocation4 + $0x17] sm:$0xff] }
  0xf7   : > { %v1959_v46 = vadd.f32 %v1811_v41, %v1511_v38 }
  0xf9   : > { %v1244_v49 = vpop.f32.mrf.mxu0  ;;  %v2027_v50 = vadd.f32 %v8501_v47, %v1959_v46  ;;  %6260 = vmatmul.msk.bf16.gmra.mxu1 %vm701_vm2, %v8524_v12 }
  0xfa   : > { %v1513_v33 = vadd.f32 %v1512_v31, %v1244_v49 }
  0xfb   : > { %v2091_v51 = vmax.f32 %v2027_v50, 0.0  ;;  %v7989_v50 = vunpack.c.h.bf16 %v8611_v13 }
  0xfc   : > { %v2218_v55 = vld [vmem:[#allocation3 + $0x30] ss:$2 sm:$0xff]  ;;  %v2282_v56 = vld [vmem:[#allocation3 + $0x31] ss:$2 sm:$0xff] }
  0xfd   : > { %2156 = vst.msk [vmem:[#allocation3 + $0x40] sm:$0xff] %vm2147_vm6, %v2091_v51  ;;  %v8600_v59 = vmax.f32 %v2218_v55, %v2282_v56  ;;  %v7992_v51 = vunpack.c.l.bf16 %v8631_v44  ;;  %v860_v55 = vld [vmem:[#allocation2 + $0xf9] sm:$0xff] }
  0xfe   : > { %v1813_v60 = vpop.f32.mrf.mxu2  ;;  %v1517_v62 = vpop.f32.mrf.mxu1  ;;  %737 = vst.msk [vmem:[#allocation2 + $0x120] sm:$0xff] %vm701_vm2, %v7989_v50  ;;  %v796_v56 = vld [vmem:[#allocation2 + $0xf7] sm:$0xff] }
  0xff   : > { %v1960_v63 = vadd.f32 %v1813_v60, %v1513_v33  ;;  %2377 = vst.msk [vmem:[#allocation4 + $0x20] sm:$0xff] %vm2147_vm6, %v8600_v59  ;;  %v2539_v3 = vpack.c.bf16 %v8600_v59, %v8581_v30 }
 0x100   : > { %738 = vst.msk [vmem:[#allocation2 + $0x128] sm:$0xff] %vm701_vm2, %v7992_v51 }
 0x101   : > { %v1247_v12 = vpop.f32.mrf.mxu0  ;;  %v2028_v4 = vadd.f32 %v8501_v47, %v1960_v63 }
 0x102   : > { %v1516_v6 = vadd.f32 %v1515_v42, %v1247_v12 }
 0x103   : > { %v2092_v5 = vmax.f32 %v2028_v4, 0.0  ;;  %6292 = vmatmul.msk.bf16.gmra.mxu2 %vm701_vm2, %v1663_v2  ;;  %v1095_v2 = vpack.c.bf16 %v797_v57, %v796_v56 }
 0x104   : > { %6228 = vmatmul.msk.bf16.gmra.mxu0 %vm701_vm2, %v1093_v61  ;;  %v1014_v61 = vsel %vm982_vm4, 0.0, %v861_v53 }
 0x105   : > { %2157 = vst.msk [vmem:[#allocation3 + $0x48] sm:$0xff] %vm2147_vm6, %v2092_v5 }
 0x106   : > { %v1816_v7 = vpop.f32.mrf.mxu2  ;;  %v2409_v9 = vld [vmem:[#allocation4 + $0x1f] sm:$0xff]  ;;  %v1520_v11 = vpop.f32.mrf.mxu1 }
 0x107   : > { %v1961_v14 = vadd.f32 %v1816_v7, %v1516_v6  ;;  %v2559_v16 = vpack.c.bf16 %v2409_v9, %v2408_v8  ;;  %v1665_v7 = vpack.c.bf16 %v1014_v61, %v860_v55 }
 0x109   : > { %v1249_v15 = vpop.f32.mrf.mxu0  ;;  %v2029_v20 = vadd.f32 %v8501_v47, %v1961_v14  ;;  %6320 = vmatmul.msk.bf16.gmra.mxu3 %vm2147_vm6, %v2559_v16  ;;  %6261 = vmatmul.msk.bf16.gmra.mxu1 %vm701_vm2, %v8543_v40 }
 0x10a   : > { %v1518_v48 = vadd.f32 %v1517_v62, %v1249_v15  ;;  %v7617_v62 = vld [vmem:[%s9761_s7 + $0x8] sm:$0xff] }
 0x10b   : > { %v2093_v21 = vmax.f32 %v2029_v20, 0.0  ;;  %2962 = vmatpush.bf16.msrb.mxu0 %v7617_v62 }
 0x10c   : > { %v2220_v26 = vld [vmem:[#allocation3 + $0x40] ss:$2 sm:$0xff]  ;;  %v2284_v27 = vld [vmem:[#allocation3 + $0x41] ss:$2 sm:$0xff] }
 0x10d   : > { %2158 = vst.msk [vmem:[#allocation3 + $0x50] sm:$0xff] %vm2147_vm6, %v2093_v21  ;;  %v8622_v22 = vmax.f32 %v2220_v26, %v2284_v27  ;;  %v8659_v21 = vld [vmem:[%s8396_s18 + $0x98] sm:$0xff]   ;;  %v7993_v26 = vunpack.c.h.bf16 %v8631_v44 }
 0x10e   : > { %v1818_v31 = vpop.f32.mrf.mxu2  ;;  %v1522_v40 = vpop.f32.mrf.mxu1  ;;  %v7996_v27 = vunpack.c.l.bf16 %v8659_v21  ;;  %v7997_v57 = vunpack.c.h.bf16 %v8659_v21 }
 0x10f   : > { %v1962_v34 = vadd.f32 %v1818_v31, %v1518_v48  ;;  %2378 = vst.msk [vmem:[#allocation4 + $0x28] sm:$0xff] %vm2147_vm6, %v8622_v22 }
 0x110   : > { %739 = vst.msk [vmem:[#allocation2 + $0x130] sm:$0xff] %vm701_vm2, %v7993_v26 }
 0x111   : > { %v1252_v35 = vpop.f32.mrf.mxu0  ;;  %v2030_v37 = vadd.f32 %v8501_v47, %v1962_v34  ;;  %740 = vst.msk [vmem:[#allocation2 + $0x138] sm:$0xff] %vm701_vm2, %v7996_v27  ;;  %v943_v34 = vsel %vm903_vm3, 0.0, %v798_v29 }
 0x112   : > { %v1521_v41 = vadd.f32 %v1520_v11, %v1252_v35  ;;  %741 = vst.msk [vmem:[#allocation2 + $0x140] sm:$0xff] %vm701_vm2, %v7997_v57 }
 0x113   : > { %v2094_v38 = vmax.f32 %v2030_v37, 0.0  ;;  %6293 = vmatmul.msk.bf16.gmra.mxu2 %vm701_vm2, %v1664_v36  ;;  %v863_v37 = vld [vmem:[#allocation2 + $0x111] sm:$0xff] }
 0x114   : > { %6229 = vmatmul.msk.bf16.gmra.mxu0 %vm701_vm2, %v1094_v32  ;;  %v862_v32 = vld [vmem:[#allocation2 + $0x109] sm:$0xff] }
 0x115   : > { %2159 = vst.msk [vmem:[#allocation3 + $0x58] sm:$0xff] %vm2147_vm6, %v2094_v38  ;;  %v1666_v50 = vpack.c.bf16 %v863_v37, %v862_v32 }
 0x116   : > { %v1821_v42 = vpop.f32.mrf.mxu2  ;;  %v1525_v43 = vpop.f32.mrf.mxu1  ;;  %v2410_v15 = vld [vmem:[#allocation4 + $0x27] sm:$0xff] }
 0x117   : > { %v1963_v46 = vadd.f32 %v1821_v42, %v1521_v41  ;;  %v2474_v19 = vsel %vm903_vm3, 0.0, %v2410_v15 }
 0x119   : > { %v1254_v49 = vpop.f32.mrf.mxu0  ;;  %v2031_v52 = vadd.f32 %v8501_v47, %v1963_v46  ;;  %6262 = vmatmul.msk.bf16.gmra.mxu1 %vm701_vm2, %v8568_v10 }
 0x11a   : > { %v1523_v10 = vadd.f32 %v1522_v40, %v1254_v49  ;;  %v799_v40 = vld [vmem:[#allocation2 + $0x10f] sm:$0xff] }
 0x11b   : > { %v2095_v54 = vmax.f32 %v2031_v52, 0.0  ;;  %v1096_v42 = vpack.c.bf16 %v799_v40, %v943_v34 }
 0x11c   : > { %v2222_v33 = vld [vmem:[#allocation3 + $0x50] ss:$2 sm:$0xff]  ;;  %v2286_v60 = vld [vmem:[#allocation3 + $0x51] ss:$2 sm:$0xff] }
 0x11d   : > { %2160 = vst.msk [vmem:[#allocation3 + $0x60] sm:$0xff] %vm2147_vm6, %v2095_v54  ;;  %v8646_v63 = vmax.f32 %v2222_v33, %v2286_v60  ;;  %v8681_v54 = vld [vmem:[%s8396_s18 + $0xa0] sm:$0xff]  }
 0x11e   : > { %v1823_v12 = vpop.f32.mrf.mxu2  ;;  %v1527_v4 = vpop.f32.mrf.mxu1  ;;  %v8000_v33 = vunpack.c.l.bf16 %v8681_v54 }
 0x11f   : > { %v1964_v5 = vadd.f32 %v1823_v12, %v1523_v10  ;;  %2379 = vst.msk [vmem:[#allocation4 + $0x30] sm:$0xff] %vm2147_vm6, %v8646_v63  ;;  %v864_v12 = vld [vmem:[#allocation2 + $0x119] sm:$0xff] }
 0x120   : > { %742 = vst.msk [vmem:[#allocation2 + $0x148] sm:$0xff] %vm701_vm2, %v8000_v33 }
 0x121   : > { %v1257_v6 = vpop.f32.mrf.mxu0  ;;  %v2032_v9 = vadd.f32 %v8501_v47, %v1964_v5 }
 0x122   : > { %v1526_v14 = vadd.f32 %v1525_v43, %v1257_v6 }
 0x123   : > { %v2096_v11 = vmax.f32 %v2032_v9, 0.0  ;;  %6294 = vmatmul.msk.bf16.gmra.mxu2 %vm701_vm2, %v1665_v7  ;;  %v865_v7 = vld [vmem:[#allocation2 + $0x121] sm:$0xff] }
 0x124   : > { %6230 = vmatmul.msk.bf16.gmra.mxu0 %vm701_vm2, %v1095_v2  ;;  %v800_v2 = vld [vmem:[#allocation2 + $0x117] sm:$0xff] }
 0x125   : > { %2161 = vst.msk [vmem:[#allocation3 + $0x68] sm:$0xff] %vm2147_vm6, %v2096_v11 }
 0x126   : > { %v1826_v16 = vpop.f32.mrf.mxu2  ;;  %v2411_v18 = vld [vmem:[#allocation4 + $0x2f] sm:$0xff]  ;;  %v1530_v20 = vpop.f32.mrf.mxu1 }
 0x127   : > { %v1965_v23 = vadd.f32 %v1826_v16, %v1526_v14  ;;  %v2560_v25 = vpack.c.bf16 %v2411_v18, %v2474_v19  ;;  %v1667_v19 = vpack.c.bf16 %v865_v7, %v864_v12 }
 0x129   : > { %v1259_v24 = vpop.f32.mrf.mxu0  ;;  %v2033_v48 = vadd.f32 %v8501_v47, %v1965_v23  ;;  %6321 = vmatmul.msk.bf16.gmra.mxu3 %vm2147_vm6, %v2560_v25  ;;  %6263 = vmatmul.msk.bf16.gmra.mxu1 %vm701_vm2, %v8590_v39 }
 0x12a   : > { %v1528_v38 = vadd.f32 %v1527_v4, %v1259_v24  ;;  %v801_v4 = vld [vmem:[#allocation2 + $0x11f] sm:$0xff] }
 0x12b   : > { %v2097_v31 = vmax.f32 %v2033_v48, 0.0  ;;  %v1097_v15 = vpack.c.bf16 %v801_v4, %v800_v2  ;;  %v8722_v2 = vld [vmem:[%s8396_s18 + $0xb0] sm:$0xff]  }
 0x12c   : > { %v2224_v35 = vld [vmem:[#allocation3 + $0x60] ss:$2 sm:$0xff]  ;;  %v2288_v36 = vld [vmem:[#allocation3 + $0x61] ss:$2 sm:$0xff]  ;;  %v8008_v7 = vunpack.c.l.bf16 %v8722_v2 }
 0x12d   : > { %2162 = vst.msk [vmem:[#allocation3 + $0x70] sm:$0xff] %vm2147_vm6, %v2097_v31  ;;  %v8672_v41 = vmax.f32 %v2224_v35, %v2288_v36  ;;  %v8702_v31 = vld [vmem:[%s8396_s18 + $0xa8] sm:$0xff]   ;;  %v8001_v35 = vunpack.c.h.bf16 %v8681_v54 }
 0x12e   : > { %v1828_v39 = vpop.f32.mrf.mxu2  ;;  %v1532_v43 = vpop.f32.mrf.mxu1  ;;  %v8004_v36 = vunpack.c.l.bf16 %v8702_v31  ;;  %746 = vst.msk [vmem:[#allocation2 + $0x168] sm:$0xff] %vm701_vm2, %v8008_v7 }
 0x12f   : > { %v1966_v46 = vadd.f32 %v1828_v39, %v1528_v38  ;;  %2380 = vst.msk [vmem:[#allocation4 + $0x38] sm:$0xff] %vm2147_vm6, %v8672_v41  ;;  %v866_v39 = vld [vmem:[#allocation2 + $0x129] sm:$0xff] }
 0x130   : > { %743 = vst.msk [vmem:[#allocation2 + $0x150] sm:$0xff] %vm701_vm2, %v8001_v35 }
 0x131   : > { %v1262_v49 = vpop.f32.mrf.mxu0  ;;  %v2034_v51 = vadd.f32 %v8501_v47, %v1966_v46  ;;  %744 = vst.msk [vmem:[#allocation2 + $0x158] sm:$0xff] %vm701_vm2, %v8004_v36 }
 0x132   : > { %v1531_v53 = vadd.f32 %v1530_v20, %v1262_v49 }
 0x133   : > { %v2098_v52 = vmax.f32 %v2034_v51, 0.0  ;;  %6295 = vmatmul.msk.bf16.gmra.mxu2 %vm701_vm2, %v1666_v50  ;;  %v867_v50 = vld [vmem:[#allocation2 + $0x131] sm:$0xff] }
 0x134   : > { %6231 = vmatmul.msk.bf16.gmra.mxu0 %vm701_vm2, %v1096_v42  ;;  %v802_v42 = vld [vmem:[#allocation2 + $0x127] sm:$0xff]  ;;  %v1668_v33 = vpack.c.bf16 %v867_v50, %v866_v39 }
 0x135   : > { %2163 = vst.msk [vmem:[#allocation3 + $0x78] sm:$0xff] %vm2147_vm6, %v2098_v52 }
 0x136   : > { %v1831_v55 = vpop.f32.mrf.mxu2  ;;  %v1535_v56 = vpop.f32.mrf.mxu1  ;;  %v2412_v27 = vld [vmem:[#allocation4 + $0x37] sm:$0xff] }
 0x137   : > { %v1967_v60 = vadd.f32 %v1831_v55, %v1531_v53 }
 0x139   : > { %v1264_v61 = vpop.f32.mrf.mxu0  ;;  %v2035_v62 = vadd.f32 %v8501_v47, %v1967_v60  ;;  %6264 = vmatmul.msk.bf16.gmra.mxu1 %vm701_vm2, %v8611_v13 }
 0x13a   : > { %v1533_v9 = vadd.f32 %v1532_v43, %v1264_v61  ;;  %v803_v43 = vld [vmem:[#allocation2 + $0x12f] sm:$0xff] }
 0x13b   : > { %v2099_v10 = vmax.f32 %v2035_v62, 0.0  ;;  %v1098_v55 = vpack.c.bf16 %v803_v43, %v802_v42 }
 0x13c   : > { %v2226_v5 = vld [vmem:[#allocation3 + $0x70] ss:$2 sm:$0xff]  ;;  %v2290_v6 = vld [vmem:[#allocation3 + $0x71] ss:$2 sm:$0xff] }
 0x13d   : > { %2164 = vst.msk [vmem:[#allocation3 + $0x80] sm:$0xff] %vm2147_vm6, %v2099_v10  ;;  %v8691_v11 = vmax.f32 %v2226_v5, %v2290_v6  ;;  %v8005_v6 = vunpack.c.h.bf16 %v8702_v31 }
 0x13e   : > { %v1833_v14 = vpop.f32.mrf.mxu2  ;;  %v1537_v16 = vpop.f32.mrf.mxu1 }
 0x13f   : > { %v1968_v18 = vadd.f32 %v1833_v14, %v1533_v9  ;;  %2381 = vst.msk [vmem:[#allocation4 + $0x40] sm:$0xff] %vm2147_vm6, %v8691_v11  ;;  %v869_v14 = vld [vmem:[#allocation2 + $0x141] sm:$0xff] }
 0x140   : > { %745 = vst.msk [vmem:[#allocation2 + $0x160] sm:$0xff] %vm701_vm2, %v8005_v6 }
 0x141   : > { %v1267_v13 = vpop.f32.mrf.mxu0  ;;  %v2036_v23 = vadd.f32 %v8501_v47, %v1968_v18  ;;  %v805_v18 = vld [vmem:[#allocation2 + $0x13f] sm:$0xff] }
 0x142   : > { %v1536_v25 = vadd.f32 %v1535_v56, %v1267_v13 }
 0x143   : > { %v2100_v24 = vmax.f32 %v2036_v23, 0.0  ;;  %6296 = vmatmul.msk.bf16.gmra.mxu2 %vm701_vm2, %v1667_v19  ;;  %v868_v23 = vld [vmem:[#allocation2 + $0x139] sm:$0xff] }
 0x144   : > { %6232 = vmatmul.msk.bf16.gmra.mxu0 %vm701_vm2, %v1097_v15 }
 0x145   : > { %2165 = vst.msk [vmem:[#allocation3 + $0x88] sm:$0xff] %vm2147_vm6, %v2100_v24  ;;  %v1022_v24 = vsel %vm982_vm4, 0.0, %v869_v14 }
 0x146   : > { %v1836_v26 = vpop.f32.mrf.mxu2  ;;  %v2413_v29 = vld [vmem:[#allocation4 + $0x3f] sm:$0xff]  ;;  %v1540_v48 = vpop.f32.mrf.mxu1 }
 0x147   : > { %v1969_v32 = vadd.f32 %v1836_v26, %v1536_v25  ;;  %v2561_v34 = vpack.c.bf16 %v2413_v29, %v2412_v27 }
 0x149   : > { %v1269_v40 = vpop.f32.mrf.mxu0  ;;  %v2037_v37 = vadd.f32 %v8501_v47, %v1969_v32  ;;  %6322 = vmatmul.msk.bf16.gmra.mxu3 %vm2147_vm6, %v2561_v34  ;;  %6265 = vmatmul.msk.bf16.gmra.mxu1 %vm701_vm2, %v8631_v44 }
 0x14a   : > { %v1538_v51 = vadd.f32 %v1537_v16, %v1269_v40  ;;  %v804_v16 = vld [vmem:[#allocation2 + $0x137] sm:$0xff]  ;;  %v1669_v40 = vpack.c.bf16 %v1022_v24, %v868_v23  ;;  %v8769_v23 = vld [vmem:[%s8396_s18 + $0xc0] sm:$0xff]  }
 0x14b   : > { %v2101_v38 = vmax.f32 %v2037_v37, 0.0  ;;  %v1099_v27 = vpack.c.bf16 %v805_v18, %v804_v16 }
 0x14c   : > { %v2228_v46 = vld [vmem:[#allocation3 + $0x80] ss:$2 sm:$0xff]  ;;  %v2292_v49 = vld [vmem:[#allocation3 + $0x81] ss:$2 sm:$0xff] }
 0x14d   : > { %2166 = vst.msk [vmem:[#allocation3 + $0x90] sm:$0xff] %vm2147_vm6, %v2101_v38  ;;  %v8713_v52 = vmax.f32 %v2228_v46, %v2292_v49  ;;  %v8747_v49 = vld [vmem:[%s8396_s18 + $0xb8] sm:$0xff]  }
 0x14e   : > { %v1838_v53 = vpop.f32.mrf.mxu2  ;;  %v1542_v44 = vpop.f32.mrf.mxu1 }
 0x14f   : > { %v1970_v56 = vadd.f32 %v1838_v53, %v1538_v51  ;;  %2382 = vst.msk [vmem:[#allocation4 + $0x48] sm:$0xff] %vm2147_vm6, %v8713_v52 }
 0x151   : > { %v1272_v57 = vpop.f32.mrf.mxu0  ;;  %v2038_v60 = vadd.f32 %v8501_v47, %v1970_v56  ;;  %v806_v56 = vld [vmem:[#allocation2 + $0x147] sm:$0xff] }
 0x152   : > { %v1541_v62 = vadd.f32 %v1540_v48, %v1272_v57 }
 0x153   : > { %v2102_v61 = vmax.f32 %v2038_v60, 0.0  ;;  %6297 = vmatmul.msk.bf16.gmra.mxu2 %vm701_vm2, %v1668_v33  ;;  %v870_v60 = vld [vmem:[#allocation2 + $0x149] sm:$0xff] }
 0x154   : > { %6233 = vmatmul.msk.bf16.gmra.mxu0 %vm701_vm2, %v1098_v55  ;;  %v8009_v55 = vunpack.c.h.bf16 %v8722_v2 }
 0x155   : > { %2167 = vst.msk [vmem:[#allocation3 + $0x98] sm:$0xff] %vm2147_vm6, %v2102_v61  ;;  %v807_v61 = vld [vmem:[#allocation2 + $0x14f] sm:$0xff] }
 0x156   : > { %v1841_v10 = vpop.f32.mrf.mxu2  ;;  %v1545_v12 = vpop.f32.mrf.mxu1  ;;  %v2414_v38 = vld [vmem:[#allocation4 + $0x47] sm:$0xff]  ;;  %747 = vst.msk [vmem:[#allocation2 + $0x170] sm:$0xff] %vm701_vm2, %v8009_v55 }
 0x157   : > { %v1971_v4 = vadd.f32 %v1841_v10, %v1541_v62  ;;  %v2478_v43 = vsel %vm903_vm3, 0.0, %v2414_v38  ;;  %v951_v62 = vsel %vm903_vm3, 0.0, %v806_v56 }
 0x158   : > { %v1100_v7 = vpack.c.bf16 %v807_v61, %v951_v62 }
 0x159   : > { %v1274_v5 = vpop.f32.mrf.mxu0  ;;  %v2039_v9 = vadd.f32 %v8501_v47, %v1971_v4  ;;  %6266 = vmatmul.msk.bf16.gmra.mxu1 %vm701_vm2, %v8659_v21  ;;  %v871_v4 = vld [vmem:[#allocation2 + $0x151] sm:$0xff] }
 0x15a   : > { %v1543_v25 = vadd.f32 %v1542_v44, %v1274_v5  ;;  %v8012_v44 = vunpack.c.l.bf16 %v8747_v49  ;;  %v1670_v16 = vpack.c.bf16 %v871_v4, %v870_v60  ;;  %v8790_v4 = vld [vmem:[%s8396_s18 + $0xc8] sm:$0xff]  }
 0x15b   : > { %v2103_v15 = vmax.f32 %v2039_v9, 0.0 }
 0x15c   : > { %v2230_v13 = vld [vmem:[#allocation3 + $0x90] ss:$2 sm:$0xff]  ;;  %v2294_v19 = vld [vmem:[#allocation3 + $0x91] ss:$2 sm:$0xff]  ;;  %748 = vst.msk [vmem:[#allocation2 + $0x178] sm:$0xff] %vm701_vm2, %v8012_v44 }
 0x15d   : > { %2168 = vst.msk [vmem:[#allocation3 + $0xa0] sm:$0xff] %vm2147_vm6, %v2103_v15  ;;  %v8734_v26 = vmax.f32 %v2230_v13, %v2294_v19 }
 0x15e   : > { %v1843_v21 = vpop.f32.mrf.mxu2  ;;  %v1547_v29 = vpop.f32.mrf.mxu1 }
 0x15f   : > { %v1972_v48 = vadd.f32 %v1843_v21, %v1543_v25  ;;  %2383 = vst.msk [vmem:[#allocation4 + $0x50] sm:$0xff] %vm2147_vm6, %v8734_v26  ;;  %v8013_v21 = vunpack.c.h.bf16 %v8747_v49 }
 0x161   : > { %v1277_v32 = vpop.f32.mrf.mxu0  ;;  %v2040_v35 = vadd.f32 %v8501_v47, %v1972_v48  ;;  %749 = vst.msk [vmem:[#allocation2 + $0x180] sm:$0xff] %vm701_vm2, %v8013_v21 }
 0x162   : > { %v1546_v37 = vadd.f32 %v1545_v12, %v1277_v32 }
 0x163   : > { %v2104_v36 = vmax.f32 %v2040_v35, 0.0  ;;  %6298 = vmatmul.msk.bf16.gmra.mxu2 %vm701_vm2, %v1669_v40  ;;  %v872_v35 = vld [vmem:[#allocation2 + $0x159] sm:$0xff]  ;;  %v875_v21 = vld [vmem:[#allocation2 + $0x171] sm:$0xff] }
 0x164   : > { %6234 = vmatmul.msk.bf16.gmra.mxu0 %vm701_vm2, %v1099_v27  ;;  %v8016_v27 = vunpack.c.l.bf16 %v8769_v23 }
 0x165   : > { %2169 = vst.msk [vmem:[#allocation3 + $0xa8] sm:$0xff] %vm2147_vm6, %v2104_v36  ;;  %v808_v36 = vld [vmem:[#allocation2 + $0x157] sm:$0xff] }
 0x166   : > { %v1846_v39 = vpop.f32.mrf.mxu2  ;;  %v2415_v42 = vld [vmem:[#allocation4 + $0x4f] sm:$0xff]  ;;  %v1550_v46 = vpop.f32.mrf.mxu1  ;;  %750 = vst.msk [vmem:[#allocation2 + $0x188] sm:$0xff] %vm701_vm2, %v8016_v27 }
 0x167   : > { %v1973_v50 = vadd.f32 %v1846_v39, %v1546_v37  ;;  %v2562_v53 = vpack.c.bf16 %v2415_v42, %v2478_v43  ;;  %v809_v37 = vld [vmem:[#allocation2 + $0x15f] sm:$0xff] }
 0x168   : > { %v873_v42 = vld [vmem:[#allocation2 + $0x161] sm:$0xff] }
 0x169   : > { %v1279_v51 = vpop.f32.mrf.mxu0  ;;  %v2041_v57 = vadd.f32 %v8501_v47, %v1973_v50  ;;  %6323 = vmatmul.msk.bf16.gmra.mxu3 %vm2147_vm6, %v2562_v53  ;;  %6267 = vmatmul.msk.bf16.gmra.mxu1 %vm701_vm2, %v8681_v54  ;;  %v1671_v44 = vpack.c.bf16 %v873_v42, %v872_v35 }
 0x16a   : > { %v1548_v5 = vadd.f32 %v1547_v29, %v1279_v51  ;;  %v1101_v51 = vpack.c.bf16 %v809_v37, %v808_v36  ;;  %v8808_v36 = vld [vmem:[%s9758_s4] ss:$0 sm:$0xff] }
 0x16b   : > { %v2105_v33 = vmax.f32 %v2041_v57, 0.0 }
 0x16c   : > { %v2232_v10 = vld [vmem:[#allocation3 + $0xa0] ss:$2 sm:$0xff]  ;;  %v2296_v12 = vld [vmem:[#allocation3 + $0xa1] ss:$2 sm:$0xff] }
 0x16d   : > { %2170 = vst.msk [vmem:[#allocation3 + $0xb0] sm:$0xff] %vm2147_vm6, %v2105_v33  ;;  %v8760_v6 = vmax.f32 %v2232_v10, %v2296_v12 }
 0x16e   : > { %v1848_v54 = vpop.f32.mrf.mxu2  ;;  %v1552_v9 = vpop.f32.mrf.mxu1 }
 0x16f   : > { %v1974_v14 = vadd.f32 %v1848_v54, %v1548_v5  ;;  %2384 = vst.msk [vmem:[#allocation4 + $0x58] sm:$0xff] %vm2147_vm6, %v8760_v6 }
 0x171   : > { %v1282_v15 = vpop.f32.mrf.mxu0  ;;  %v2042_v18 = vadd.f32 %v8501_v47, %v1974_v14  ;;  %v8020_v14 = vunpack.c.l.bf16 %v8790_v4 }
 0x172   : > { %v1551_v19 = vadd.f32 %v1550_v46, %v1282_v15 }
 0x173   : > { %v2106_v13 = vmax.f32 %v2042_v18, 0.0  ;;  %6299 = vmatmul.msk.bf16.gmra.mxu2 %vm701_vm2, %v1670_v16  ;;  %752 = vst.msk [vmem:[#allocation2 + $0x198] sm:$0xff] %vm701_vm2, %v8020_v14  ;;  %v874_v18 = vld [vmem:[#allocation2 + $0x169] sm:$0xff] }
 0x174   : > { %6235 = vmatmul.msk.bf16.gmra.mxu0 %vm701_vm2, %v1100_v7  ;;  %v1672_v35 = vpack.c.bf16 %v875_v21, %v874_v18 }
 0x175   : > { %2171 = vst.msk [vmem:[#allocation3 + $0xb8] sm:$0xff] %vm2147_vm6, %v2106_v13  ;;  %v810_v13 = vld [vmem:[#allocation2 + $0x167] sm:$0xff] }
 0x176   : > { %v1851_v24 = vpop.f32.mrf.mxu2  ;;  %v1555_v25 = vpop.f32.mrf.mxu1  ;;  %v2416_v62 = vld [vmem:[#allocation4 + $0x57] sm:$0xff] }
 0x177   : > { %v1975_v29 = vadd.f32 %v1851_v24, %v1551_v19  ;;  %v811_v19 = vld [vmem:[#allocation2 + $0x16f] sm:$0xff] }
 0x179   : > { %v1284_v48 = vpop.f32.mrf.mxu0  ;;  %v2043_v32 = vadd.f32 %v8501_v47, %v1975_v29  ;;  %6268 = vmatmul.msk.bf16.gmra.mxu1 %vm701_vm2, %v8702_v31 }
 0x17a   : > { %v1553_v43 = vadd.f32 %v1552_v9, %v1284_v48  ;;  %v8017_v9 = vunpack.c.h.bf16 %v8769_v23  ;;  %v1102_v48 = vpack.c.bf16 %v811_v19, %v810_v13 }
 0x17b   : > { %v2107_v40 = vmax.f32 %v2043_v32, 0.0 }
 0x17c   : > { %v2234_v38 = vld [vmem:[#allocation3 + $0xb0] ss:$2 sm:$0xff]  ;;  %v2298_v39 = vld [vmem:[#allocation3 + $0xb1] ss:$2 sm:$0xff]  ;;  %751 = vst.msk [vmem:[#allocation2 + $0x190] sm:$0xff] %vm701_vm2, %v8017_v9 }
 0x17d   : > { %2172 = vst.msk [vmem:[#allocation3 + $0xc0] sm:$0xff] %vm2147_vm6, %v2107_v40  ;;  %v8779_v46 = vmax.f32 %v2234_v38, %v2298_v39 }
 0x17e   : > { %v1853_v50 = vpop.f32.mrf.mxu2  ;;  %v1557_v53 = vpop.f32.mrf.mxu1 }
 0x17f   : > { %v1976_v55 = vadd.f32 %v1853_v50, %v1553_v43  ;;  %2385 = vst.msk [vmem:[#allocation4 + $0x60] sm:$0xff] %vm2147_vm6, %v8779_v46  ;;  %v8815_v50 = vld [vmem:[%s8396_s18 + $0xd0] sm:$0xff]  }
 0x181   : > { %v1287_v31 = vpop.f32.mrf.mxu0  ;;  %v2044_v57 = vadd.f32 %v8501_v47, %v1976_v55  ;;  %v8021_v55 = vunpack.c.h.bf16 %v8790_v4 }
 0x182   : > { %v1556_v60 = vadd.f32 %v1555_v25, %v1287_v31  ;;  %v8024_v31 = vunpack.c.l.bf16 %v8815_v50 }
 0x183   : > { %v2108_v33 = vmax.f32 %v2044_v57, 0.0  ;;  %6300 = vmatmul.msk.bf16.gmra.mxu2 %vm701_vm2, %v1671_v44  ;;  %v877_v57 = vld [vmem:[#allocation2 + $0x181] sm:$0xff]  ;;  %753 = vst.msk [vmem:[#allocation2 + $0x1a0] sm:$0xff] %vm701_vm2, %v8021_v55  ;;  %v815_v55 = vld [vmem:[#allocation2 + $0x18f] sm:$0xff] }
 0x184   : > { %6236 = vmatmul.msk.bf16.gmra.mxu0 %vm701_vm2, %v1101_v51  ;;  %754 = vst.msk [vmem:[#allocation2 + $0x1a8] sm:$0xff] %vm701_vm2, %v8024_v31 }
 0x185   : > { %2173 = vst.msk [vmem:[#allocation3 + $0xc8] sm:$0xff] %vm2147_vm6, %v2108_v33 }
 0x186   : > { %v1856_v61 = vpop.f32.mrf.mxu2  ;;  %v2417_v10 = vld [vmem:[#allocation4 + $0x5f] sm:$0xff]  ;;  %v1560_v12 = vpop.f32.mrf.mxu1 }
 0x187   : > { %v1977_v5 = vadd.f32 %v1856_v61, %v1556_v60  ;;  %v2563_v7 = vpack.c.bf16 %v2417_v10, %v2416_v62  ;;  %v812_v60 = vld [vmem:[#allocation2 + $0x177] sm:$0xff]  ;;  %v813_v61 = vld [vmem:[#allocation2 + $0x17f] sm:$0xff] }
 0x188   : > { %v1103_v9 = vpack.c.bf16 %v813_v61, %v812_v60 }
 0x189   : > { %v1289_v54 = vpop.f32.mrf.mxu0  ;;  %v2045_v15 = vadd.f32 %v8501_v47, %v1977_v5  ;;  %6324 = vmatmul.msk.bf16.gmra.mxu3 %vm2147_vm6, %v2563_v7  ;;  %6269 = vmatmul.msk.bf16.gmra.mxu1 %vm701_vm2, %v8722_v2  ;;  %v1030_v5 = vsel %vm982_vm4, 0.0, %v877_v57 }
 0x18a   : > { %v1558_v27 = vadd.f32 %v1557_v53, %v1289_v54 }
 0x18b   : > { %v2109_v16 = vmax.f32 %v2045_v15, 0.0 }
 0x18c   : > { %v2236_v24 = vld [vmem:[#allocation3 + $0xc0] ss:$2 sm:$0xff]  ;;  %v2300_v25 = vld [vmem:[#allocation3 + $0xc1] ss:$2 sm:$0xff] }
 0x18d   : > { %2174 = vst.msk [vmem:[#allocation3 + $0xd0] sm:$0xff] %vm2147_vm6, %v2109_v16  ;;  %v8801_v47 = vmax.f32 %v2236_v24, %v2300_v25 }
 0x18e   : > { %v1858_v29 = vpop.f32.mrf.mxu2  ;;  %v1562_v2 = vpop.f32.mrf.mxu1 }
 0x18f   : > { %v1978_v32 = vadd.f32 %v1858_v29, %v1558_v27  ;;  %2386 = vst.msk [vmem:[#allocation4 + $0x68] sm:$0xff] %vm2147_vm6, %v8801_v47 }
 0x191   : > { %v1292_v40 = vpop.f32.mrf.mxu0  ;;  %v2046_v37 = vadd.f32 %v8808_v36, %v1978_v32  ;;  %v8840_v32 = vld [vmem:[%s8396_s18 + $0xd8] sm:$0xff]  }
 0x192   : > { %v1561_v39 = vadd.f32 %v1560_v12, %v1292_v40  ;;  %v876_v12 = vld [vmem:[#allocation2 + $0x179] sm:$0xff] }
 0x193   : > { %v2110_v38 = vmax.f32 %v2046_v37, 0.0  ;;  %6301 = vmatmul.msk.bf16.gmra.mxu2 %vm701_vm2, %v1672_v35  ;;  %v1673_v18 = vpack.c.bf16 %v1030_v5, %v876_v12 }
 0x194   : > { %6237 = vmatmul.msk.bf16.gmra.mxu0 %vm701_vm2, %v1102_v48 }
 0x195   : > { %2175 = vst.msk [vmem:[#allocation3 + $0xd8] sm:$0xff] %vm2147_vm6, %v2110_v38  ;;  %v8025_v38 = vunpack.c.h.bf16 %v8815_v50 }
 0x196   : > { %v1861_v42 = vpop.f32.mrf.mxu2  ;;  %v1565_v43 = vpop.f32.mrf.mxu1  ;;  %v2418_v21 = vld [vmem:[#allocation4 + $0x67] sm:$0xff] }
 0x197   : > { %v1979_v51 = vadd.f32 %v1861_v42, %v1561_v39  ;;  %v2482_v48 = vsel %vm903_vm3, 0.0, %v2418_v21  ;;  %v8028_v39 = vunpack.c.l.bf16 %v8840_v32  ;;  %v814_v42 = vld [vmem:[#allocation2 + $0x187] sm:$0xff]  ;;  %755 = vst.msk [vmem:[#allocation2 + $0x1b0] sm:$0xff] %vm701_vm2, %v8025_v38 }
 0x198   : > { %v959_v31 = vsel %vm903_vm3, 0.0, %v814_v42  ;;  %v881_v38 = vld [vmem:[#allocation2 + $0x1a1] sm:$0xff] }
 0x199   : > { %v1294_v53 = vpop.f32.mrf.mxu0  ;;  %v2047_v44 = vadd.f32 %v8808_v36, %v1979_v51  ;;  %6270 = vmatmul.msk.bf16.gmra.mxu1 %vm701_vm2, %v8747_v49  ;;  %756 = vst.msk [vmem:[#allocation2 + $0x1b8] sm:$0xff] %vm701_vm2, %v8028_v39 }
 0x19a   : > { %v1563_v54 = vadd.f32 %v1562_v2, %v1294_v53  ;;  %v878_v53 = vld [vmem:[#allocation2 + $0x189] sm:$0xff] }
 0x19b   : > { %v2111_v33 = vmax.f32 %v2047_v44, 0.0 }
 0x19c   : > { %v2238_v62 = vld [vmem:[#allocation3 + $0xd0] ss:$2 sm:$0xff]  ;;  %v2302_v10 = vld [vmem:[#allocation3 + $0xd1] ss:$2 sm:$0xff] }
 0x19d   : > { %2176 = vst.msk [vmem:[#allocation3 + $0xe0] sm:$0xff] %vm2147_vm6, %v2111_v33  ;;  %v8827_v7 = vmax.f32 %v2238_v62, %v2302_v10  ;;  %v879_v33 = vld [vmem:[#allocation2 + $0x191] sm:$0xff]  ;;  %v1104_v62 = vpack.c.bf16 %v815_v55, %v959_v31 }
 0x19e   : > { %v1863_v49 = vpop.f32.mrf.mxu2  ;;  %v1567_v14 = vpop.f32.mrf.mxu1 }
 0x19f   : > { %v1980_v15 = vadd.f32 %v1863_v49, %v1563_v54  ;;  %2387 = vst.msk [vmem:[#allocation4 + $0x70] sm:$0xff] %vm2147_vm6, %v8827_v7  ;;  %v1674_v54 = vpack.c.bf16 %v879_v33, %v878_v53 }
 0x1a1   : > { %v1297_v16 = vpop.f32.mrf.mxu0  ;;  %v2048_v19 = vadd.f32 %v8808_v36, %v1980_v15 }
 0x1a2   : > { %v1566_v25 = vadd.f32 %v1565_v43, %v1297_v16 }
 0x1a3   : > { %v2112_v24 = vmax.f32 %v2048_v19, 0.0  ;;  %6302 = vmatmul.msk.bf16.gmra.mxu2 %vm701_vm2, %v1673_v18  ;;  %v8029_v19 = vunpack.c.h.bf16 %v8840_v32 }
 0x1a4   : > { %6238 = vmatmul.msk.bf16.gmra.mxu0 %vm701_vm2, %v1103_v9 }
 0x1a5   : > { %2177 = vst.msk [vmem:[#allocation3 + $0xe8] sm:$0xff] %vm2147_vm6, %v2112_v24 }
 0x1a6   : > { %v1866_v27 = vpop.f32.mrf.mxu2  ;;  %v2419_v29 = vld [vmem:[#allocation4 + $0x6f] sm:$0xff]  ;;  %v1570_v2 = vpop.f32.mrf.mxu1  ;;  %757 = vst.msk [vmem:[#allocation2 + $0x1c0] sm:$0xff] %vm701_vm2, %v8029_v19 }
 0x1a7   : > { %v1981_v40 = vadd.f32 %v1866_v27, %v1566_v25  ;;  %v2564_v37 = vpack.c.bf16 %v2419_v29, %v2482_v48  ;;  %v880_v48 = vld [vmem:[#allocation2 + $0x199] sm:$0xff] }
 0x1a8   : > { %v1675_v31 = vpack.c.bf16 %v881_v38, %v880_v48  ;;  %v883_v48 = vld [vmem:[#allocation2 + $0x1b1] sm:$0xff] }
 0x1a9   : > { %v1299_v35 = vpop.f32.mrf.mxu0  ;;  %v2049_v43 = vadd.f32 %v8808_v36, %v1981_v40  ;;  %6325 = vmatmul.msk.bf16.gmra.mxu3 %vm2147_vm6, %v2564_v37  ;;  %6271 = vmatmul.msk.bf16.gmra.mxu1 %vm701_vm2, %v8769_v23  ;;  %v817_v40 = vld [vmem:[#allocation2 + $0x19f] sm:$0xff] }
 0x1aa   : > { %v1568_v60 = vadd.f32 %v1567_v14, %v1299_v35  ;;  %v8862_v14 = vld [vmem:[%s8396_s18 + $0xe0] sm:$0xff]  }
 0x1ab   : > { %v2113_v51 = vmax.f32 %v2049_v43, 0.0  ;;  %v8032_v24 = vunpack.c.l.bf16 %v8862_v14 }
 0x1ac   : > { %v2240_v44 = vld [vmem:[#allocation3 + $0xe0] ss:$2 sm:$0xff]  ;;  %v2304_v57 = vld [vmem:[#allocation3 + $0xe1] ss:$2 sm:$0xff] }
 0x1ad   : > { %2178 = vst.msk [vmem:[#allocation3 + $0xf0] sm:$0xff] %vm2147_vm6, %v2113_v51  ;;  %v8853_v61 = vmax.f32 %v2240_v44, %v2304_v57 }
 0x1ae   : > { %v1868_v23 = vpop.f32.mrf.mxu2  ;;  %v1572_v10 = vpop.f32.mrf.mxu1  ;;  %758 = vst.msk [vmem:[#allocation2 + $0x1c8] sm:$0xff] %vm701_vm2, %v8032_v24  ;;  %v882_v24 = vld [vmem:[#allocation2 + $0x1a9] sm:$0xff] }
 0x1af   : > { %v1982_v12 = vadd.f32 %v1868_v23, %v1568_v60  ;;  %2388 = vst.msk [vmem:[#allocation4 + $0x78] sm:$0xff] %vm2147_vm6, %v8853_v61 }
 0x1b1   : > { %v1302_v5 = vpop.f32.mrf.mxu0  ;;  %v2050_v49 = vadd.f32 %v8808_v36, %v1982_v12 }
 0x1b2   : > { %v1571_v15 = vadd.f32 %v1570_v2, %v1302_v5  ;;  %v816_v2 = vld [vmem:[#allocation2 + $0x197] sm:$0xff]  ;;  %v8883_v5 = vld [vmem:[%s8396_s18 + $0xe8] sm:$0xff]  }
 0x1b3   : > { %v2114_v9 = vmax.f32 %v2050_v49, 0.0  ;;  %6303 = vmatmul.msk.bf16.gmra.mxu2 %vm701_vm2, %v1674_v54  ;;  %v1105_v51 = vpack.c.bf16 %v817_v40, %v816_v2 }
 0x1b4   : > { %6239 = vmatmul.msk.bf16.gmra.mxu0 %vm701_vm2, %v1104_v62 }
 0x1b5   : > { %2179 = vst.msk [vmem:[#allocation3 + $0xf8] sm:$0xff] %vm2147_vm6, %v2114_v9 }
 0x1b6   : > { %v1871_v16 = vpop.f32.mrf.mxu2  ;;  %v1575_v18 = vpop.f32.mrf.mxu1  ;;  %v2420_v62 = vld [vmem:[#allocation4 + $0x77] sm:$0xff] }
 0x1b7   : > { %v1983_v25 = vadd.f32 %v1871_v16, %v1571_v15  ;;  %v8033_v15 = vunpack.c.h.bf16 %v8862_v14  ;;  %v8036_v16 = vunpack.c.l.bf16 %v8883_v5 }
 0x1b9   : > { %v1304_v21 = vpop.f32.mrf.mxu0  ;;  %v2051_v27 = vadd.f32 %v8808_v36, %v1983_v25  ;;  %6272 = vmatmul.msk.bf16.gmra.mxu1 %vm701_vm2, %v8790_v4  ;;  %759 = vst.msk [vmem:[#allocation2 + $0x1d0] sm:$0xff] %vm701_vm2, %v8033_v15  ;;  %v818_v25 = vld [vmem:[#allocation2 + $0x1a7] sm:$0xff] }
 0x1ba   : > { %v1573_v39 = vadd.f32 %v1572_v10, %v1304_v21  ;;  %760 = vst.msk [vmem:[#allocation2 + $0x1d8] sm:$0xff] %vm701_vm2, %v8036_v16  ;;  %v819_v21 = vld [vmem:[#allocation2 + $0x1af] sm:$0xff] }
 0x1bb   : > { %v2115_v29 = vmax.f32 %v2051_v27, 0.0 }
 0x1bc   : > { %v2242_v35 = vld [vmem:[#allocation3 + $0xf0] ss:$2 sm:$0xff]  ;;  %v2306_v37 = vld [vmem:[#allocation3 + $0xf1] ss:$2 sm:$0xff] }
 0x1bd   : > { %2180 = vst.msk [vmem:[#allocation3 + $0x100] sm:$0xff] %vm2147_vm6, %v2115_v29  ;;  %v8872_v42 = vmax.f32 %v2242_v35, %v2306_v37  ;;  %v1106_v37 = vpack.c.bf16 %v819_v21, %v818_v25 }
 0x1be   : > { %v1873_v43 = vpop.f32.mrf.mxu2  ;;  %v1577_v53 = vpop.f32.mrf.mxu1 }
 0x1bf   : > { %v1984_v55 = vadd.f32 %v1873_v43, %v1573_v39  ;;  %2389 = vst.msk [vmem:[#allocation4 + $0x80] sm:$0xff] %vm2147_vm6, %v8872_v42  ;;  %v1676_v43 = vpack.c.bf16 %v883_v48, %v882_v24 }
 0x1c1   : > { %v1307_v4 = vpop.f32.mrf.mxu0  ;;  %v2052_v57 = vadd.f32 %v8808_v36, %v1984_v55 }
 0x1c2   : > { %v1576_v60 = vadd.f32 %v1575_v18, %v1307_v4 }
 0x1c3   : > { %v2116_v33 = vmax.f32 %v2052_v57, 0.0  ;;  %6304 = vmatmul.msk.bf16.gmra.mxu2 %vm701_vm2, %v1675_v31  ;;  %v8903_v57 = vld [vmem:[%s8396_s18 + $0xf0] sm:$0xff]  }
 0x1c4   : > { %6240 = vmatmul.msk.bf16.gmra.mxu0 %vm701_vm2, %v1105_v51 }
 0x1c5   : > { %2181 = vst.msk [vmem:[#allocation3 + $0x108] sm:$0xff] %vm2147_vm6, %v2116_v33 }
 0x1c6   : > { %v1876_v23 = vpop.f32.mrf.mxu2  ;;  %v2421_v10 = vld [vmem:[#allocation4 + $0x7f] sm:$0xff]  ;;  %v1580_v12 = vpop.f32.mrf.mxu1 }
 0x1c7   : > { %v1985_v54 = vadd.f32 %v1876_v23, %v1576_v60  ;;  %v2565_v9 = vpack.c.bf16 %v2421_v10, %v2420_v62  ;;  %v8037_v23 = vunpack.c.h.bf16 %v8883_v5  ;;  %v8040_v62 = vunpack.c.l.bf16 %v8903_v57 }
 0x1c9   : > { %v1309_v49 = vpop.f32.mrf.mxu0  ;;  %v2053_v19 = vadd.f32 %v8808_v36, %v1985_v54  ;;  %6326 = vmatmul.msk.bf16.gmra.mxu3 %vm2147_vm6, %v2565_v9  ;;  %6273 = vmatmul.msk.bf16.gmra.mxu1 %vm701_vm2, %v8815_v50  ;;  %761 = vst.msk [vmem:[#allocation2 + $0x1e0] sm:$0xff] %vm701_vm2, %v8037_v23  ;;  %v821_v9 = vld [vmem:[#allocation2 + $0x1bf] sm:$0xff] }
 0x1ca   : > { %v1578_v2 = vadd.f32 %v1577_v53, %v1309_v49  ;;  %762 = vst.msk [vmem:[#allocation2 + $0x1e8] sm:$0xff] %vm701_vm2, %v8040_v62  ;;  %v820_v49 = vld [vmem:[#allocation2 + $0x1b7] sm:$0xff]  ;;  %v8041_v62 = vunpack.c.h.bf16 %v8903_v57 }
 0x1cb   : > { %v2117_v18 = vmax.f32 %v2053_v19, 0.0  ;;  %v884_v19 = vld [vmem:[#allocation2 + $0x1b9] sm:$0xff]  ;;  %v1107_v21 = vpack.c.bf16 %v821_v9, %v820_v49  ;;  %v886_v49 = vld [vmem:[#allocation2 + $0x1c9] sm:$0xff] }
 0x1cc   : > { %v2244_v27 = vld [vmem:[#allocation3 + $0x100] ss:$2 sm:$0xff]  ;;  %v2308_v29 = vld [vmem:[#allocation3 + $0x101] ss:$2 sm:$0xff]  ;;  %763 = vst.msk [vmem:[#allocation2 + $0x1f0] sm:$0xff] %vm701_vm2, %v8041_v62 }
 0x1cd   : > { %2182 = vst.msk [vmem:[#allocation3 + $0x110] sm:$0xff] %vm2147_vm6, %v2117_v18  ;;  %v8894_v40 = vmax.f32 %v2244_v27, %v2308_v29  ;;  %v823_v9 = vld [vmem:[#allocation2 + $0x1cf] sm:$0xff] }
 0x1ce   : > { %v1878_v35 = vpop.f32.mrf.mxu2  ;;  %v1582_v50 = vpop.f32.mrf.mxu1 }
 0x1cf   : > { %v1986_v38 = vadd.f32 %v1878_v35, %v1578_v2  ;;  %2390 = vst.msk [vmem:[#allocation4 + $0x88] sm:$0xff] %vm2147_vm6, %v8894_v40 }
 0x1d0   : > { %v888_v62 = vld [vmem:[#allocation2 + $0x1d9] sm:$0xff] }
 0x1d1   : > { %v1312_v39 = vpop.f32.mrf.mxu0  ;;  %v2054_v51 = vadd.f32 %v8808_v36, %v1986_v38 }
 0x1d2   : > { %v1581_v4 = vadd.f32 %v1580_v12, %v1312_v39  ;;  %v885_v12 = vld [vmem:[#allocation2 + $0x1c1] sm:$0xff] }
 0x1d3   : > { %v2118_v55 = vmax.f32 %v2054_v51, 0.0  ;;  %6305 = vmatmul.msk.bf16.gmra.mxu2 %vm701_vm2, %v1676_v43  ;;  %v1038_v18 = vsel %vm982_vm4, 0.0, %v885_v12 }
 0x1d4   : > { %6241 = vmatmul.msk.bf16.gmra.mxu0 %vm701_vm2, %v1106_v37  ;;  %v1677_v2 = vpack.c.bf16 %v1038_v18, %v884_v19  ;;  %v887_v18 = vld [vmem:[#allocation2 + $0x1d1] sm:$0xff] }
 0x1d5   : > { %2183 = vst.msk [vmem:[#allocation3 + $0x118] sm:$0xff] %vm2147_vm6, %v2118_v55 }
 0x1d6   : > { %v1881_v53 = vpop.f32.mrf.mxu2  ;;  %v1585_v31 = vpop.f32.mrf.mxu1  ;;  %v2422_v39 = vld [vmem:[#allocation4 + $0x87] sm:$0xff] }
 0x1d7   : > { %v1987_v33 = vadd.f32 %v1881_v53, %v1581_v4  ;;  %v2486_v55 = vsel %vm903_vm3, 0.0, %v2422_v39  ;;  %v8928_v53 = vld [vmem:[%s8396_s18 + $0xf8] sm:$0xff]   ;;  %s6131_s18 = sshll.u32 %s561_s26, 4  ;;  %s6132_s18 = int_to_ptr.vmem [resolvable:$true] %s6131_s18 }
 0x1d8   : > { %v2453_v56 = vld [vmem:[#allocation4 + $0x81] sm:$0xff] }
 0x1d9   : > { %v1314_v60 = vpop.f32.mrf.mxu0  ;;  %v2055_v10 = vadd.f32 %v8808_v36, %v1987_v33  ;;  %6274 = vmatmul.msk.bf16.gmra.mxu1 %vm701_vm2, %v8840_v32 }
 0x1da   : > { %v1583_v24 = vadd.f32 %v1582_v50, %v1314_v60 }
 0x1db   : > { %v2119_v54 = vmax.f32 %v2055_v10, 0.0  ;;  %v822_v10 = vld [vmem:[#allocation2 + $0x1c7] sm:$0xff] }
 0x1dc   : > { %v2246_v15 = vld [vmem:[#allocation3 + $0x110] ss:$2 sm:$0xff]  ;;  %v2310_v16 = vld [vmem:[#allocation3 + $0x111] ss:$2 sm:$0xff] }
 0x1dd   : > { %2184 = vst.msk [vmem:[#allocation3 + $0x120] sm:$0xff] %vm2147_vm6, %v2119_v54  ;;  %v8915_v25 = vmax.f32 %v2246_v15, %v2310_v16  ;;  %v967_v15 = vsel %vm903_vm3, 0.0, %v822_v10 }
 0x1de   : > { %v1883_v32 = vpop.f32.mrf.mxu2  ;;  %v1587_v27 = vpop.f32.mrf.mxu1 }
 0x1df   : > { %v1988_v29 = vadd.f32 %v1883_v32, %v1583_v24  ;;  %2391 = vst.msk [vmem:[#allocation4 + $0x90] sm:$0xff] %vm2147_vm6, %v8915_v25 }
 0x1e1   : > { %v1317_v48 = vpop.f32.mrf.mxu0  ;;  %v2056_v37 = vadd.f32 %v8808_v36, %v1988_v29 }
 0x1e2   : > { %v1586_v38 = vadd.f32 %v1585_v31, %v1317_v48  ;;  %v8044_v31 = vunpack.c.l.bf16 %v8928_v53 }
 0x1e3   : > { %v2120_v50 = vmax.f32 %v2056_v37, 0.0  ;;  %6306 = vmatmul.msk.bf16.gmra.mxu2 %vm701_vm2, %v1677_v2  ;;  %v1678_v37 = vpack.c.bf16 %v887_v18, %v886_v49 }
 0x1e4   : > { %6242 = vmatmul.msk.bf16.gmra.mxu0 %vm701_vm2, %v1107_v21  ;;  %764 = vst.msk [vmem:[#allocation2 + $0x1f8] sm:$0xff] %vm701_vm2, %v8044_v31  ;;  %v825_v31 = vld [vmem:[#allocation2 + $0x1df] sm:$0xff] }
 0x1e5   : > { %2185 = vst.msk [vmem:[#allocation3 + $0x128] sm:$0xff] %vm2147_vm6, %v2120_v50 }
 0x1e6   : > { %v1886_v43 = vpop.f32.mrf.mxu2  ;;  %v2423_v51 = vld [vmem:[#allocation4 + $0x8f] sm:$0xff]  ;;  %v1590_v4 = vpop.f32.mrf.mxu1 }
 0x1e7   : > { %v1989_v33 = vadd.f32 %v1886_v43, %v1586_v38  ;;  %v2566_v23 = vpack.c.bf16 %v2423_v51, %v2486_v55  ;;  %v8045_v51 = vunpack.c.h.bf16 %v8928_v53 }
 0x1e9   : > { %v1319_v60 = vpop.f32.mrf.mxu0  ;;  %v2057_v12 = vadd.f32 %v8808_v36, %v1989_v33  ;;  %6327 = vmatmul.msk.bf16.gmra.mxu3 %vm2147_vm6, %v2566_v23  ;;  %6275 = vmatmul.msk.bf16.gmra.mxu1 %vm701_vm2, %v8862_v14  ;;  %v1108_v14 = vpack.c.bf16 %v823_v9, %v967_v15  ;;  %765 = vst.msk [vmem:[#allocation2 + $0x200] sm:$0xff] %vm701_vm2, %v8045_v51 }
 0x1ea   : > { %v1588_v24 = vadd.f32 %v1587_v27, %v1319_v60 }
 0x1eb   : > { %v2121_v54 = vmax.f32 %v2057_v12, 0.0 }
 0x1ec   : > { %v2248_v16 = vld [vmem:[#allocation3 + $0x120] ss:$2 sm:$0xff]  ;;  %v2312_v19 = vld [vmem:[#allocation3 + $0x121] ss:$2 sm:$0xff] }
 0x1ed   : > { %2186 = vst.msk [vmem:[#allocation3 + $0x130] sm:$0xff] %vm2147_vm6, %v2121_v54  ;;  %v8941_v32 = vmax.f32 %v2248_v16, %v2312_v19  ;;  %v889_v54 = vld [vmem:[#allocation2 + $0x1e1] sm:$0xff] }
 0x1ee   : > { %v1888_v21 = vpop.f32.mrf.mxu2  ;;  %v1592_v29 = vpop.f32.mrf.mxu1 }
 0x1ef   : > { %v1990_v48 = vadd.f32 %v1888_v21, %v1588_v24  ;;  %2392 = vst.msk [vmem:[#allocation4 + $0x98] sm:$0xff] %vm2147_vm6, %v8941_v32  ;;  %v1679_v21 = vpack.c.bf16 %v889_v54, %v888_v62 }
 0x1f1   : > { %v1322_v2 = vpop.f32.mrf.mxu0  ;;  %v2058_v50 = vadd.f32 %v8808_v36, %v1990_v48 }
 0x1f2   : > { %v1591_v39 = vadd.f32 %v1590_v4, %v1322_v2  ;;  %v824_v4 = vld [vmem:[#allocation2 + $0x1d7] sm:$0xff] }
 0x1f3   : > { %v2122_v38 = vmax.f32 %v2058_v50, 0.0  ;;  %6307 = vmatmul.msk.bf16.gmra.mxu2 %vm701_vm2, %v1678_v37  ;;  %v1109_v16 = vpack.c.bf16 %v825_v31, %v824_v4  ;;  %v891_v31 = vld [vmem:[#allocation2 + $0x1f1] sm:$0xff] }
 0x1f4   : > { %6243 = vmatmul.msk.bf16.gmra.mxu0 %vm701_vm2, %v1108_v14 }
 0x1f5   : > { %2187 = vst.msk [vmem:[#allocation3 + $0x138] sm:$0xff] %vm2147_vm6, %v2122_v38 }
 0x1f6   : > { %v1891_v27 = vpop.f32.mrf.mxu2  ;;  %v1595_v43 = vpop.f32.mrf.mxu1  ;;  %v2424_v37 = vld [vmem:[#allocation4 + $0x97] sm:$0xff] }
 0x1f7   : > { %v1991_v55 = vadd.f32 %v1891_v27, %v1591_v39 }
 0x1f9   : > { %v1324_v33 = vpop.f32.mrf.mxu0  ;;  %v2059_v60 = vadd.f32 %v8808_v36, %v1991_v55  ;;  %6276 = vmatmul.msk.bf16.gmra.mxu1 %vm701_vm2, %v8883_v5 }
 0x1fa   : > { %v1593_v49 = vadd.f32 %v1592_v29, %v1324_v33 }
 0x1fb   : > { %v2123_v23 = vmax.f32 %v2059_v60, 0.0  ;;  %v826_v60 = vld [vmem:[#allocation2 + $0x1e7] sm:$0xff] }
 0x1fc   : > { %v2250_v10 = vld [vmem:[#allocation3 + $0x130] ss:$2 sm:$0xff]  ;;  %v2314_v12 = vld [vmem:[#allocation3 + $0x131] ss:$2 sm:$0xff] }
 0x1fd   : > { %2188 = vst.msk [vmem:[#allocation3 + $0x140] sm:$0xff] %vm2147_vm6, %v2123_v23  ;;  %v8955_v9 = vmax.f32 %v2250_v10, %v2314_v12  ;;  %v827_v23 = vld [vmem:[#allocation2 + $0x1ef] sm:$0xff] }
 0x1fe   : > { %v1893_v15 = vpop.f32.mrf.mxu2  ;;  %v1597_v19 = vpop.f32.mrf.mxu1  ;;  %v7613_v12 = vld [vmem:[%s9760_s6 + $0x8] sm:$0xff] }
 0x1ff   : > { %v1992_v18 = vadd.f32 %v1893_v15, %v1593_v49  ;;  %2393 = vst.msk [vmem:[#allocation4 + $0xa0] sm:$0xff] %vm2147_vm6, %v8955_v9  ;;  %v1110_v15 = vpack.c.bf16 %v827_v23, %v826_v60  ;;  %2793 = vmatpush.bf16.msrb.mxu3 %v7613_v12 }
 0x201   : > { %v1327_v24 = vpop.f32.mrf.mxu0  ;;  %v2060_v14 = vadd.f32 %v8808_v36, %v1992_v18 }
 0x202   : > { %v1596_v29 = vadd.f32 %v1595_v43, %v1327_v24  ;;  %v890_v43 = vld [vmem:[#allocation2 + $0x1e9] sm:$0xff] }
 0x203   : > { %v2124_v48 = vmax.f32 %v2060_v14, 0.0  ;;  %6308 = vmatmul.msk.bf16.gmra.mxu2 %vm701_vm2, %v1679_v21  ;;  %v1680_v24 = vpack.c.bf16 %v891_v31, %v890_v43 }
 0x204   : > { %6244 = vmatmul.msk.bf16.gmra.mxu0 %vm701_vm2, %v1109_v16 }
 0x205   : > { %2189 = vst.msk [vmem:[#allocation3 + $0x148] sm:$0xff] %vm2147_vm6, %v2124_v48 }
 0x206   : > { %v1896_v2 = vpop.f32.mrf.mxu2  ;;  %v2425_v50 = vld [vmem:[#allocation4 + $0x9f] sm:$0xff]  ;;  %v1600_v38 = vpop.f32.mrf.mxu1 }
 0x207   : > { %v1993_v39 = vadd.f32 %v1896_v2, %v1596_v29  ;;  %v2567_v51 = vpack.c.bf16 %v2425_v50, %v2424_v37 }
 0x209   : > { %v1329_v27 = vpop.f32.mrf.mxu0  ;;  %v2061_v55 = vadd.f32 %v8808_v36, %v1993_v39  ;;  %6328 = vmatmul.msk.bf16.gmra.mxu3 %vm2147_vm6, %v2567_v51  ;;  %6277 = vmatmul.msk.bf16.gmra.mxu1 %vm701_vm2, %v8903_v57 }
 0x20a   : > { %v1598_v10 = vadd.f32 %v1597_v19, %v1329_v27  ;;  %v7616_v19 = vld [vmem:[%s9761_s7] sm:$0xff] }
 0x20b   : > { %v2125_v33 = vmax.f32 %v2061_v55, 0.0  ;;  %2963 = vmatpush.bf16.msrb.mxu0 %v7616_v19  ;;  %v893_v27 = vld [vmem:[#allocation2 + $0x201] sm:$0xff]  ;;  %v828_v55 = vld [vmem:[#allocation2 + $0x1f7] sm:$0xff] }
 0x20c   : > { %v2252_v62 = vld [vmem:[#allocation3 + $0x140] ss:$2 sm:$0xff]  ;;  %v2316_v4 = vld [vmem:[#allocation3 + $0x141] ss:$2 sm:$0xff]  ;;  %v1046_v23 = vsel %vm982_vm4, 0.0, %v893_v27 }
 0x20d   : > { %2190 = vst.msk [vmem:[#allocation3 + $0x150] sm:$0xff] %vm2147_vm6, %v2125_v33  ;;  %v8973_v54 = vmax.f32 %v2252_v62, %v2316_v4  ;;  %v829_v33 = vld [vmem:[#allocation2 + $0x1ff] sm:$0xff] }
 0x20e   : > { %v1898_v49 = vpop.f32.mrf.mxu2  ;;  %v1602_v16 = vpop.f32.mrf.mxu1 }
 0x20f   : > { %v1994_v57 = vadd.f32 %v1898_v49, %v1598_v10  ;;  %2394 = vst.msk [vmem:[#allocation4 + $0xa8] sm:$0xff] %vm2147_vm6, %v8973_v54  ;;  %v1111_v10 = vpack.c.bf16 %v829_v33, %v828_v55  ;;  %v2439_v33 = vld [vmem:[#allocation4 + $0x11] sm:$0xff] }
 0x211   : > { %v1332_v18 = vpop.f32.mrf.mxu0  ;;  %v2062_v21 = vadd.f32 %v8808_v36, %v1994_v57 }
 0x212   : > { %v1601_v48 = vadd.f32 %v1600_v38, %v1332_v18  ;;  %v892_v38 = vld [vmem:[#allocation2 + $0x1f9] sm:$0xff] }
 0x213   : > { %v2126_v14 = vmax.f32 %v2062_v21, 0.0  ;;  %6309 = vmatmul.msk.bf16.gmra.mxu2 %vm701_vm2, %v1680_v24 }
 0x214   : > { %6245 = vmatmul.msk.bf16.gmra.mxu0 %vm701_vm2, %v1110_v15  ;;  %v1681_v15 = vpack.c.bf16 %v1046_v23, %v892_v38 }
 0x215   : > { %2191 = vst.msk [vmem:[#allocation3 + $0x158] sm:$0xff] %vm2147_vm6, %v2126_v14 }
 0x216   : > { %v1901_v29 = vpop.f32.mrf.mxu2  ;;  %v1605_v2 = vpop.f32.mrf.mxu1  ;;  %v2426_v24 = vld [vmem:[#allocation4 + $0xa7] sm:$0xff] }
 0x217   : > { %v1995_v37 = vadd.f32 %v1901_v29, %v1601_v48  ;;  %v2490_v14 = vsel %vm903_vm3, 0.0, %v2426_v24 }
 0x219   : > { %v1334_v50 = vpop.f32.mrf.mxu0  ;;  %v2063_v39 = vadd.f32 %v8808_v36, %v1995_v37  ;;  %6278 = vmatmul.msk.bf16.gmra.mxu1 %vm701_vm2, %v8928_v53 }
 0x21a   : > { %v1603_v62 = vadd.f32 %v1602_v16, %v1334_v50 }
 0x21b   : > { %v2127_v51 = vmax.f32 %v2063_v39, 0.0 }
 0x21c   : > { %v2254_v43 = vld [vmem:[#allocation3 + $0x150] ss:$2 sm:$0xff]  ;;  %v2318_v60 = vld [vmem:[#allocation3 + $0x151] ss:$2 sm:$0xff] }
 0x21d   : > { %2192 = vst.msk [vmem:[#allocation3 + $0x160] sm:$0xff] %vm2147_vm6, %v2127_v51  ;;  %v8990_v4 = vmax.f32 %v2254_v43, %v2318_v60 }
 0x21e   : > { %v1903_v31 = vpop.f32.mrf.mxu2  ;;  %v1607_v12 = vpop.f32.mrf.mxu1 }
 0x21f   : > { %v1996_v49 = vadd.f32 %v1903_v31, %v1603_v62  ;;  %2395 = vst.msk [vmem:[#allocation4 + $0xb0] sm:$0xff] %vm2147_vm6, %v8990_v4  ;;  %v2438_v31 = vld [vmem:[#allocation4 + $0x9] sm:$0xff] }
 0x221   : > { %v1337_v53 = vpop.f32.mrf.mxu0  ;;  %v2064_v45 = vadd.f32 %v8808_v36, %v1996_v49  ;;  %v2876_v49 = vpack.c.bf16 %v2439_v33, %v2438_v31 }
 0x222   : > { %v1606_v16 = vadd.f32 %v1605_v2, %v1337_v53 }
 0x223   : > { %v2128_v18 = vmax.f32 %v2064_v45, 0.0  ;;  %6310 = vmatmul.msk.bf16.gmra.mxu2 %vm701_vm2, %v1681_v15 }
 0x224   : > { %6246 = vmatmul.msk.bf16.gmra.mxu0 %vm701_vm2, %v1111_v10  ;;  %v7621_v10 = vld [vmem:[%s9764_s10 + $0x18] sm:$0xff] }
 0x225   : > { %2193 = vst.msk [vmem:[#allocation3 + $0x168] sm:$0xff] %vm2147_vm6, %v2128_v18  ;;  %3523 = vmatpush.bf16.msrb.mxu2 %v7621_v10 }
 0x226   : > { %v1906_v19 = vpop.f32.mrf.mxu2  ;;  %v2427_v21 = vld [vmem:[#allocation4 + $0xaf] sm:$0xff]  ;;  %v1610_v48 = vpop.f32.mrf.mxu1 }
 0x227   : > { %v1997_v29 = vadd.f32 %v1906_v19, %v1606_v16  ;;  %v2568_v50 = vpack.c.bf16 %v2427_v21, %v2490_v14  ;;  %v9016_v16 = vadd.s32 24, %v8416_v17  ;;  %v2441_v14 = vld [vmem:[#allocation4 + $0x21] sm:$0xff] }
 0x229   : > { %v1339_v37 = vpop.f32.mrf.mxu0  ;;  %v2065_v39 = vadd.f32 %v8808_v36, %v1997_v29  ;;  %6329 = vmatmul.msk.bf16.gmra.mxu3 %vm2147_vm6, %v2568_v50  ;;  %vm2505_vm7 = vcmp.eq.s32.totalorder %v9016_v16, 31  ;;  %v7623_v16 = vld [vmem:[%s9763_s9 + $0x8] sm:$0xff] }
 0x22a   : > { %v1608_v55 = vadd.f32 %v1607_v12, %v1339_v37 }
 0x22b   : > { %v2129_v27 = vmax.f32 %v2065_v39, 0.0  ;;  %v9020_v39 = vpop.f32.mrf.mxu3 }
 0x22c   : > { %v2256_v2 = vld [vmem:[#allocation3 + $0x160] ss:$2 sm:$0xff]  ;;  %v2320_v51 = vld [vmem:[#allocation3 + $0x161] ss:$2 sm:$0xff] }
 0x22d   : > { %2194 = vst.msk [vmem:[#allocation3 + $0x170] sm:$0xff] %vm2147_vm6, %v2129_v27  ;;  %v9005_v43 = vmax.f32 %v2256_v2, %v2320_v51  ;;  %v2509_v27 = vsel %vm2505_vm7, 0.0, %v2441_v14 }
 0x22e   : > { %v1908_v60 = vpop.f32.mrf.mxu2  ;;  %v1612_v38 = vpop.f32.mrf.mxu1 }
 0x22f   : > { %v1998_v23 = vadd.f32 %v1908_v60, %v1608_v55  ;;  %2396 = vst.msk [vmem:[#allocation4 + $0xb8] sm:$0xff] %vm2147_vm6, %v9005_v43 }
 0x231   : > { %v1342_v62 = vpop.f32.mrf.mxu0  ;;  %v2066_v53 = vadd.f32 %v8808_v36, %v1998_v23  ;;  %v2440_v23 = vld [vmem:[#allocation4 + $0x19] sm:$0xff] }
 0x232   : > { %v1611_v15 = vadd.f32 %v1610_v48, %v1342_v62  ;;  %v7625_v62 = vld [vmem:[%s9763_s9 + $0x18] sm:$0xff]  ;;  %v2877_v31 = vpack.c.bf16 %v2509_v27, %v2440_v23 }
 0x233   : > { %v2130_v12 = vmax.f32 %v2066_v53, 0.0  ;;  %3426 = vmatpush.bf16.msrb.mxu1 %v7625_v62 }
 0x234   : > { %6367 = vmatmul.msk.bf16.vlgmr.msrb.gmra.mxu0 %vm2147_vm6, %v2876_v49 }
 0x235   : > { %2195 = vst.msk [vmem:[#allocation3 + $0x178] sm:$0xff] %vm2147_vm6, %v2130_v12 }
 0x236   : > { %v1911_v45 = vpop.f32.mrf.mxu2  ;;  %v1615_v18 = vpop.f32.mrf.mxu1 }
 0x237   : > { %v1999_v24 = vadd.f32 %v1911_v45, %v1611_v15  ;;  %v2428_v15 = vld [vmem:[#allocation4 + $0xb7] sm:$0xff] }
 0x239   : > { %v1344_v19 = vpop.f32.mrf.mxu0  ;;  %v2067_v21 = vadd.f32 %v8808_v36, %v1999_v24 }
 0x23a   : > { %v1613_v48 = vadd.f32 %v1612_v38, %v1344_v19  ;;  %v2447_v38 = vld [vmem:[#allocation4 + $0x51] sm:$0xff] }
 0x23b   : > { %v2131_v29 = vmax.f32 %v2067_v21, 0.0 }
 0x23c   : > { %v2258_v37 = vld [vmem:[#allocation3 + $0x170] ss:$2 sm:$0xff]  ;;  %v2322_v50 = vld [vmem:[#allocation3 + $0x171] ss:$2 sm:$0xff] }
 0x23d   : > { %2196 = vst.msk [vmem:[#allocation3 + $0x180] sm:$0xff] %vm2147_vm6, %v2131_v29  ;;  %v9025_v2 = vmax.f32 %v2258_v37, %v2322_v50  ;;  %v9037_v29 = vpop.f32.mrf.mxu3 }
 0x23e   : > { %v1913_v51 = vpop.f32.mrf.mxu2  ;;  %v1617_v55 = vpop.f32.mrf.mxu1 }
 0x23f   : > { %v2000_v33 = vadd.f32 %v1913_v51, %v1613_v48  ;;  %2397 = vst.msk [vmem:[#allocation4 + $0xc0] sm:$0xff] %vm2147_vm6, %v9025_v2 }
 0x241   : > { %v1347_v60 = vpop.f32.mrf.mxu0  ;;  %v2068_v10 = vadd.f32 %v8808_v36, %v2000_v33  ;;  %v2443_v33 = vld [vmem:[#allocation4 + $0x31] sm:$0xff] }
 0x242   : > { %v1616_v53 = vadd.f32 %v1615_v18, %v1347_v60 }
 0x243   : > { %v2132_v49 = vmax.f32 %v2068_v10, 0.0  ;;  %v2442_v10 = vld [vmem:[#allocation4 + $0x29] sm:$0xff] }
 0x244   : > { %6368 = vmatmul.msk.bf16.gmra.mxu0 %vm2147_vm6, %v2877_v31 }
 0x245   : > { %2197 = vst.msk [vmem:[#allocation3 + $0x188] sm:$0xff] %vm2147_vm6, %v2132_v49  ;;  %v9046_v49 = vpop.f32.mrf.mxu3 }
 0x246   : > { %v1916_v12 = vpop.f32.mrf.mxu2  ;;  %v2429_v45 = vld [vmem:[#allocation4 + $0xbf] sm:$0xff]  ;;  %v1620_v24 = vpop.f32.mrf.mxu1 }
 0x247   : > { %v2001_v19 = vadd.f32 %v1916_v12, %v1616_v53  ;;  %v2569_v14 = vpack.c.bf16 %v2429_v45, %v2428_v15  ;;  %v2878_v53 = vpack.c.bf16 %v2443_v33, %v2442_v10 }
 0x249   : > { %v1349_v21 = vpop.f32.mrf.mxu0  ;;  %v2069_v37 = vadd.f32 %v8808_v36, %v2001_v19  ;;  %6330 = vmatmul.msk.bf16.gmra.mxu3 %vm2147_vm6, %v2569_v14 }
 0x24a   : > { %v1618_v18 = vadd.f32 %v1617_v55, %v1349_v21 }
 0x24b   : > { %v2133_v50 = vmax.f32 %v2069_v37, 0.0 }
 0x24c   : > { %v2260_v48 = vld [vmem:[#allocation3 + $0x180] ss:$2 sm:$0xff]  ;;  %v2324_v27 = vld [vmem:[#allocation3 + $0x181] ss:$2 sm:$0xff] }
 0x24d   : > { %v9041_v51 = vmax.f32 %v2260_v48, %v2324_v27  ;;  %2198 = vst.msk [vmem:[#allocation3 + $0x190] sm:$0xff] %vm2147_vm6, %v2133_v50  ;;  %v9052_v50 = vpop.f32.mrf.mxu3  ;;  %v2445_v48 = vld [vmem:[#allocation4 + $0x41] sm:$0xff] }
 0x24e   : > { %v1918_v60 = vpop.f32.mrf.mxu2  ;;  %v1622_v23 = vpop.f32.mrf.mxu1 }
 0x24f   : > { %2398 = vst.msk [vmem:[#allocation4 + $0xc8] sm:$0xff] %vm2147_vm6, %v9041_v51  ;;  %v2002_v62 = vadd.f32 %v1918_v60, %v1618_v18 }
 0x251   : > { %v1352_v31 = vpop.f32.mrf.mxu0  ;;  %v2070_v12 = vadd.f32 %v8808_v36, %v2002_v62 }
 0x252   : > { %v1621_v45 = vadd.f32 %v1620_v24, %v1352_v31  ;;  %v2513_v24 = vsel %vm2505_vm7, 0.0, %v2445_v48 }
 0x253   : > { %v2134_v15 = vmax.f32 %v2070_v12, 0.0 }
 0x254   : > { %6369 = vmatmul.msk.bf16.gmra.mxu0 %vm2147_vm6, %v2878_v53 }
 0x255   : > { %2199 = vst.msk [vmem:[#allocation3 + $0x198] sm:$0xff] %vm2147_vm6, %v2134_v15  ;;  %v2444_v15 = vld [vmem:[#allocation4 + $0x39] sm:$0xff] }
 0x256   : > { %v1921_v55 = vpop.f32.mrf.mxu2  ;;  %v1625_v19 = vpop.f32.mrf.mxu1  ;;  %v2430_v48 = vld [vmem:[#allocation4 + $0xc7] sm:$0xff] }
 0x257   : > { %v2003_v21 = vadd.f32 %v1921_v55, %v1621_v45  ;;  %v2879_v55 = vpack.c.bf16 %v2513_v24, %v2444_v15 }
 0x259   : > { %v1354_v14 = vpop.f32.mrf.mxu0  ;;  %v2071_v37 = vadd.f32 %v8808_v36, %v2003_v21 }
 0x25a   : > { %v1623_v62 = vadd.f32 %v1622_v23, %v1354_v14 }
 0x25b   : > { %v2135_v27 = vmax.f32 %v2071_v37, 0.0  ;;  %v9064_v37 = vpop.f32.mrf.mxu3 }
 0x25c   : > { %v2262_v18 = vld [vmem:[#allocation3 + $0x190] ss:$2 sm:$0xff]  ;;  %v2326_v33 = vld [vmem:[#allocation3 + $0x191] ss:$2 sm:$0xff] }
 0x25d   : > { %v9054_v60 = vmax.f32 %v2262_v18, %v2326_v33  ;;  %2200 = vst.msk [vmem:[#allocation3 + $0x1a0] sm:$0xff] %vm2147_vm6, %v2135_v27  ;;  %v2494_v33 = vsel %vm903_vm3, 0.0, %v2430_v48 }
 0x25e   : > { %v1923_v31 = vpop.f32.mrf.mxu2  ;;  %v1627_v10 = vpop.f32.mrf.mxu1 }
 0x25f   : > { %2399 = vst.msk [vmem:[#allocation4 + $0xd0] sm:$0xff] %vm2147_vm6, %v9054_v60  ;;  %v2004_v53 = vadd.f32 %v1923_v31, %v1623_v62 }
 0x261   : > { %v1357_v12 = vpop.f32.mrf.mxu0  ;;  %v2072_v21 = vadd.f32 %v8808_v36, %v2004_v53 }
 0x262   : > { %v1626_v14 = vadd.f32 %v1625_v19, %v1357_v12 }
 0x263   : > { %v2136_v23 = vmax.f32 %v2072_v21, 0.0 }
 0x264   : > { %6370 = vmatmul.msk.bf16.gmra.mxu0 %vm2147_vm6, %v2879_v55  ;;  %v9072_v55 = vpop.f32.mrf.mxu3 }
 0x265   : > { %2201 = vst.msk [vmem:[#allocation3 + $0x1a8] sm:$0xff] %vm2147_vm6, %v2136_v23 }
 0x266   : > { %v1926_v27 = vpop.f32.mrf.mxu2  ;;  %v2431_v18 = vld [vmem:[#allocation4 + $0xcf] sm:$0xff]  ;;  %v1630_v62 = vpop.f32.mrf.mxu1 }
 0x267   : > { %v2005_v31 = vadd.f32 %v1926_v27, %v1626_v14  ;;  %v2570_v24 = vpack.c.bf16 %v2431_v18, %v2494_v33  ;;  %v2446_v18 = vld [vmem:[#allocation4 + $0x49] sm:$0xff] }
 0x269   : > { %v1359_v45 = vpop.f32.mrf.mxu0  ;;  %v2073_v53 = vadd.f32 %v8808_v36, %v2005_v31  ;;  %6331 = vmatmul.msk.bf16.gmra.mxu3 %vm2147_vm6, %v2570_v24  ;;  %v2880_v31 = vpack.c.bf16 %v2447_v38, %v2446_v18 }
 0x26a   : > { %v1628_v23 = vadd.f32 %v1627_v10, %v1359_v45 }
 0x26b   : > { %v2137_v15 = vmax.f32 %v2073_v53, 0.0 }
 0x26c   : > { %v2264_v19 = vld [vmem:[#allocation3 + $0x1a0] ss:$2 sm:$0xff]  ;;  %v2328_v12 = vld [vmem:[#allocation3 + $0x1a1] ss:$2 sm:$0xff] }
 0x26d   : > { %v9074_v21 = vmax.f32 %v2264_v19, %v2328_v12  ;;  %2202 = vst.msk [vmem:[#allocation3 + $0x1b0] sm:$0xff] %vm2147_vm6, %v2137_v15  ;;  %v9081_v12 = vpop.f32.mrf.mxu3 }
 0x26e   : > { %v1928_v48 = vpop.f32.mrf.mxu2  ;;  %v1632_v33 = vpop.f32.mrf.mxu1 }
 0x26f   : > { %2400 = vst.msk [vmem:[#allocation4 + $0xd8] sm:$0xff] %vm2147_vm6, %v9074_v21  ;;  %v2006_v14 = vadd.f32 %v1928_v48, %v1628_v23  ;;  %v2449_v48 = vld [vmem:[#allocation4 + $0x61] sm:$0xff] }
 0x271   : > { %v1362_v27 = vpop.f32.mrf.mxu0  ;;  %v2074_v24 = vadd.f32 %v8808_v36, %v2006_v14 }
 0x272   : > { %v1631_v19 = vadd.f32 %v1630_v62, %v1362_v27  ;;  %v2517_v62 = vsel %vm2505_vm7, 0.0, %v2449_v48 }
 0x273   : > { %v2138_v53 = vmax.f32 %v2074_v24, 0.0 }
 0x274   : > { %6371 = vmatmul.msk.bf16.gmra.mxu0 %vm2147_vm6, %v2880_v31 }
 0x275   : > { %2203 = vst.msk [vmem:[#allocation3 + $0x1b8] sm:$0xff] %vm2147_vm6, %v2138_v53  ;;  %v9090_v27 = vpop.f32.mrf.mxu3 }
 0x276   : > { %v1931_v10 = vpop.f32.mrf.mxu2  ;;  %v1635_v23 = vpop.f32.mrf.mxu1  ;;  %v2463_v58 = vld [vmem:[#allocation4 + $0xd1] sm:$0xff] }
 0x277   : > { %v2007_v45 = vadd.f32 %v1931_v10, %v1631_v19  ;;  %v2448_v19 = vld [vmem:[#allocation4 + $0x59] sm:$0xff] }
 0x279   : > { %v1364_v15 = vpop.f32.mrf.mxu0  ;;  %v2075_v57 = vadd.f32 %v8808_v36, %v2007_v45 }
 0x27a   : > { %v1633_v14 = vadd.f32 %v1632_v33, %v1364_v15 }
 0x27b   : > { %v2139_v5 = vmax.f32 %v2075_v57, 0.0 }
 0x27c   : > { %v2266_v35 = vld [vmem:[#allocation3 + $0x1b0] ss:$2 sm:$0xff]  ;;  %v2330_v38 = vld [vmem:[#allocation3 + $0x1b1] ss:$2 sm:$0xff] }
 0x27d   : > { %v9085_v18 = vmax.f32 %v2266_v35, %v2330_v38  ;;  %2204 = vst.msk [vmem:[#allocation3 + $0x1c0] sm:$0xff] %vm2147_vm6, %v2139_v5  ;;  %v2881_v35 = vpack.c.bf16 %v2517_v62, %v2448_v19  ;;  %v9099_v15 = vpop.f32.mrf.mxu3  ;;  %v2432_v38 = vld [vmem:[#allocation4 + $0xd7] sm:$0xff]  ;;  %v9104_v62 = vld [vmem:[%s9758_s4] ss:$0 sm:$0xff] }
 0x27e   : > { %v1933_v31 = vpop.f32.mrf.mxu2  ;;  %v1637_v45 = vpop.f32.mrf.mxu1 }
 0x27f   : > { %2401 = vst.msk [vmem:[#allocation4 + $0xe0] sm:$0xff] %vm2147_vm6, %v9085_v18  ;;  %v2008_v24 = vadd.f32 %v1933_v31, %v1633_v14 }
 0x281   : > { %v1367_v53 = vpop.f32.mrf.mxu0  ;;  %v2076_v10 = vadd.f32 %v8808_v36, %v2008_v24 }
 0x282   : > { %v1636_v33 = vadd.f32 %v1635_v23, %v1367_v53 }
 0x283   : > { %v2140_v5 = vmax.f32 %v2076_v10, 0.0  ;;  %v2451_v10 = vld [vmem:[#allocation4 + $0x71] sm:$0xff] }
 0x284   : > { %6372 = vmatmul.msk.bf16.gmra.mxu0 %vm2147_vm6, %v2881_v35 }
 0x285   : > { %2205 = vst.msk [vmem:[#allocation3 + $0x1c8] sm:$0xff] %vm2147_vm6, %v2140_v5 }
 0x286   : > { %v1936_v48 = vpop.f32.mrf.mxu2  ;;  %v2433_v14 = vld [vmem:[#allocation4 + $0xdf] sm:$0xff]  ;;  %v1640_v5 = vpop.f32.mrf.mxu1 }
 0x287   : > { %v2009_v31 = vadd.f32 %v1936_v48, %v1636_v33  ;;  %v2571_v44 = vpack.c.bf16 %v2433_v14, %v2432_v38  ;;  %v2450_v14 = vld [vmem:[#allocation4 + $0x69] sm:$0xff] }
 0x289   : > { %v1369_v0 = vpop.f32.mrf.mxu0  ;;  %v2077_v36 = vadd.f32 %v9104_v62, %v2009_v31  ;;  %6332 = vmatmul.msk.bf16.gmra.mxu3 %vm2147_vm6, %v2571_v44  ;;  %v7612_v44 = vld [vmem:[%s9760_s6] sm:$0xff]  ;;  %v9116_v31 = vpop.f32.mrf.mxu3 }
 0x28a   : > { %v1638_v35 = vadd.f32 %v1637_v45, %v1369_v0  ;;  %2794 = vmatpush.bf16.msrb.mxu3 %v7612_v44 }
 0x28b   : > { %v2141_v23 = vmax.f32 %v2077_v36, 0.0  ;;  %v2882_v36 = vpack.c.bf16 %v2451_v10, %v2450_v14 }
 0x28c   : > { %v2268_v24 = vld [vmem:[#allocation3 + $0x1c0] ss:$2 sm:$0xff]  ;;  %v2332_v53 = vld [vmem:[#allocation3 + $0x1c1] ss:$2 sm:$0xff] }
 0x28d   : > { %v9108_v19 = vmax.f32 %v2268_v24, %v2332_v53  ;;  %2206 = vst.msk [vmem:[#allocation3 + $0x1d0] sm:$0xff] %vm2147_vm6, %v2141_v23 }
 0x28e   : > { %v1938_v33 = vpop.f32.mrf.mxu2  ;;  %v1642_v57 = vpop.f32.mrf.mxu1 }
 0x28f   : > { %2402 = vst.msk [vmem:[#allocation4 + $0xe8] sm:$0xff] %vm2147_vm6, %v9108_v19  ;;  %v2010_v48 = vadd.f32 %v1938_v33, %v1638_v35 }
 0x291   : > { %v1372_v38 = vpop.f32.mrf.mxu0  ;;  %v2078_v24 = vadd.f32 %v9104_v62, %v2010_v48  ;;  %v9121_v33 = vpop.f32.mrf.mxu3 }
 0x292   : > { %v1641_v45 = vadd.f32 %v1640_v5, %v1372_v38  ;;  %v2521_v5 = vsel %vm2505_vm7, 0.0, %v2453_v56 }
 0x293   : > { %v2142_v0 = vmax.f32 %v2078_v24, 0.0  ;;  %v2452_v24 = vld [vmem:[#allocation4 + $0x79] sm:$0xff] }
 0x294   : > { %6373 = vmatmul.msk.bf16.gmra.mxu0 %vm2147_vm6, %v2882_v36 }
 0x295   : > { %2207 = vst.msk [vmem:[#allocation3 + $0x1d8] sm:$0xff] %vm2147_vm6, %v2142_v0 }
 0x296   : > { %v1941_v23 = vpop.f32.mrf.mxu2  ;;  %v2465_v30 = vld [vmem:[#allocation4 + $0xe1] sm:$0xff] }
 0x297   : > { %v2011_v53 = vadd.f32 %v1941_v23, %v1641_v45  ;;  %v2883_v45 = vpack.c.bf16 %v2521_v5, %v2452_v24 }
 0x299   : > { %v1374_v35 = vpop.f32.mrf.mxu0  ;;  %v2079_v13 = vadd.f32 %v9104_v62, %v2011_v53  ;;  %v9134_v53 = vpop.f32.mrf.mxu3 }
 0x29a   : > { %v1643_v44 = vadd.f32 %v1642_v57, %v1374_v35  ;;  %v2434_v35 = vld [vmem:[#allocation4 + $0xe7] sm:$0xff] }
 0x29b   : > { %v2143_v34 = vmax.f32 %v2079_v13, 0.0 }
 0x29c   : > { %v2270_v10 = vld [vmem:[#allocation3 + $0x1d0] ss:$2 sm:$0xff]  ;;  %v2334_v14 = vld [vmem:[#allocation3 + $0x1d1] ss:$2 sm:$0xff] }
 0x29d   : > { %v9124_v48 = vmax.f32 %v2270_v10, %v2334_v14  ;;  %2208 = vst.msk [vmem:[#allocation3 + $0x1e0] sm:$0xff] %vm2147_vm6, %v2143_v34  ;;  %v1645_v34 = vpop.f32.mrf.mxu1 }
 0x29e   : > { %v1943_v38 = vpop.f32.mrf.mxu2 }
 0x29f   : > { %2403 = vst.msk [vmem:[#allocation4 + $0xf0] sm:$0xff] %vm2147_vm6, %v9124_v48  ;;  %v2012_v36 = vadd.f32 %v1943_v38, %v1643_v44  ;;  %v2498_v44 = vsel %vm903_vm3, 0.0, %v2434_v35  ;;  %v2455_v35 = vld [vmem:[#allocation4 + $0x91] sm:$0xff] }
 0x2a1   : > { %v1377_v13 = vpop.f32.mrf.mxu0  ;;  %v2080_v23 = vadd.f32 %v9104_v62, %v2012_v36  ;;  %v9142_v36 = vpop.f32.mrf.mxu3 }
 0x2a2   : > { %v1646_v56 = vadd.f32 %v1645_v34, %v1377_v13 }
 0x2a3   : > { %v2144_v57 = vmax.f32 %v2080_v23, 0.0 }
 0x2a4   : > { %6374 = vmatmul.msk.bf16.gmra.mxu0 %vm2147_vm6, %v2883_v45 }
 0x2a5   : > { %2209 = vst.msk [vmem:[#allocation3 + $0x1e8] sm:$0xff] %vm2147_vm6, %v2144_v57  ;;  %v1647_v34 = vpop.f32.mrf.mxu1  ;;  %v7620_v57 = vld [vmem:[%s9764_s10 + $0x10] sm:$0xff] }
 0x2a6   : > { %v1946_v10 = vpop.f32.mrf.mxu2  ;;  %v2435_v14 = vld [vmem:[#allocation4 + $0xef] sm:$0xff]  ;;  %3524 = vmatpush.bf16.msrb.mxu2 %v7620_v57 }
 0x2a7   : > { %v2013_v38 = vadd.f32 %v1946_v10, %v1646_v56  ;;  %v2572_v0 = vpack.c.bf16 %v2435_v14, %v2498_v44  ;;  %v2454_v14 = vld [vmem:[#allocation4 + $0x89] sm:$0xff]  ;;  %v7624_v44 = vld [vmem:[%s9763_s9 + $0x10] sm:$0xff] }
 0x2a8   : > { %3427 = vmatpush.bf16.msrb.mxu1 %v7624_v44 }
 0x2a9   : > { %v2081_v5 = vadd.f32 %v9104_v62, %v2013_v38  ;;  %6333 = vmatmul.msk.bf16.gmra.mxu3 %vm2147_vm6, %v2572_v0  ;;  %v1379_v24 = vpop.f32.mrf.mxu0  ;;  %v2884_v38 = vpack.c.bf16 %v2455_v35, %v2454_v14 }
 0x2aa   : > { %v1648_v56 = vadd.f32 %v1647_v34, %v1379_v24  ;;  %v9157_v24 = vpop.f32.mrf.mxu3 }
 0x2ab   : > { %v2145_v45 = vmax.f32 %v2081_v5, 0.0 }
 0x2ac   : > { %v2272_v23 = vld [vmem:[#allocation3 + $0x1e0] ss:$2 sm:$0xff]  ;;  %v2336_v13 = vld [vmem:[#allocation3 + $0x1e1] ss:$2 sm:$0xff]  ;;  %3428 = vmatpush.bf16.msrb.mxu1 %v7623_v16 }
 0x2ad   : > { %v9147_v20 = vmax.f32 %v2272_v23, %v2336_v13  ;;  %2210 = vst.msk [vmem:[#allocation3 + $0x1f0] sm:$0xff] %vm2147_vm6, %v2145_v45  ;;  %v2457_v23 = vld [vmem:[#allocation4 + $0xa1] sm:$0xff] }
 0x2ae   : > { %v1948_v10 = vpop.f32.mrf.mxu2  ;;  %v2525_v35 = vsel %vm2505_vm7, 0.0, %v2457_v23  ;;  %v2458_v23 = vld [vmem:[#allocation4 + $0xa9] sm:$0xff] }
 0x2af   : > { %2404 = vst.msk [vmem:[#allocation4 + $0xf8] sm:$0xff] %vm2147_vm6, %v9147_v20  ;;  %v2014_v0 = vadd.f32 %v1948_v10, %v1648_v56 }
 0x2b1   : > { %v2082_v5 = vadd.f32 %v9104_v62, %v2014_v0  ;;  %v2456_v62 = vld [vmem:[#allocation4 + $0x99] sm:$0xff] }
 0x2b2   : > { %v9160_v13 = vpop.f32.mrf.mxu3  ;;  %v2885_v0 = vpack.c.bf16 %v2525_v35, %v2456_v62  ;;  %v2461_v35 = vld [vmem:[#allocation4 + $0xc1] sm:$0xff]  ;;  %v9183_v62 = vpop.f32.mrf.mxu0 }
 0x2b3   : > { %v2146_v45 = vmax.f32 %v2082_v5, 0.0 }
 0x2b4   : > { %6375 = vmatmul.msk.bf16.gmra.mxu0 %vm2147_vm6, %v2884_v38 }
 0x2b5   : > { %2211 = vst.msk [vmem:[#allocation3 + $0x1f8] sm:$0xff] %vm2147_vm6, %v2146_v45  ;;  %v2459_v45 = vld [vmem:[#allocation4 + $0xb1] sm:$0xff] }
 0x2b6   : > { %v2436_v44 = vld [vmem:[#allocation4 + $0xf7] sm:$0xff] }
 0x2ba   : > { %v9171_v14 = vpop.f32.mrf.mxu3 }
 0x2bc   : > { %v2274_v34 = vld [vmem:[#allocation3 + $0x1f0] ss:$2 sm:$0xff]  ;;  %v2338_v57 = vld [vmem:[#allocation3 + $0x1f1] ss:$2 sm:$0xff] }
 0x2bd   : > { %v9162_v56 = vmax.f32 %v2274_v34, %v2338_v57  ;;  %v2886_v57 = vpack.c.bf16 %v2459_v45, %v2458_v23  ;;  %v9190_v45 = vpop.f32.mrf.mxu0 }
 0x2bf   : > { %2405 = vst.msk [vmem:[#allocation4 + $0x100] sm:$0xff] %vm2147_vm6, %v9162_v56 }
 0x2c2   : > { %v9174_v34 = vpop.f32.mrf.mxu3 }
 0x2c4   : > { %6376 = vmatmul.msk.bf16.gmra.mxu0 %vm2147_vm6, %v2885_v0  ;;  %v2529_v0 = vsel %vm2505_vm7, 0.0, %v2461_v35 }
 0x2c5   : > { %v9198_v23 = vpop.f32.mrf.mxu0 }
 0x2c6   : > { %v2437_v38 = vld [vmem:[#allocation4 + $0xff] sm:$0xff] }
 0x2c7   : > { %v2573_v5 = vpack.c.bf16 %v2437_v38, %v2436_v44  ;;  %v2460_v44 = vld [vmem:[#allocation4 + $0xb9] sm:$0xff] }
 0x2c9   : > { %6334 = vmatmul.msk.bf16.gmra.mxu3 %vm2147_vm6, %v2573_v5  ;;  %v2887_v5 = vpack.c.bf16 %v2529_v0, %v2460_v44  ;;  %v9790_v0 = vpack.c.bf16 %v8646_v63, %v8622_v22  ;;  %v9793_v22 = vpack.c.bf16 %v8691_v11, %v8672_v41  ;;  %v2467_v63 = vld [vmem:[#allocation4 + $0xf1] sm:$0xff]  ;;  %v2469_v41 = vld [vmem:[#allocation4 + $0x101] sm:$0xff]  ;;  %v2468_v11 = vld [vmem:[#allocation4 + $0xf9] sm:$0xff] }
 0x2ca   : > { %v9177_v8 = vpop.f32.mrf.mxu3 }
 0x2cd   : > { %v9207_v44 = vpop.f32.mrf.mxu0 }
 0x2d2   : > { %v9187_v38 = vpop.f32.mrf.mxu3 }
 0x2d4   : > { %6377 = vmatmul.msk.bf16.gmra.mxu0 %vm2147_vm6, %v2886_v57 }
 0x2d9   : > { %6343 = vmatmul.msk.bf16.vlgmr.msrb.gmra.mxu3 %vm2147_vm6, %v2538_v1  ;;  %v2462_v1 = vld [vmem:[#allocation4 + $0xc9] sm:$0xff] }
 0x2da   : > { %v9196_v28 = vpop.f32.mrf.mxu3  ;;  %v2888_v57 = vpack.c.bf16 %v2463_v58, %v2462_v1  ;;  %v9216_v1 = vpop.f32.mrf.mxu0 }
 0x2e2   : > { %v9200_v35 = vpop.f32.mrf.mxu3 }
 0x2e4   : > { %6378 = vmatmul.msk.bf16.gmra.mxu0 %vm2147_vm6, %v2887_v5  ;;  %v2464_v5 = vld [vmem:[#allocation4 + $0xd9] sm:$0xff] }
 0x2e9   : > { %6344 = vmatmul.msk.bf16.gmra.mxu3 %vm2147_vm6, %v2539_v3  ;;  %v2533_v3 = vsel %vm2505_vm7, 0.0, %v2465_v30 }
 0x2ea   : > { %v9209_v59 = vpop.f32.mrf.mxu3  ;;  %v2889_v10 = vpack.c.bf16 %v2533_v3, %v2464_v5  ;;  %v9795_v5 = vpack.c.bf16 %v8734_v26, %v8713_v52  ;;  %v7619_v52 = vld [vmem:[%s9764_s10 + $0x8] sm:$0xff]  ;;  %v7629_v26 = vld [vmem:[%s9765_s11 + $0x18] sm:$0xff] }
 0x2eb   : > { %9791 = vst [vmem:[#allocation18_spill] sm:$0xff] %v9209_v59  ;;  %v2466_v59 = vld [vmem:[#allocation4 + $0xe9] sm:$0xff]  ;;  %3525 = vmatpush.bf16.msrb.mxu2 %v7619_v52  ;;  %3636 = vmatpush.bf16.msra.mxu3 %v7629_v26 }
 0x2ec   : > { %v2890_v30 = vpack.c.bf16 %v2467_v63, %v2466_v59 }
 0x2f2   : > { %v9214_v58 = vpop.f32.mrf.mxu3 }
 0x2f3   : > { %9792 = vst [vmem:[#allocation19_spill] sm:$0xff] %v9214_v58 }
 0x2f4   : > { %6379 = vmatmul.msk.bf16.gmra.mxu0 %vm2147_vm6, %v2888_v57 }
 0x2f9   : > { %6345 = vmatmul.msk.bf16.gmra.mxu3 %vm2147_vm6, %v9790_v0  ;;  %v9224_v0 = vpop.f32.mrf.mxu0 }
 0x2fa   : > { %v9222_v57 = vpop.f32.mrf.mxu3 }
 0x2fb   : > { %9794 = vst [vmem:[#allocation20_spill] sm:$0xff] %v9222_v57 }
 0x302   : > { %v9227_v3 = vpop.f32.mrf.mxu3 }
 0x304   : > { %6380 = vmatmul.msk.bf16.gmra.mxu0 %vm2147_vm6, %v2889_v10  ;;  %v9229_v10 = vpop.f32.mrf.mxu0 }
 0x309   : > { %6346 = vmatmul.msk.bf16.gmra.mxu3 %vm2147_vm6, %v9793_v22  ;;  %v2537_v22 = vsel %vm2505_vm7, 0.0, %v2469_v41  ;;  %v9798_v41 = vpack.c.bf16 %v8872_v42, %v8853_v61  ;;  %v9285_v61 = vld [vmem:[%s9762_s8] ss:$0 sm:$0xff] }
 0x30a   : > { %v9237_v57 = vpop.f32.mrf.mxu3  ;;  %v2891_v58 = vpack.c.bf16 %v2537_v22, %v2468_v11 }
 0x30c   : > { %v9239_v59 = vpop.f32.mrf.mxu0 }
 0x312   : > { %v9242_v63 = vpop.f32.mrf.mxu3 }
 0x314   : > { %6381 = vmatmul.msk.bf16.gmra.mxu0 %vm2147_vm6, %v2890_v30  ;;  %v9796_v30 = vpack.c.bf16 %v8779_v46, %v8760_v6  ;;  %v9797_v6 = vpack.c.bf16 %v8827_v7, %v8801_v47  ;;  %v9800_v47 = vpack.c.bf16 %v8915_v25, %v8894_v40  ;;  %v7618_v25 = vld [vmem:[%s9764_s10] sm:$0xff] }
 0x315   : > { %3526 = vmatpush.bf16.msrb.mxu2 %v7618_v25 }
 0x319   : > { %6347 = vmatmul.msk.bf16.gmra.mxu3 %vm2147_vm6, %v9795_v5 }
 0x324   : > { %6382 = vmatmul.msk.bf16.gmra.mxu0 %vm2147_vm6, %v2891_v58  ;;  %v9257_v58 = vpop.f32.mrf.mxu3 }
 0x329   : > { %6348 = vmatmul.msk.bf16.gmra.mxu3 %vm2147_vm6, %v9796_v30  ;;  %v9799_v30 = vmov 0.0  }
 0x32a   : > { %3258 = vst.msk [vmem:[#allocation6 + $0x7] sm:$0x1] %vm3257_vm8, %v9799_v30 }
 0x32b   : > { %3259 = vst.msk [vmem:[#allocation6 + $0x88] sm:$0x1] %vm3257_vm8, %v9799_v30 }
 0x32c   : > { %v9263_v46 = vpop.f32.mrf.mxu3 }
 0x334   : > { %v9265_v5 = vpop.f32.mrf.mxu3 }
 0x339   : > { %6349 = vmatmul.msk.bf16.gmra.mxu3 %vm2147_vm6, %v9797_v6 }
 0x349   : > { %6350 = vmatmul.msk.bf16.gmra.mxu3 %vm2147_vm6, %v9798_v41 }
 0x34c   : > { %v9271_v11 = vpop.f32.mrf.mxu3 }
 0x354   : > { %v9273_v22 = vpop.f32.mrf.mxu3 }
 0x359   : > { %6351 = vmatmul.msk.bf16.gmra.mxu3 %vm2147_vm6, %v9800_v47 }
 0x35c   : > { %v2796_v7 = vpop.f32.mrf.mxu3 }
 0x35d   : > { %v2797_v52 = vadd.f32 %v2796_v7, %v9020_v39  ;;  %v7622_v7 = vld [vmem:[%s9763_s9] sm:$0xff] }
 0x35e   : > { %3429 = vmatpush.bf16.msrb.mxu1 %v7622_v7 }
 0x35f   : > { %v3045_v42 = vadd.f32 %v9183_v62, %v2797_v52  ;;  %v9801_v62 = vpack.c.bf16 %v8955_v9, %v8941_v32  ;;  %v9306_v52 = vpop.f32.mrf.mxu0 }
 0x361   : > { %v3081_v26 = vadd.f32 %v9285_v61, %v3045_v42 }
 0x363   : > { %v3113_v16 = vmax.f32 %v3081_v26, 0.0 }
 0x364   : > { %v2798_v6 = vpop.f32.mrf.mxu3 }
 0x365   : > { %3146 = vst.msk [vmem:[#allocation5] sm:$0xff] %vm3145_vm9, %v3113_v16  ;;  %v2799_v40 = vadd.f32 %v2798_v6, %v9037_v29 }
 0x367   : > { %v3046_v39 = vadd.f32 %v9190_v45, %v2799_v40  ;;  %v7628_v40 = vld [vmem:[%s9765_s11 + $0x10] sm:$0xff] }
 0x368   : > { %3637 = vmatpush.bf16.msra.mxu3 %v7628_v40 }
 0x369   : > { %v3082_v41 = vadd.f32 %v9285_v61, %v3046_v39  ;;  %6352 = vmatmul.msk.bf16.gmra.mxu3 %vm2147_vm6, %v9801_v62  ;;  %v9802_v39 = vpack.c.bf16 %v8990_v4, %v8973_v54 }
 0x36b   : > { %v3114_v30 = vmax.f32 %v3082_v41, 0.0  ;;  %v2987_v41 = vpop.f32.mrf.mxu0 }
 0x36c   : > { %v2801_v47 = vpop.f32.mrf.mxu3 }
 0x36d   : > { %3147 = vst.msk [vmem:[#allocation5 + $0x8] sm:$0xff] %vm3145_vm9, %v3114_v30  ;;  %v2802_v29 = vadd.f32 %v2801_v47, %v9046_v49 }
 0x36f   : > { %v3047_v45 = vadd.f32 %v9198_v23, %v2802_v29 }
 0x371   : > { %v3083_v42 = vadd.f32 %v9285_v61, %v3047_v45 }
 0x373   : > { %v3115_v32 = vmax.f32 %v3083_v42, 0.0  ;;  %v9325_v7 = vpop.f32.mrf.mxu0 }
 0x374   : > { %v2803_v9 = vpop.f32.mrf.mxu3  ;;  %v3178_v26 = vld [vmem:[#allocation5] ss:$2 sm:$0xff]  ;;  %v3210_v16 = vld [vmem:[#allocation5 + $0x1] ss:$2 sm:$0xff] }
 0x375   : > { %3148 = vst.msk [vmem:[#allocation5 + $0x10] sm:$0xff] %vm3145_vm9, %v3115_v32  ;;  %v2804_v6 = vadd.f32 %v2803_v9, %v9052_v50  ;;  %v3241_v49 = vmax.f32 %v3178_v26, %v3210_v16  ;;  %v9803_v26 = vpack.c.bf16 %v9025_v2, %v9005_v43 }
 0x377   : > { %v3048_v23 = vadd.f32 %v9207_v44, %v2804_v6  ;;  %3260 = vst.msk [vmem:[#allocation6 + $0x8] sm:$0xff] %vm3145_vm9, %v3241_v49 }
 0x379   : > { %v3084_v25 = vadd.f32 %v9285_v61, %v3048_v23  ;;  %6353 = vmatmul.msk.bf16.gmra.mxu3 %vm2147_vm6, %v9802_v39 }
 0x37b   : > { %v3116_v62 = vmax.f32 %v3084_v25, 0.0 }
 0x37c   : > { %v2806_v50 = vpop.f32.mrf.mxu3 }
 0x37d   : > { %3149 = vst.msk [vmem:[#allocation5 + $0x18] sm:$0xff] %vm3145_vm9, %v3116_v62  ;;  %v2807_v30 = vadd.f32 %v2806_v50, %v9064_v37 }
 0x37e   : > { %v3276_v6 = vld [vmem:[#allocation6 + $0x7] sm:$0xff] }
 0x37f   : > { %v3049_v47 = vadd.f32 %v9216_v1, %v2807_v30 }
 0x381   : > { %v3085_v44 = vadd.f32 %v9285_v61, %v3049_v47 }
 0x383   : > { %v3117_v29 = vmax.f32 %v3085_v44, 0.0 }
 0x384   : > { %v2808_v45 = vpop.f32.mrf.mxu3  ;;  %v3180_v42 = vld [vmem:[#allocation5 + $0x10] ss:$2 sm:$0xff]  ;;  %v3212_v32 = vld [vmem:[#allocation5 + $0x11] ss:$2 sm:$0xff] }
 0x385   : > { %3150 = vst.msk [vmem:[#allocation5 + $0x20] sm:$0xff] %vm3145_vm9, %v3117_v29  ;;  %v2809_v54 = vadd.f32 %v2808_v45, %v9072_v55  ;;  %v3242_v4 = vmax.f32 %v3180_v42, %v3212_v32  ;;  %v9804_v45 = vpack.c.bf16 %v9054_v60, %v9041_v51 }
 0x387   : > { %v3050_v9 = vadd.f32 %v9224_v0, %v2809_v54  ;;  %3261 = vst.msk [vmem:[#allocation6 + $0x10] sm:$0xff] %vm3145_vm9, %v3242_v4  ;;  %v3342_v37 = vpack.c.bf16 %v3242_v4, %v3241_v49  ;;  %v2992_v0 = vpop.f32.mrf.mxu0  ;;  %v3308_v49 = vsel %vm903_vm3, 0.0, %v3276_v6 }
 0x389   : > { %v3086_v1 = vadd.f32 %v9285_v61, %v3050_v9  ;;  %6354 = vmatmul.msk.bf16.gmra.mxu3 %vm2147_vm6, %v9803_v26  ;;  %6423 = vmatmul.msk.bf16.vlgmr.msrb.gmra.mxu2 %vm3145_vm9, %v3342_v37 }
 0x38b   : > { %v3118_v16 = vmax.f32 %v3086_v1, 0.0 }
 0x38c   : > { %v2811_v40 = vpop.f32.mrf.mxu3 }
 0x38d   : > { %3151 = vst.msk [vmem:[#allocation5 + $0x28] sm:$0xff] %vm3145_vm9, %v3118_v16  ;;  %v2812_v55 = vadd.f32 %v2811_v40, %v9081_v12 }
 0x38e   : > { %v3277_v23 = vld [vmem:[#allocation6 + $0xf] sm:$0xff] }
 0x38f   : > { %v3051_v25 = vadd.f32 %v9229_v10, %v2812_v55  ;;  %v3358_v39 = vpack.c.bf16 %v3277_v23, %v3308_v49  ;;  %v2995_v29 = vpop.f32.mrf.mxu0 }
 0x391   : > { %v3087_v43 = vadd.f32 %v9285_v61, %v3051_v25  ;;  %6399 = vmatmul.msk.bf16.vlgmr.msrb.gmra.mxu1 %vm3145_vm9, %v3358_v39 }
 0x393   : > { %v3119_v2 = vmax.f32 %v3087_v43, 0.0 }
 0x394   : > { %v2813_v62 = vpop.f32.mrf.mxu3  ;;  %v3182_v50 = vld [vmem:[#allocation5 + $0x20] ss:$2 sm:$0xff]  ;;  %v3214_v30 = vld [vmem:[#allocation5 + $0x21] ss:$2 sm:$0xff] }
 0x395   : > { %3152 = vst.msk [vmem:[#allocation5 + $0x30] sm:$0xff] %vm3145_vm9, %v3119_v2  ;;  %v2814_v12 = vadd.f32 %v2813_v62, %v9090_v27  ;;  %v3243_v47 = vmax.f32 %v3182_v50, %v3214_v30 }
 0x397   : > { %v3052_v44 = vadd.f32 %v9239_v59, %v2814_v12  ;;  %3262 = vst.msk [vmem:[#allocation6 + $0x18] sm:$0xff] %vm3145_vm9, %v3243_v47  ;;  %v2997_v4 = vpop.f32.mrf.mxu0 }
 0x399   : > { %v3088_v10 = vadd.f32 %v9285_v61, %v3052_v44  ;;  %6355 = vmatmul.msk.bf16.gmra.mxu3 %vm2147_vm6, %v9804_v45  ;;  %v9806_v45 = vpack.c.bf16 %v9124_v48, %v9108_v19 }
 0x39b   : > { %v3120_v42 = vmax.f32 %v3088_v10, 0.0 }
 0x39c   : > { %v2816_v32 = vpop.f32.mrf.mxu3 }
 0x39d   : > { %3153 = vst.msk [vmem:[#allocation5 + $0x38] sm:$0xff] %vm3145_vm9, %v3120_v42  ;;  %v2817_v54 = vadd.f32 %v2816_v32, %v9099_v15 }
 0x39e   : > { %v3278_v55 = vld [vmem:[#allocation6 + $0x17] sm:$0xff] }
 0x39f   : > { %v3053_v27 = vadd.f32 %v9306_v52, %v2817_v54  ;;  %v9805_v52 = vpack.c.bf16 %v9085_v18, %v9074_v21  ;;  %v3000_v23 = vpop.f32.mrf.mxu0  ;;  %v3310_v25 = vsel %vm903_vm3, 0.0, %v3278_v55  ;;  %v7627_v18 = vld [vmem:[%s9765_s11 + $0x8] sm:$0xff] }
 0x3a0   : > { %3638 = vmatpush.bf16.msra.mxu3 %v7627_v18  ;;  %v3292_v18 = vld [vmem:[#allocation6 + $0x9] sm:$0xff] }
 0x3a1   : > { %v3089_v59 = vadd.f32 %v9285_v61, %v3053_v27 }
 0x3a3   : > { %v3121_v9 = vmax.f32 %v3089_v59, 0.0 }
 0x3a4   : > { %v2818_v37 = vpop.f32.mrf.mxu3  ;;  %v3184_v1 = vld [vmem:[#allocation5 + $0x30] ss:$2 sm:$0xff]  ;;  %v3216_v26 = vld [vmem:[#allocation5 + $0x31] ss:$2 sm:$0xff] }
 0x3a5   : > { %3154 = vst.msk [vmem:[#allocation5 + $0x40] sm:$0xff] %vm3145_vm9, %v3121_v9  ;;  %v2819_v51 = vadd.f32 %v2818_v37, %v9116_v31  ;;  %v3244_v60 = vmax.f32 %v3184_v1, %v3216_v26 }
 0x3a7   : > { %v3054_v16 = vadd.f32 %v2987_v41, %v2819_v51  ;;  %3263 = vst.msk [vmem:[#allocation6 + $0x20] sm:$0xff] %vm3145_vm9, %v3244_v60  ;;  %v3343_v6 = vpack.c.bf16 %v3244_v60, %v3243_v47  ;;  %v3002_v47 = vpop.f32.mrf.mxu0 }
 0x3a9   : > { %v3090_v15 = vadd.f32 %v9285_v61, %v3054_v16  ;;  %6356 = vmatmul.msk.bf16.gmra.mxu3 %vm2147_vm6, %v9805_v52  ;;  %6424 = vmatmul.msk.bf16.gmra.mxu2 %vm3145_vm9, %v3343_v6 }
 0x3ab   : > { %v3122_v40 = vmax.f32 %v3090_v15, 0.0 }
 0x3ac   : > { %v2821_v49 = vpop.f32.mrf.mxu3 }
 0x3ad   : > { %3155 = vst.msk [vmem:[#allocation5 + $0x48] sm:$0xff] %vm3145_vm9, %v3122_v40  ;;  %v2822_v31 = vadd.f32 %v2821_v49, %v9121_v33  ;;  %v3293_v49 = vld [vmem:[#allocation6 + $0x11] sm:$0xff] }
 0x3ae   : > { %v3279_v41 = vld [vmem:[#allocation6 + $0x1f] sm:$0xff] }
 0x3af   : > { %v3055_v39 = vadd.f32 %v9325_v7, %v2822_v31  ;;  %v3359_v43 = vpack.c.bf16 %v3279_v41, %v3310_v25  ;;  %v7626_v7 = vld [vmem:[%s9765_s11] sm:$0xff]  ;;  %v3005_v27 = vpop.f32.mrf.mxu0 }
 0x3b0   : > { %3639 = vmatpush.bf16.msra.mxu3 %v7626_v7 }
 0x3b1   : > { %v3091_v21 = vadd.f32 %v9285_v61, %v3055_v39  ;;  %6400 = vmatmul.msk.bf16.gmra.mxu1 %vm3145_vm9, %v3359_v43 }
 0x3b3   : > { %v3123_v2 = vmax.f32 %v3091_v21, 0.0 }
 0x3b4   : > { %v2823_v62 = vpop.f32.mrf.mxu3  ;;  %v3186_v50 = vld [vmem:[#allocation5 + $0x40] ss:$2 sm:$0xff]  ;;  %v3218_v33 = vld [vmem:[#allocation5 + $0x41] ss:$2 sm:$0xff] }
 0x3b5   : > { %3156 = vst.msk [vmem:[#allocation5 + $0x50] sm:$0xff] %vm3145_vm9, %v3123_v2  ;;  %v2824_v30 = vadd.f32 %v2823_v62, %v9134_v53  ;;  %v3245_v12 = vmax.f32 %v3186_v50, %v3218_v33 }
 0x3b7   : > { %v3056_v44 = vadd.f32 %v2992_v0, %v2824_v30  ;;  %3264 = vst.msk [vmem:[#allocation6 + $0x28] sm:$0xff] %vm3145_vm9, %v3245_v12 }
 0x3b9   : > { %v3092_v10 = vadd.f32 %v9285_v61, %v3056_v44  ;;  %6357 = vmatmul.msk.bf16.gmra.mxu3 %vm2147_vm6, %v9806_v45 }
 0x3bb   : > { %v3124_v42 = vmax.f32 %v3092_v10, 0.0 }
 0x3bc   : > { %v2826_v32 = vpop.f32.mrf.mxu3 }
 0x3bd   : > { %3157 = vst.msk [vmem:[#allocation5 + $0x58] sm:$0xff] %vm3145_vm9, %v3124_v42  ;;  %v2827_v53 = vadd.f32 %v2826_v32, %v9142_v36  ;;  %v9807_v36 = vpack.c.bf16 %v9162_v56, %v9147_v20 }
 0x3be   : > { %v3280_v6 = vld [vmem:[#allocation6 + $0x27] sm:$0xff] }
 0x3bf   : > { %v3057_v54 = vadd.f32 %v2995_v29, %v2827_v53  ;;  %v3007_v29 = vpop.f32.mrf.mxu0  ;;  %v3312_v40 = vsel %vm903_vm3, 0.0, %v3280_v6  ;;  %v3295_v10 = vld [vmem:[#allocation6 + $0x21] sm:$0xff] }
 0x3c1   : > { %v3093_v0 = vadd.f32 %v9285_v61, %v3057_v54 }
 0x3c3   : > { %v3125_v59 = vmax.f32 %v3093_v0, 0.0 }
 0x3c4   : > { %v2828_v9 = vpop.f32.mrf.mxu3  ;;  %v3188_v37 = vld [vmem:[#allocation5 + $0x50] ss:$2 sm:$0xff]  ;;  %v3220_v1 = vld [vmem:[#allocation5 + $0x51] ss:$2 sm:$0xff] }
 0x3c5   : > { %3158 = vst.msk [vmem:[#allocation5 + $0x60] sm:$0xff] %vm3145_vm9, %v3125_v59  ;;  %v2829_v19 = vadd.f32 %v2828_v9, %v9157_v24  ;;  %v3246_v48 = vmax.f32 %v3188_v37, %v3220_v1  ;;  %v3294_v59 = vld [vmem:[#allocation6 + $0x19] sm:$0xff] }
 0x3c7   : > { %v3058_v26 = vadd.f32 %v2997_v4, %v2829_v19  ;;  %3265 = vst.msk [vmem:[#allocation6 + $0x30] sm:$0xff] %vm3145_vm9, %v3246_v48  ;;  %v3344_v51 = vpack.c.bf16 %v3246_v48, %v3245_v12  ;;  %v9402_v4 = vadd.s32 8, %v8416_v17  ;;  %v3010_v41 = vpop.f32.mrf.mxu0 }
 0x3c9   : > { %v3094_v60 = vadd.f32 %v9285_v61, %v3058_v26  ;;  %6358 = vmatmul.msk.bf16.gmra.mxu3 %vm2147_vm6, %v9807_v36  ;;  %6425 = vmatmul.msk.bf16.gmra.mxu2 %vm3145_vm9, %v3344_v51  ;;  %vm3325_vm10 = vcmp.eq.s32.totalorder %v9402_v4, 15 }
 0x3ca   : > { %v3329_v53 = vsel %vm3325_vm10, 0.0, %v3295_v10 }
 0x3cb   : > { %v3126_v16 = vmax.f32 %v3094_v60, 0.0 }
 0x3cc   : > { %v2831_v15 = vpop.f32.mrf.mxu3 }
 0x3cd   : > { %3159 = vst.msk [vmem:[#allocation5 + $0x68] sm:$0xff] %vm3145_vm9, %v3126_v16  ;;  %v2832_v24 = vadd.f32 %v2831_v15, %v9160_v13  ;;  %v3327_v13 = vsel %vm3325_vm10, 0.0, %v3293_v49 }
 0x3ce   : > { %v3281_v52 = vld [vmem:[#allocation6 + $0x2f] sm:$0xff]  ;;  %v3568_v62 = vpack.c.bf16 %v3327_v13, %v3292_v18 }
 0x3cf   : > { %v3059_v20 = vadd.f32 %v3000_v23, %v2832_v24  ;;  %v3360_v56 = vpack.c.bf16 %v3281_v52, %v3312_v40  ;;  %v3012_v7 = vpop.f32.mrf.mxu0  ;;  %v3296_v49 = vld [vmem:[#allocation6 + $0x29] sm:$0xff] }
 0x3d1   : > { %v3095_v55 = vadd.f32 %v9285_v61, %v3059_v20  ;;  %6401 = vmatmul.msk.bf16.gmra.mxu1 %vm3145_vm9, %v3360_v56 }
 0x3d3   : > { %v3127_v31 = vmax.f32 %v3095_v55, 0.0 }
 0x3d4   : > { %v2833_v25 = vpop.f32.mrf.mxu3  ;;  %v3190_v39 = vld [vmem:[#allocation5 + $0x60] ss:$2 sm:$0xff]  ;;  %v3222_v43 = vld [vmem:[#allocation5 + $0x61] ss:$2 sm:$0xff] }
 0x3d5   : > { %3160 = vst.msk [vmem:[#allocation5 + $0x70] sm:$0xff] %vm3145_vm9, %v3127_v31  ;;  %v2834_v23 = vadd.f32 %v2833_v25, %v9171_v14  ;;  %v3247_v21 = vmax.f32 %v3190_v39, %v3222_v43 }
 0x3d7   : > { %v3060_v2 = vadd.f32 %v3002_v47, %v2834_v23  ;;  %3266 = vst.msk [vmem:[#allocation6 + $0x38] sm:$0xff] %vm3145_vm9, %v3247_v21  ;;  %v3015_v37 = vpop.f32.mrf.mxu0 }
 0x3d9   : > { %v3096_v50 = vadd.f32 %v9285_v61, %v3060_v2  ;;  %6447 = vmatmul.msk.bf16.vlgmr.msra.gmra.mxu3 %vm3145_vm9, %v3568_v62 }
 0x3db   : > { %v3128_v33 = vmax.f32 %v3096_v50, 0.0 }
 0x3dc   : > { %v2836_v30 = vpop.f32.mrf.mxu3 }
 0x3dd   : > { %3161 = vst.msk [vmem:[#allocation5 + $0x78] sm:$0xff] %vm3145_vm9, %v3128_v33  ;;  %v2837_v12 = vadd.f32 %v2836_v30, %v9174_v34 }
 0x3de   : > { %v3282_v48 = vld [vmem:[#allocation6 + $0x37] sm:$0xff] }
 0x3df   : > { %v3061_v44 = vadd.f32 %v3005_v27, %v2837_v12  ;;  %v3569_v27 = vpack.c.bf16 %v3329_v53, %v3294_v59  ;;  %v3314_v60 = vsel %vm903_vm3, 0.0, %v3282_v48  ;;  %v3297_v6 = vld [vmem:[#allocation6 + $0x31] sm:$0xff]  ;;  %v3017_v15 = vpop.f32.mrf.mxu0  ;;  %v9808_v12 = vld [vmem:[#allocation18_spill] sm:$0xff] }
 0x3e0   : > { %v3331_v40 = vsel %vm3325_vm10, 0.0, %v3297_v6 }
 0x3e1   : > { %v3097_v14 = vadd.f32 %v9285_v61, %v3061_v44 }
 0x3e3   : > { %v3129_v45 = vmax.f32 %v3097_v14, 0.0 }
 0x3e4   : > { %v2838_v47 = vpop.f32.mrf.mxu3  ;;  %v3192_v42 = vld [vmem:[#allocation5 + $0x70] ss:$2 sm:$0xff]  ;;  %v3224_v32 = vld [vmem:[#allocation5 + $0x71] ss:$2 sm:$0xff] }
 0x3e5   : > { %3162 = vst.msk [vmem:[#allocation5 + $0x80] sm:$0xff] %vm3145_vm9, %v3129_v45  ;;  %v2839_v54 = vadd.f32 %v2838_v47, %v9177_v8  ;;  %v3248_v0 = vmax.f32 %v3192_v42, %v3224_v32 }
 0x3e7   : > { %v3062_v9 = vadd.f32 %v3007_v29, %v2839_v54  ;;  %3267 = vst.msk [vmem:[#allocation6 + $0x40] sm:$0xff] %vm3145_vm9, %v3248_v0  ;;  %v3345_v34 = vpack.c.bf16 %v3248_v0, %v3247_v21  ;;  %v3020_v39 = vpop.f32.mrf.mxu0  ;;  %v9809_v0 = vld [vmem:[#allocation19_spill] sm:$0xff] }
 0x3e9   : > { %v3098_v1 = vadd.f32 %v9285_v61, %v3062_v9  ;;  %6426 = vmatmul.msk.bf16.gmra.mxu2 %vm3145_vm9, %v3345_v34  ;;  %6448 = vmatmul.msk.bf16.gmra.mxu3 %vm3145_vm9, %v3569_v27 }
 0x3eb   : > { %v3130_v19 = vmax.f32 %v3098_v1, 0.0 }
 0x3ec   : > { %v2841_v26 = vpop.f32.mrf.mxu3 }
 0x3ed   : > { %3163 = vst.msk [vmem:[#allocation5 + $0x88] sm:$0xff] %vm3145_vm9, %v3130_v19  ;;  %v2842_v8 = vadd.f32 %v2841_v26, %v9187_v38 }
 0x3ee   : > { %v3283_v51 = vld [vmem:[#allocation6 + $0x3f] sm:$0xff] }
 0x3ef   : > { %v3063_v36 = vadd.f32 %v3010_v41, %v2842_v8  ;;  %v3361_v29 = vpack.c.bf16 %v3283_v51, %v3314_v60  ;;  %v3570_v41 = vpack.c.bf16 %v3331_v40, %v3296_v49  ;;  %v3022_v14 = vpop.f32.mrf.mxu0  ;;  %v3298_v10 = vld [vmem:[#allocation6 + $0x39] sm:$0xff] }
 0x3f1   : > { %v3099_v16 = vadd.f32 %v9285_v61, %v3063_v36  ;;  %6402 = vmatmul.msk.bf16.gmra.mxu1 %vm3145_vm9, %v3361_v29  ;;  %v9810_v36 = vld [vmem:[#allocation20_spill] sm:$0xff] }
 0x3f3   : > { %v3131_v24 = vmax.f32 %v3099_v16, 0.0 }
 0x3f4   : > { %v2843_v52 = vpop.f32.mrf.mxu3  ;;  %v3194_v20 = vld [vmem:[#allocation5 + $0x80] ss:$2 sm:$0xff]  ;;  %v3226_v56 = vld [vmem:[#allocation5 + $0x81] ss:$2 sm:$0xff] }
 0x3f5   : > { %3164 = vst.msk [vmem:[#allocation5 + $0x90] sm:$0xff] %vm3145_vm9, %v3131_v24  ;;  %v2844_v38 = vadd.f32 %v2843_v52, %v9196_v28  ;;  %v3249_v55 = vmax.f32 %v3194_v20, %v3226_v56 }
 0x3f7   : > { %v3064_v31 = vadd.f32 %v3012_v7, %v2844_v38  ;;  %3268 = vst.msk [vmem:[#allocation6 + $0x48] sm:$0xff] %vm3145_vm9, %v3249_v55  ;;  %v3025_v1 = vpop.f32.mrf.mxu0 }
 0x3f9   : > { %v3100_v25 = vadd.f32 %v9285_v61, %v3064_v31  ;;  %6449 = vmatmul.msk.bf16.gmra.mxu3 %vm3145_vm9, %v3570_v41 }
 0x3fb   : > { %v3132_v13 = vmax.f32 %v3100_v25, 0.0 }
 0x3fc   : > { %v2846_v43 = vpop.f32.mrf.mxu3 }
 0x3fd   : > { %3165 = vst.msk [vmem:[#allocation5 + $0x98] sm:$0xff] %vm3145_vm9, %v3132_v13  ;;  %v2847_v23 = vadd.f32 %v2846_v43, %v9200_v35 }
 0x3fe   : > { %v3299_v18 = vld [vmem:[#allocation6 + $0x41] sm:$0xff] }
 0x3ff   : > { %v3065_v21 = vadd.f32 %v3015_v37, %v2847_v23  ;;  %v3333_v30 = vsel %vm3325_vm10, 0.0, %v3299_v18  ;;  %v3284_v53 = vld [vmem:[#allocation6 + $0x47] sm:$0xff] }
 0x400   : > { %v3571_v47 = vpack.c.bf16 %v3333_v30, %v3298_v10  ;;  %v3316_v34 = vsel %vm903_vm3, 0.0, %v3284_v53 }
 0x401   : > { %v3101_v28 = vadd.f32 %v9285_v61, %v3065_v21 }
 0x403   : > { %v3133_v2 = vmax.f32 %v3101_v28, 0.0 }
 0x404   : > { %v2848_v62 = vpop.f32.mrf.mxu3  ;;  %v3196_v50 = vld [vmem:[#allocation5 + $0x90] ss:$2 sm:$0xff]  ;;  %v3228_v33 = vld [vmem:[#allocation5 + $0x91] ss:$2 sm:$0xff] }
 0x405   : > { %3166 = vst.msk [vmem:[#allocation5 + $0xa0] sm:$0xff] %vm3145_vm9, %v3133_v2  ;;  %v2849_v7 = vadd.f32 %v2848_v62, %v9808_v12  ;;  %v3250_v44 = vmax.f32 %v3196_v50, %v3228_v33 }
 0x407   : > { %v3066_v45 = vadd.f32 %v3017_v15, %v2849_v7  ;;  %3269 = vst.msk [vmem:[#allocation6 + $0x50] sm:$0xff] %vm3145_vm9, %v3250_v44  ;;  %v3346_v35 = vpack.c.bf16 %v3250_v44, %v3249_v55  ;;  %v3027_v15 = vpop.f32.mrf.mxu0 }
 0x409   : > { %v3102_v42 = vadd.f32 %v9285_v61, %v3066_v45  ;;  %6427 = vmatmul.msk.bf16.gmra.mxu2 %vm3145_vm9, %v3346_v35  ;;  %6450 = vmatmul.msk.bf16.gmra.mxu3 %vm3145_vm9, %v3571_v47 }
 0x40b   : > { %v3134_v32 = vmax.f32 %v3102_v42, 0.0 }
 0x40c   : > { %v2851_v54 = vpop.f32.mrf.mxu3 }
 0x40d   : > { %3167 = vst.msk [vmem:[#allocation5 + $0xa8] sm:$0xff] %vm3145_vm9, %v3134_v32  ;;  %v2852_v59 = vadd.f32 %v2851_v54, %v9809_v0 }
 0x40e   : > { %v3285_v9 = vld [vmem:[#allocation6 + $0x4f] sm:$0xff] }
 0x40f   : > { %v3067_v27 = vadd.f32 %v3020_v39, %v2852_v59  ;;  %v3362_v37 = vpack.c.bf16 %v3285_v9, %v3316_v34  ;;  %v3300_v38 = vld [vmem:[#allocation6 + $0x49] sm:$0xff]  ;;  %v3030_v25 = vpop.f32.mrf.mxu0 }
 0x411   : > { %v3103_v19 = vadd.f32 %v9285_v61, %v3067_v27  ;;  %6403 = vmatmul.msk.bf16.gmra.mxu1 %vm3145_vm9, %v3362_v37 }
 0x413   : > { %v3135_v48 = vmax.f32 %v3103_v19, 0.0 }
 0x414   : > { %v3198_v26 = vld [vmem:[#allocation5 + $0xa0] ss:$2 sm:$0xff]  ;;  %v3230_v8 = vld [vmem:[#allocation5 + $0xa1] ss:$2 sm:$0xff]  ;;  %v2853_v51 = vpop.f32.mrf.mxu3 }
 0x415   : > { %v3251_v60 = vmax.f32 %v3198_v26, %v3230_v8  ;;  %3168 = vst.msk [vmem:[#allocation5 + $0xb0] sm:$0xff] %vm3145_vm9, %v3135_v48  ;;  %v2854_v29 = vadd.f32 %v2853_v51, %v9810_v36 }
 0x417   : > { %3270 = vst.msk [vmem:[#allocation6 + $0x58] sm:$0xff] %vm3145_vm9, %v3251_v60  ;;  %v3068_v16 = vadd.f32 %v3022_v14, %v2854_v29  ;;  %v3032_v30 = vpop.f32.mrf.mxu0 }
 0x419   : > { %v3104_v6 = vadd.f32 %v9285_v61, %v3068_v16 }
 0x41b   : > { %v3136_v24 = vmax.f32 %v3104_v6, 0.0 }
 0x41c   : > { %v2856_v52 = vpop.f32.mrf.mxu3 }
 0x41d   : > { %3169 = vst.msk [vmem:[#allocation5 + $0xb8] sm:$0xff] %vm3145_vm9, %v3136_v24  ;;  %v2857_v40 = vadd.f32 %v2856_v52, %v9227_v3 }
 0x41e   : > { %v3301_v20 = vld [vmem:[#allocation6 + $0x51] sm:$0xff] }
 0x41f   : > { %v3069_v56 = vadd.f32 %v3025_v1, %v2857_v40  ;;  %v3335_v55 = vsel %vm3325_vm10, 0.0, %v3301_v20  ;;  %v3286_v62 = vld [vmem:[#allocation6 + $0x57] sm:$0xff]  ;;  %v3035_v53 = vpop.f32.mrf.mxu0 }
 0x420   : > { %v3572_v49 = vpack.c.bf16 %v3335_v55, %v3300_v38 }
 0x421   : > { %v3105_v31 = vadd.f32 %v9285_v61, %v3069_v56 }
 0x422   : > { %6451 = vmatmul.msk.bf16.gmra.mxu3 %vm3145_vm9, %v3572_v49  ;;  %v3431_v49 = vpop.f32.mrf.mxu1 }
 0x423   : > { %v3137_v41 = vmax.f32 %v3105_v31, 0.0 }
 0x424   : > { %v2858_v13 = vpop.f32.mrf.mxu3  ;;  %v3200_v39 = vld [vmem:[#allocation5 + $0xb0] ss:$2 sm:$0xff]  ;;  %v3232_v43 = vld [vmem:[#allocation5 + $0xb1] ss:$2 sm:$0xff] }
 0x425   : > { %3170 = vst.msk [vmem:[#allocation5 + $0xc0] sm:$0xff] %vm3145_vm9, %v3137_v41  ;;  %v2859_v3 = vadd.f32 %v2858_v13, %v9237_v57  ;;  %v3252_v23 = vmax.f32 %v3200_v39, %v3232_v43  ;;  %v3318_v57 = vsel %vm903_vm3, 0.0, %v3286_v62  ;;  %v3528_v41 = vpop.f32.mrf.mxu2 }
 0x427   : > { %v3070_v21 = vadd.f32 %v3027_v15, %v2859_v3  ;;  %3271 = vst.msk [vmem:[#allocation6 + $0x60] sm:$0xff] %vm3145_vm9, %v3252_v23  ;;  %v3347_v28 = vpack.c.bf16 %v3252_v23, %v3251_v60  ;;  %v3037_v48 = vpop.f32.mrf.mxu0 }
 0x429   : > { %v3106_v18 = vadd.f32 %v9285_v61, %v3070_v21  ;;  %6428 = vmatmul.msk.bf16.gmra.mxu2 %vm3145_vm9, %v3347_v28 }
 0x42b   : > { %v3138_v2 = vmax.f32 %v3106_v18, 0.0  ;;  %v3433_v18 = vpop.f32.mrf.mxu1 }
 0x42c   : > { %v2861_v50 = vpop.f32.mrf.mxu3 }
 0x42d   : > { %3171 = vst.msk [vmem:[#allocation5 + $0xc8] sm:$0xff] %vm3145_vm9, %v3138_v2  ;;  %v2862_v33 = vadd.f32 %v2861_v50, %v9242_v63  ;;  %v3529_v2 = vadd.f32 %v3528_v41, %v3431_v49  ;;  %v9506_v50 = vld [vmem:[%s9766_s12] ss:$0 sm:$0xff] }
 0x42e   : > { %v3287_v12 = vld [vmem:[#allocation6 + $0x5f] sm:$0xff] }
 0x42f   : > { %v3071_v7 = vadd.f32 %v3030_v25, %v2862_v33  ;;  %v3363_v44 = vpack.c.bf16 %v3287_v12, %v3318_v57  ;;  %v3302_v37 = vld [vmem:[#allocation6 + $0x59] sm:$0xff]  ;;  %v3040_v52 = vpop.f32.mrf.mxu0  ;;  %v3530_v33 = vpop.f32.mrf.mxu2 }
 0x431   : > { %v3107_v14 = vadd.f32 %v9285_v61, %v3071_v7  ;;  %6404 = vmatmul.msk.bf16.gmra.mxu1 %vm3145_vm9, %v3363_v44 }
 0x433   : > { %v3139_v10 = vmax.f32 %v3107_v14, 0.0 }
 0x434   : > { %v3202_v45 = vld [vmem:[#allocation5 + $0xc0] ss:$2 sm:$0xff]  ;;  %v3234_v35 = vld [vmem:[#allocation5 + $0xc1] ss:$2 sm:$0xff]  ;;  %v2863_v47 = vpop.f32.mrf.mxu3 }
 0x435   : > { %v3253_v42 = vmax.f32 %v3202_v45, %v3234_v35  ;;  %3172 = vst.msk [vmem:[#allocation5 + $0xd0] sm:$0xff] %vm3145_vm9, %v3139_v10  ;;  %v2864_v63 = vadd.f32 %v2863_v47, %v9257_v58  ;;  %v3436_v10 = vpop.f32.mrf.mxu1  ;;  %v3531_v45 = vadd.f32 %v3530_v33, %v3433_v18 }
 0x437   : > { %3272 = vst.msk [vmem:[#allocation6 + $0x68] sm:$0xff] %vm3145_vm9, %v3253_v42  ;;  %v3072_v32 = vadd.f32 %v3032_v30, %v2864_v63  ;;  %v3042_v23 = vpop.f32.mrf.mxu0  ;;  %v3533_v35 = vpop.f32.mrf.mxu2 }
 0x439   : > { %v3108_v54 = vadd.f32 %v9285_v61, %v3072_v32 }
 0x43b   : > { %v3140_v0 = vmax.f32 %v3108_v54, 0.0 }
 0x43c   : > { %v2866_v59 = vpop.f32.mrf.mxu3 }
 0x43d   : > { %3173 = vst.msk [vmem:[#allocation5 + $0xd8] sm:$0xff] %vm3145_vm9, %v3140_v0  ;;  %v2867_v9 = vadd.f32 %v2866_v59, %v9263_v46 }
 0x43e   : > { %v3303_v34 = vld [vmem:[#allocation6 + $0x61] sm:$0xff] }
 0x43f   : > { %v3073_v27 = vadd.f32 %v3035_v53, %v2867_v9  ;;  %v3337_v1 = vsel %vm3325_vm10, 0.0, %v3303_v34  ;;  %v3288_v24 = vld [vmem:[#allocation6 + $0x67] sm:$0xff]  ;;  %v3534_v9 = vadd.f32 %v3533_v35, %v3436_v10 }
 0x440   : > { %v3573_v19 = vpack.c.bf16 %v3337_v1, %v3302_v37 }
 0x441   : > { %v3109_v58 = vadd.f32 %v9285_v61, %v3073_v27  ;;  %v3438_v27 = vpop.f32.mrf.mxu1 }
 0x442   : > { %6452 = vmatmul.msk.bf16.gmra.mxu3 %vm3145_vm9, %v3573_v19  ;;  %v3535_v19 = vpop.f32.mrf.mxu2 }
 0x443   : > { %v3141_v26 = vmax.f32 %v3109_v58, 0.0 }
 0x444   : > { %v2868_v8 = vpop.f32.mrf.mxu3  ;;  %v3204_v51 = vld [vmem:[#allocation5 + $0xd0] ss:$2 sm:$0xff]  ;;  %v3236_v60 = vld [vmem:[#allocation5 + $0xd1] ss:$2 sm:$0xff] }
 0x445   : > { %3174 = vst.msk [vmem:[#allocation5 + $0xe0] sm:$0xff] %vm3145_vm9, %v3141_v26  ;;  %v2869_v46 = vadd.f32 %v2868_v8, %v9265_v5  ;;  %v3254_v36 = vmax.f32 %v3204_v51, %v3236_v60  ;;  %v3320_v5 = vsel %vm903_vm3, 0.0, %v3288_v24 }
 0x447   : > { %v3074_v29 = vadd.f32 %v3037_v48, %v2869_v46  ;;  %3273 = vst.msk [vmem:[#allocation6 + $0x70] sm:$0xff] %vm3145_vm9, %v3254_v36  ;;  %v3348_v16 = vpack.c.bf16 %v3254_v36, %v3253_v42 }
 0x449   : > { %v3110_v6 = vadd.f32 %v9285_v61, %v3074_v29  ;;  %6429 = vmatmul.msk.bf16.gmra.mxu2 %vm3145_vm9, %v3348_v16 }
 0x44b   : > { %v3142_v15 = vmax.f32 %v3110_v6, 0.0 }
 0x44c   : > { %v2871_v40 = vpop.f32.mrf.mxu3 }
 0x44d   : > { %3175 = vst.msk [vmem:[#allocation5 + $0xe8] sm:$0xff] %vm3145_vm9, %v3142_v15  ;;  %v2872_v20 = vadd.f32 %v2871_v40, %v9271_v11  ;;  %v3536_v15 = vadd.f32 %v3535_v19, %v3438_v27 }
 0x44e   : > { %v3289_v56 = vld [vmem:[#allocation6 + $0x6f] sm:$0xff]  ;;  %v3441_v17 = vpop.f32.mrf.mxu1 }
 0x44f   : > { %v3075_v38 = vadd.f32 %v3040_v52, %v2872_v20  ;;  %v3364_v55 = vpack.c.bf16 %v3289_v56, %v3320_v5  ;;  %v3304_v7 = vld [vmem:[#allocation6 + $0x69] sm:$0xff]  ;;  %v3538_v20 = vpop.f32.mrf.mxu2 }
 0x450   : > { %v3539_v5 = vadd.f32 %v3538_v20, %v3441_v17 }
 0x451   : > { %v3111_v31 = vadd.f32 %v9285_v61, %v3075_v38  ;;  %6405 = vmatmul.msk.bf16.gmra.mxu1 %vm3145_vm9, %v3364_v55 }
 0x453   : > { %v3143_v25 = vmax.f32 %v3111_v31, 0.0 }
 0x454   : > { %v3206_v13 = vld [vmem:[#allocation5 + $0xe0] ss:$2 sm:$0xff]  ;;  %v3238_v39 = vld [vmem:[#allocation5 + $0xe1] ss:$2 sm:$0xff]  ;;  %v2873_v43 = vpop.f32.mrf.mxu3 }
 0x455   : > { %v3255_v3 = vmax.f32 %v3206_v13, %v3238_v39  ;;  %3176 = vst.msk [vmem:[#allocation5 + $0xf0] sm:$0xff] %vm3145_vm9, %v3143_v25  ;;  %v2874_v11 = vadd.f32 %v2873_v43, %v9273_v22 }
 0x456   : > { %v3443_v49 = vpop.f32.mrf.mxu1 }
 0x457   : > { %3274 = vst.msk [vmem:[#allocation6 + $0x78] sm:$0xff] %vm3145_vm9, %v3255_v3  ;;  %v3076_v21 = vadd.f32 %v3042_v23, %v2874_v11  ;;  %v3540_v41 = vpop.f32.mrf.mxu2 }
 0x458   : > { %v3541_v43 = vadd.f32 %v3540_v41, %v3443_v49  ;;  %v7724_v49 = vld [vmem:[#allocation9 + $0x2ec] sm:$0xf0] }
 0x459   : > { %v3112_v28 = vadd.f32 %v9285_v61, %v3076_v21  ;;  %v7656_v41 = vld [vmem:[#allocation9 + $0xcc] sm:$0xf0] }
 0x45b   : > { %v3144_v62 = vmax.f32 %v3112_v28, 0.0 }
 0x45c   : > { %v3641_v30 = vpop.f32.mrf.mxu3 }
 0x45d   : > { %3177 = vst.msk [vmem:[#allocation5 + $0xf8] sm:$0xff] %vm3145_vm9, %v3144_v62  ;;  %v3681_v12 = vadd.f32 %v3641_v30, %v3529_v2  ;;  %v7786_v30 = vld [vmem:[#allocation9 + $0x4e4] sm:$0xf] }
 0x45e   : > { %v3305_v22 = vld [vmem:[#allocation6 + $0x71] sm:$0xff] }
 0x45f   : > { %v3701_v57 = vadd.f32 %v9506_v50, %v3681_v12  ;;  %v3339_v61 = vsel %vm3325_vm10, 0.0, %v3305_v22  ;;  %v3290_v34 = vld [vmem:[#allocation6 + $0x77] sm:$0xff]  ;;  %v7083_v12 = vld [vmem:[#allocation9 + $0x4f0] sm:$0xf0] }
 0x460   : > { %v3574_v44 = vpack.c.bf16 %v3339_v61, %v3304_v7  ;;  %v3322_v48 = vsel %vm903_vm3, 0.0, %v3290_v34 }
 0x461   : > { %v3717_v14 = vmax.f32 %v3701_v57, 0.0  ;;  %v7086_v57 = vor.u32 %v7786_v30, %v7083_v12  ;;  %v7652_v30 = vld [vmem:[#allocation9 + $0xac] sm:$0xf0]  ;;  %v6665_v12 = vld [vmem:[#allocation9 + $0x1a0] sm:$0xf] }
 0x462   : > { %6453 = vmatmul.msk.bf16.gmra.mxu3 %vm3145_vm9, %v3574_v44 }
 0x463   : > { %3733 = vst [vmem:[#allocation7] sm:$0xff] %v3717_v14  ;;  %5537 = vmatpush.bf16.msra.mxu0 %v7086_v57  ;;  %v7684_v57 = vld [vmem:[#allocation9 + $0x1ac] sm:$0xf0] }
 0x464   : > { %v3643_v47 = vpop.f32.mrf.mxu3  ;;  %v3208_v42 = vld [vmem:[#allocation5 + $0xf0] ss:$2 sm:$0xff]  ;;  %v3240_v63 = vld [vmem:[#allocation5 + $0xf1] ss:$2 sm:$0xff] }
 0x465   : > { %v3682_v32 = vadd.f32 %v3643_v47, %v3531_v45  ;;  %v3256_v53 = vmax.f32 %v3208_v42, %v3240_v63 }
 0x467   : > { %v3702_v54 = vadd.f32 %v9506_v50, %v3682_v32  ;;  %3275 = vst.msk [vmem:[#allocation6 + $0x80] sm:$0xff] %vm3145_vm9, %v3256_v53  ;;  %v3349_v0 = vpack.c.bf16 %v3256_v53, %v3255_v3 }
 0x469   : > { %v3718_v59 = vmax.f32 %v3702_v54, 0.0  ;;  %6430 = vmatmul.msk.bf16.gmra.mxu2 %vm3145_vm9, %v3349_v0 }
 0x46b   : > { %3734 = vst [vmem:[#allocation7 + $0x8] sm:$0xff] %v3718_v59 }
 0x46c   : > { %v3646_v37 = vpop.f32.mrf.mxu3  ;;  %v3543_v18 = vpop.f32.mrf.mxu2 }
 0x46d   : > { %v3683_v1 = vadd.f32 %v3646_v37, %v3534_v9 }
 0x46e   : > { %v3291_v58 = vld [vmem:[#allocation6 + $0x7f] sm:$0xff]  ;;  %v3446_v21 = vpop.f32.mrf.mxu1 }
 0x46f   : > { %v3306_v26 = vld [vmem:[#allocation6 + $0x79] sm:$0xff]  ;;  %v3307_v8 = vld [vmem:[#allocation6 + $0x81] sm:$0xff]  ;;  %v3703_v51 = vadd.f32 %v9506_v50, %v3683_v1  ;;  %v3365_v60 = vpack.c.bf16 %v3291_v58, %v3322_v48  ;;  %v3544_v62 = vadd.f32 %v3543_v18, %v3446_v21 }
 0x470   : > { %v3341_v46 = vsel %vm3325_vm10, 0.0, %v3307_v8  ;;  %v7720_v21 = vld [vmem:[#allocation9 + $0x2cc] sm:$0xf0] }
 0x471   : > { %v3575_v36 = vpack.c.bf16 %v3341_v46, %v3306_v26  ;;  %v3719_v29 = vmax.f32 %v3703_v51, 0.0  ;;  %6406 = vmatmul.msk.bf16.gmra.mxu1 %vm3145_vm9, %v3365_v60  ;;  %v7782_v51 = vld [vmem:[#allocation9 + $0x4c4] sm:$0xf]  ;;  %v7067_v60 = vld [vmem:[#allocation9 + $0x4d0] sm:$0xf0] }
 0x472   : > { %v3749_v16 = vld [vmem:[#allocation7] ss:$2 sm:$0xff]  ;;  %v3765_v6 = vld [vmem:[#allocation7 + $0x1] ss:$2 sm:$0xff] }
 0x473   : > { %6454 = vmatmul.msk.bf16.gmra.mxu3 %vm3145_vm9, %v3575_v36  ;;  %v3780_v24 = vmax.f32 %v3749_v16, %v3765_v6  ;;  %3735 = vst [vmem:[#allocation7 + $0x10] sm:$0xff] %v3719_v29  ;;  %v7070_v36 = vor.u32 %v7782_v51, %v7067_v60  ;;  %v6505_v60 = vld [vmem:[#allocation9 + $0x60] sm:$0xf] }
 0x474   : > { %v3648_v52 = vpop.f32.mrf.mxu3  ;;  %v3545_v14 = vpop.f32.mrf.mxu2 }
 0x475   : > { %3788 = vst [vmem:[#allocation8] sm:$0xff] %v3780_v24  ;;  %v3684_v40 = vadd.f32 %v3648_v52, %v3536_v15  ;;  %5538 = vmatpush.bf16.msra.mxu0 %v7070_v36  ;;  %v6569_v52 = vld [vmem:[#allocation9 + $0xe0] sm:$0xf] }
 0x476   : > { %v3448_v61 = vpop.f32.mrf.mxu1  ;;  %v6633_v36 = vld [vmem:[#allocation9 + $0x160] sm:$0xf] }
 0x477   : > { %v3704_v56 = vadd.f32 %v9506_v50, %v3684_v40  ;;  %v3546_v35 = vadd.f32 %v3545_v14, %v3448_v61  ;;  %v7660_v40 = vld [vmem:[#allocation9 + $0xec] sm:$0xf0]  ;;  %v6666_v14 = vor.u32 %v7684_v57, %v6665_v12  ;;  %v6987_v57 = vld [vmem:[#allocation9 + $0x430] sm:$0xf0] }
 0x478   : > { %v7716_v61 = vld [vmem:[#allocation9 + $0x2ac] sm:$0xf0] }
 0x479   : > { %v3720_v4 = vmax.f32 %v3704_v56, 0.0  ;;  %v6570_v56 = vor.u32 %v7660_v40, %v6569_v52  ;;  %v7770_v40 = vld [vmem:[#allocation9 + $0x464] sm:$0xf] }
 0x47b   : > { %3736 = vst [vmem:[#allocation7 + $0x18] sm:$0xff] %v3720_v4  ;;  %v6697_v4 = vld [vmem:[#allocation9 + $0x1e0] sm:$0xf]  ;;  %5381 = vmatpush.bf16.msra.mxu1 %v6570_v56 }
 0x47c   : > { %v3651_v38 = vpop.f32.mrf.mxu3 }
 0x47d   : > { %v3685_v55 = vadd.f32 %v3651_v38, %v3539_v5  ;;  %v7692_v5 = vld [vmem:[#allocation9 + $0x1ec] sm:$0xf0]  ;;  %v6825_v38 = vld [vmem:[#allocation9 + $0x2e0] sm:$0xf] }
 0x47f   : > { %v3705_v31 = vadd.f32 %v9506_v50, %v3685_v55  ;;  %v6698_v55 = vor.u32 %v7692_v5, %v6697_v4  ;;  %v6489_v5 = vld [vmem:[#allocation9 + $0x40] sm:$0xf] }
 0x481   : > { %v3721_v25 = vmax.f32 %v3705_v31, 0.0  ;;  %v6553_v31 = vld [vmem:[#allocation9 + $0xc0] sm:$0xf]  ;;  %5394 = vmatpush.bf16.msra.mxu2 %v6698_v55 }
 0x482   : > { %v3751_v13 = vld [vmem:[#allocation7 + $0x10] ss:$2 sm:$0xff]  ;;  %v3767_v39 = vld [vmem:[#allocation7 + $0x11] ss:$2 sm:$0xff] }
 0x483   : > { %v3781_v3 = vmax.f32 %v3751_v13, %v3767_v39  ;;  %3737 = vst [vmem:[#allocation7 + $0x20] sm:$0xff] %v3721_v25  ;;  %v6826_v13 = vor.u32 %v7724_v49, %v6825_v38  ;;  %v6554_v39 = vor.u32 %v7656_v41, %v6553_v31  ;;  %v7640_v38 = vld [vmem:[#allocation9 + $0x4c] sm:$0xf0]  ;;  %v6617_v49 = vld [vmem:[#allocation9 + $0x140] sm:$0xf] }
 0x484   : > { %v3653_v11 = vpop.f32.mrf.mxu3  ;;  %v6490_v55 = vor.u32 %v7640_v38, %v6489_v5  ;;  %v7672_v31 = vld [vmem:[#allocation9 + $0x14c] sm:$0xf0]  ;;  %v6745_v41 = vld [vmem:[#allocation9 + $0x240] sm:$0xf] }
 0x485   : > { %3789 = vst [vmem:[#allocation8 + $0x8] sm:$0xff] %v3781_v3  ;;  %v3686_v23 = vadd.f32 %v3653_v11, %v3541_v43  ;;  %v6681_v43 = vld [vmem:[#allocation9 + $0x1c0] sm:$0xf]  ;;  %v7688_v3 = vld [vmem:[#allocation9 + $0x1cc] sm:$0xf0]  ;;  %5407 = vmatpush.bf16.msrb.mxu3 %v6826_v13  ;;  %5382 = vmatpush.bf16.msra.mxu1 %v6554_v39 }
 0x486   : > { %v6809_v11 = vld [vmem:[#allocation9 + $0x2c0] sm:$0xf]  ;;  %v7704_v13 = vld [vmem:[#allocation9 + $0x24c] sm:$0xf0]  ;;  %v7766_v39 = vld [vmem:[#allocation9 + $0x444] sm:$0xf] }
 0x487   : > { %v3706_v28 = vadd.f32 %v9506_v50, %v3686_v23  ;;  %v6682_v23 = vor.u32 %v7688_v3, %v6681_v43  ;;  %v6746_v43 = vor.u32 %v7704_v13, %v6745_v41  ;;  %v7003_v3 = vld [vmem:[#allocation9 + $0x450] sm:$0xf0]  ;;  %v7780_v13 = vld [vmem:[#allocation9 + $0x4ac] sm:$0xf0] }
 0x489   : > { %v3722_v2 = vmax.f32 %v3706_v28, 0.0  ;;  %v6810_v28 = vor.u32 %v7720_v21, %v6809_v11  ;;  %5395 = vmatpush.bf16.msra.mxu2 %v6682_v23  ;;  %v7006_v11 = vor.u32 %v7766_v39, %v7003_v3  ;;  %v6473_v23 = vld [vmem:[#allocation9 + $0x20] sm:$0xf]  ;;  %v7636_v21 = vld [vmem:[#allocation9 + $0x2c] sm:$0xf0] }
 0x48a   : > { %v7177_v39 = vld [vmem:[#allocation9 + $0x5a0] sm:$0xf] }
 0x48b   : > { %3738 = vst [vmem:[#allocation7 + $0x28] sm:$0xff] %v3722_v2  ;;  %5408 = vmatpush.bf16.msrb.mxu3 %v6810_v28  ;;  %v6601_v28 = vld [vmem:[#allocation9 + $0x120] sm:$0xf] }
 0x48c   : > { %v3656_v33 = vpop.f32.mrf.mxu3  ;;  %v3548_v0 = vpop.f32.mrf.mxu2 }
 0x48d   : > { %v3687_v22 = vadd.f32 %v3656_v33, %v3544_v62  ;;  %v6537_v33 = vld [vmem:[#allocation9 + $0xa0] sm:$0xf]  ;;  %5396 = vmatpush.bf16.msra.mxu2 %v6666_v14 }
 0x48e   : > { %v3451_v54 = vpop.f32.mrf.mxu1  ;;  %v6585_v14 = vld [vmem:[#allocation9 + $0x100] sm:$0xf] }
 0x48f   : > { %v3707_v7 = vadd.f32 %v9506_v50, %v3687_v22  ;;  %v3549_v27 = vadd.f32 %v3548_v0, %v3451_v54  ;;  %v6538_v22 = vor.u32 %v7652_v30, %v6537_v33  ;;  %v7700_v33 = vld [vmem:[#allocation9 + $0x22c] sm:$0xf0] }
 0x491   : > { %v3723_v44 = vmax.f32 %v3707_v7, 0.0  ;;  %v6793_v7 = vld [vmem:[#allocation9 + $0x2a0] sm:$0xf]  ;;  %5383 = vmatpush.bf16.msra.mxu1 %v6538_v22  ;;  %v7762_v22 = vld [vmem:[#allocation9 + $0x424] sm:$0xf] }
 0x492   : > { %v3753_v10 = vld [vmem:[#allocation7 + $0x20] ss:$2 sm:$0xff]  ;;  %v3769_v45 = vld [vmem:[#allocation7 + $0x21] ss:$2 sm:$0xff] }
 0x493   : > { %v3782_v47 = vmax.f32 %v3753_v10, %v3769_v45  ;;  %3739 = vst [vmem:[#allocation7 + $0x30] sm:$0xff] %v3723_v44  ;;  %v6794_v10 = vor.u32 %v7716_v61, %v6793_v7  ;;  %v7778_v45 = vld [vmem:[#allocation9 + $0x4a4] sm:$0xf]  ;;  %v6990_v7 = vor.u32 %v7762_v22, %v6987_v57  ;;  %v6457_v61 = vld [vmem:[#allocation9] sm:$0xf] }
 0x494   : > { %v3658_v42 = vpop.f32.mrf.mxu3  ;;  %v3550_v26 = vpop.f32.mrf.mxu2 }
 0x495   : > { %3790 = vst [vmem:[#allocation8 + $0x10] sm:$0xff] %v3782_v47  ;;  %v3688_v63 = vadd.f32 %v3658_v42, %v3546_v35  ;;  %v7051_v35 = vld [vmem:[#allocation9 + $0x4b0] sm:$0xf0]  ;;  %5409 = vmatpush.bf16.msrb.mxu3 %v6794_v10 }
 0x496   : > { %v3453_v58 = vpop.f32.mrf.mxu1  ;;  %v7054_v42 = vor.u32 %v7778_v45, %v7051_v35 }
 0x497   : > { %v3708_v32 = vadd.f32 %v9506_v50, %v3688_v63  ;;  %v3551_v8 = vadd.f32 %v3550_v26, %v3453_v58  ;;  %v7035_v26 = vld [vmem:[#allocation9 + $0x490] sm:$0xf0] }
 0x498   : > { %5539 = vmatpush.bf16.msra.mxu0 %v7054_v42 }
 0x499   : > { %v3724_v53 = vmax.f32 %v3708_v32, 0.0  ;;  %v6521_v32 = vld [vmem:[#allocation9 + $0x80] sm:$0xf] }
 0x49b   : > { %3740 = vst [vmem:[#allocation7 + $0x38] sm:$0xff] %v3724_v53  ;;  %v7648_v53 = vld [vmem:[#allocation9 + $0x8c] sm:$0xf0] }
 0x49c   : > { %v6522_v0 = vor.u32 %v7648_v53, %v6521_v32  ;;  %v6713_v32 = vld [vmem:[#allocation9 + $0x200] sm:$0xf]  ;;  %v7696_v53 = vld [vmem:[#allocation9 + $0x20c] sm:$0xf0] }
 0x49e   : > { %5384 = vmatpush.bf16.msra.mxu1 %v6522_v0 }
 0x4a2   : > { %v3755_v59 = vld [vmem:[#allocation7 + $0x30] ss:$2 sm:$0xff]  ;;  %v3771_v9 = vld [vmem:[#allocation7 + $0x31] ss:$2 sm:$0xff] }
 0x4a3   : > { %v3783_v34 = vmax.f32 %v3755_v59, %v3771_v9  ;;  %v6649_v59 = vld [vmem:[#allocation9 + $0x180] sm:$0xf]  ;;  %v7680_v9 = vld [vmem:[#allocation9 + $0x18c] sm:$0xf0] }
 0x4a5   : > { %3791 = vst [vmem:[#allocation8 + $0x18] sm:$0xff] %v3783_v34  ;;  %v3661_v37 = vpop.f32.mrf.mxu3  ;;  %v6777_v34 = vld [vmem:[#allocation9 + $0x280] sm:$0xf] }
 0x4a6   : > { %v3689_v1 = vadd.f32 %v3661_v37, %v3549_v27  ;;  %v6650_v37 = vor.u32 %v7680_v9, %v6649_v59  ;;  %v6714_v59 = vor.u32 %v7696_v53, %v6713_v32  ;;  %v6971_v9 = vld [vmem:[#allocation9 + $0x410] sm:$0xf0]  ;;  %v6889_v32 = vld [vmem:[#allocation9 + $0x360] sm:$0xf]  ;;  %v7740_v53 = vld [vmem:[#allocation9 + $0x36c] sm:$0xf0] }
 0x4a8   : > { %v3709_v19 = vadd.f32 %v9506_v50, %v3689_v1  ;;  %v7712_v1 = vld [vmem:[#allocation9 + $0x28c] sm:$0xf0]  ;;  %5397 = vmatpush.bf16.msra.mxu2 %v6650_v37 }
 0x4aa   : > { %v3725_v48 = vmax.f32 %v3709_v19, 0.0  ;;  %v7774_v19 = vld [vmem:[#allocation9 + $0x484] sm:$0xf] }
 0x4ab   : > { %v7038_v51 = vor.u32 %v7774_v19, %v7035_v26  ;;  %v7081_v19 = vld [vmem:[#allocation9 + $0x4e0] sm:$0xf] }
 0x4ac   : > { %3741 = vst [vmem:[#allocation7 + $0x40] sm:$0xff] %v3725_v48  ;;  %v3553_v25 = vpop.f32.mrf.mxu2  ;;  %v6778_v48 = vor.u32 %v7712_v1, %v6777_v34  ;;  %v6953_v34 = vld [vmem:[#allocation9 + $0x3e0] sm:$0xf] }
 0x4ad   : > { %v3663_v46 = vpop.f32.mrf.mxu3  ;;  %5540 = vmatpush.bf16.msra.mxu0 %v7038_v51  ;;  %v7820_v51 = vld [vmem:[#allocation9 + $0x5ec] sm:$0xf0] }
 0x4ae   : > { %v3690_v29 = vadd.f32 %v3663_v46, %v3551_v8  ;;  %v3456_v20 = vpop.f32.mrf.mxu1  ;;  %v7644_v46 = vld [vmem:[#allocation9 + $0x6c] sm:$0xf0]  ;;  %5410 = vmatpush.bf16.msrb.mxu3 %v6778_v48 }
 0x4af   : > { %v3554_v18 = vadd.f32 %v3553_v25, %v3456_v20  ;;  %v7019_v20 = vld [vmem:[#allocation9 + $0x470] sm:$0xf0]  ;;  %v6618_v25 = vor.u32 %v7672_v31, %v6617_v49  ;;  %v7748_v49 = vld [vmem:[#allocation9 + $0x3ac] sm:$0xf0]  ;;  %v7049_v31 = vld [vmem:[#allocation9 + $0x4a0] sm:$0xf] }
 0x4b0   : > { %v3710_v16 = vadd.f32 %v9506_v50, %v3690_v29  ;;  %v6506_v29 = vor.u32 %v7644_v46, %v6505_v60  ;;  %v7022_v56 = vor.u32 %v7770_v40, %v7019_v20  ;;  %v6577_v60 = vld [vmem:[#allocation9 + $0xe8] sm:$0xf]  ;;  %v7816_v20 = vld [vmem:[#allocation9 + $0x5cc] sm:$0xf0] }
 0x4b2   : > { %v3726_v6 = vmax.f32 %v3710_v16, 0.0  ;;  %v7676_v16 = vld [vmem:[#allocation9 + $0x16c] sm:$0xf0]  ;;  %5385 = vmatpush.bf16.msra.mxu1 %v6506_v29  ;;  %5541 = vmatpush.bf16.msra.mxu0 %v7022_v56  ;;  %v6937_v29 = vld [vmem:[#allocation9 + $0x3c0] sm:$0xf] }
 0x4b3   : > { %v6561_v56 = vld [vmem:[#allocation9 + $0xc8] sm:$0xf] }
 0x4b4   : > { %3742 = vst [vmem:[#allocation7 + $0x48] sm:$0xff] %v3726_v6  ;;  %v3555_v54 = vpop.f32.mrf.mxu2  ;;  %v6761_v6 = vld [vmem:[#allocation9 + $0x260] sm:$0xf] }
 0x4b6   : > { %v3458_v47 = vpop.f32.mrf.mxu1  ;;  %5386 = vmatpush.bf16.msra.mxu1 %v6490_v55  ;;  %5542 = vmatpush.bf16.msra.mxu0 %v7006_v11  ;;  %v6921_v55 = vld [vmem:[#allocation9 + $0x3a0] sm:$0xf]  ;;  %v7050_v11 = vor.u32 %v7780_v13, %v7049_v31 }
 0x4b7   : > { %v3556_v27 = vadd.f32 %v3555_v54, %v3458_v47  ;;  %v7664_v47 = vld [vmem:[#allocation9 + $0x10c] sm:$0xf0]  ;;  %v7758_v54 = vld [vmem:[#allocation9 + $0x404] sm:$0xf] }
 0x4b8   : > { %v6974_v37 = vor.u32 %v7758_v54, %v6971_v9  ;;  %v7017_v54 = vld [vmem:[#allocation9 + $0x460] sm:$0xf]  ;;  %v7772_v9 = vld [vmem:[#allocation9 + $0x46c] sm:$0xf0] }
 0x4ba   : > { %5543 = vmatpush.bf16.msra.mxu0 %v6990_v7  ;;  %v7776_v7 = vld [vmem:[#allocation9 + $0x48c] sm:$0xf0] }
 0x4bb   : > { %v3757_v15 = vld [vmem:[#allocation7 + $0x40] ss:$2 sm:$0xff]  ;;  %v3773_v24 = vld [vmem:[#allocation7 + $0x41] ss:$2 sm:$0xff] }
 0x4bc   : > { %v3784_v17 = vmax.f32 %v3757_v15, %v3773_v24  ;;  %v7708_v15 = vld [vmem:[#allocation9 + $0x26c] sm:$0xf0] }
 0x4bd   : > { %v6762_v52 = vor.u32 %v7708_v15, %v6761_v6 }
 0x4be   : > { %3792 = vst [vmem:[#allocation8 + $0x20] sm:$0xff] %v3784_v17  ;;  %v6634_v17 = vor.u32 %v7676_v16, %v6633_v36  ;;  %5544 = vmatpush.bf16.msra.mxu0 %v6974_v37  ;;  %v7661_v36 = vld [vmem:[#allocation9 + $0xf4] sm:$0xf0]  ;;  %v7752_v16 = vld [vmem:[#allocation9 + $0x3cc] sm:$0xf0]  ;;  %v7018_v37 = vor.u32 %v7772_v9, %v7017_v54 }
 0x4bf   : > { %5411 = vmatpush.bf16.msrb.mxu3 %v6762_v52  ;;  %v6578_v6 = vor.u32 %v7661_v36, %v6577_v60  ;;  %v6938_v15 = vor.u32 %v7752_v16, %v6937_v29  ;;  %v7193_v52 = vld [vmem:[#allocation9 + $0x5c0] sm:$0xf]  ;;  %v7768_v29 = vld [vmem:[#allocation9 + $0x44c] sm:$0xf0] }
 0x4c0   : > { %5398 = vmatpush.bf16.msra.mxu2 %v6634_v17  ;;  %v7784_v17 = vld [vmem:[#allocation9 + $0x4cc] sm:$0xf0]  ;;  %v7194_v5 = vor.u32 %v7816_v20, %v7193_v52  ;;  %v7001_v60 = vld [vmem:[#allocation9 + $0x440] sm:$0xf]  ;;  %v7641_v52 = vld [vmem:[#allocation9 + $0x54] sm:$0xf0] }
 0x4c1   : > { %v7129_v16 = vld [vmem:[#allocation9 + $0x540] sm:$0xf]  ;;  %v7002_v20 = vor.u32 %v7768_v29, %v7001_v60  ;;  %v7884_v60 = vld [vmem:[#allocation9 + $0x7ec] sm:$0xf0] }
 0x4c2   : > { %5589 = vmatpush.bf16.msrb.mxu0 %v6578_v6  ;;  %v7800_v6 = vld [vmem:[#allocation9 + $0x54c] sm:$0xf0]  ;;  %v3812_v29 = vld [vmem:[#allocation8 + $0x4] ss:$8 sm:$0xf] }
 0x4c3   : > { %5412 = vmatpush.bf16.msrb.mxu3 %v6746_v43  ;;  %v7812_v43 = vld [vmem:[#allocation9 + $0x5ac] sm:$0xf0] }
 0x4c4   : > { %5399 = vmatpush.bf16.msra.mxu2 %v6618_v25  ;;  %v6922_v25 = vor.u32 %v7748_v49, %v6921_v55  ;;  %v6985_v55 = vld [vmem:[#allocation9 + $0x420] sm:$0xf]  ;;  %v7764_v49 = vld [vmem:[#allocation9 + $0x42c] sm:$0xf0] }
 0x4c5   : > { %v3666_v2 = vpop.f32.mrf.mxu3 }
 0x4c6   : > { %v3691_v62 = vadd.f32 %v3666_v2, %v3554_v18  ;;  %v6474_v18 = vor.u32 %v7636_v21, %v6473_v23  ;;  %v7668_v2 = vld [vmem:[#allocation9 + $0x12c] sm:$0xf0]  ;;  %v6545_v23 = vld [vmem:[#allocation9 + $0xa8] sm:$0xf]  ;;  %v7653_v21 = vld [vmem:[#allocation9 + $0xb4] sm:$0xf0] }
 0x4c7   : > { %v6602_v30 = vor.u32 %v7668_v2, %v6601_v28 }
 0x4c8   : > { %v3711_v44 = vadd.f32 %v9506_v50, %v3691_v62  ;;  %v6729_v62 = vld [vmem:[#allocation9 + $0x220] sm:$0xf]  ;;  %5387 = vmatpush.bf16.msra.mxu1 %v6474_v18  ;;  %v7178_v18 = vor.u32 %v7812_v43, %v7177_v39  ;;  %v6481_v43 = vld [vmem:[#allocation9 + $0x28] sm:$0xf] }
 0x4c9   : > { %v6730_v12 = vor.u32 %v7700_v33, %v6729_v62  ;;  %5400 = vmatpush.bf16.msra.mxu2 %v6602_v30  ;;  %v6546_v62 = vor.u32 %v7653_v21, %v6545_v23  ;;  %v6905_v33 = vld [vmem:[#allocation9 + $0x380] sm:$0xf]  ;;  %v7744_v30 = vld [vmem:[#allocation9 + $0x38c] sm:$0xf0]  ;;  %v6986_v23 = vor.u32 %v7764_v49, %v6985_v55 }
 0x4ca   : > { %v3727_v63 = vmax.f32 %v3711_v44, 0.0  ;;  %v7632_v44 = vld [vmem:[#allocation9 + $0xc] sm:$0xf0]  ;;  %v6906_v57 = vor.u32 %v7744_v30, %v6905_v33  ;;  %v6841_v21 = vld [vmem:[#allocation9 + $0x300] sm:$0xf] }
 0x4cb   : > { %5413 = vmatpush.bf16.msrb.mxu3 %v6730_v12  ;;  %v6458_v35 = vor.u32 %v7632_v44, %v6457_v61  ;;  %v7033_v12 = vld [vmem:[#allocation9 + $0x480] sm:$0xf]  ;;  %v7808_v44 = vld [vmem:[#allocation9 + $0x58c] sm:$0xf0] }
 0x4cc   : > { %3743 = vst [vmem:[#allocation7 + $0x50] sm:$0xff] %v3727_v63  ;;  %v6586_v63 = vor.u32 %v7664_v47, %v6585_v14  ;;  %v3558_v48 = vpop.f32.mrf.mxu2  ;;  %v7161_v61 = vld [vmem:[#allocation9 + $0x580] sm:$0xf]  ;;  %v7760_v33 = vld [vmem:[#allocation9 + $0x40c] sm:$0xf0] }
 0x4cd   : > { %v3668_v58 = vpop.f32.mrf.mxu3  ;;  %5388 = vmatpush.bf16.msra.mxu1 %v6458_v35  ;;  %v7649_v35 = vld [vmem:[#allocation9 + $0x94] sm:$0xf0] }
 0x4ce   : > { %v3692_v8 = vadd.f32 %v3668_v58, %v3556_v27  ;;  %v3461_v0 = vpop.f32.mrf.mxu1  ;;  %v7756_v27 = vld [vmem:[#allocation9 + $0x3ec] sm:$0xf0]  ;;  %5401 = vmatpush.bf16.msra.mxu2 %v6586_v63 }
 0x4cf   : > { %v6954_v1 = vor.u32 %v7756_v27, %v6953_v34  ;;  %v7788_v58 = vld [vmem:[#allocation9 + $0x4ec] sm:$0xf0]  ;;  %5414 = vmatpush.bf16.msrb.mxu3 %v6714_v59  ;;  %v3559_v41 = vadd.f32 %v3558_v48, %v3461_v0  ;;  %v6890_v59 = vor.u32 %v7740_v53, %v6889_v32  ;;  %v7145_v34 = vld [vmem:[#allocation9 + $0x560] sm:$0xf] }
 0x4d0   : > { %v3712_v24 = vadd.f32 %v9506_v50, %v3692_v8  ;;  %v7082_v26 = vor.u32 %v7788_v58, %v7081_v19  ;;  %v7209_v8 = vld [vmem:[#allocation9 + $0x5e0] sm:$0xf]  ;;  %v6513_v19 = vld [vmem:[#allocation9 + $0x68] sm:$0xf]  ;;  %v7645_v58 = vld [vmem:[#allocation9 + $0x74] sm:$0xf0] }
 0x4d1   : > { %5420 = vmatpush.bf16.msrb.mxu1 %v6954_v1  ;;  %v7210_v46 = vor.u32 %v7820_v51, %v7209_v8  ;;  %v7804_v1 = vld [vmem:[#allocation9 + $0x56c] sm:$0xf0]  ;;  %v6873_v8 = vld [vmem:[#allocation9 + $0x340] sm:$0xf]  ;;  %v6514_v36 = vor.u32 %v7645_v58, %v6513_v19 }
 0x4d2   : > { %v3728_v4 = vmax.f32 %v3712_v24, 0.0  ;;  %5433 = vmatpush.bf16.msrb.mxu2 %v7082_v26  ;;  %v7065_v24 = vld [vmem:[#allocation9 + $0x4c0] sm:$0xf]  ;;  %v7146_v26 = vor.u32 %v7804_v1, %v7145_v34  ;;  %v7736_v51 = vld [vmem:[#allocation9 + $0x34c] sm:$0xf0] }
 0x4d3   : > { %5446 = vmatpush.bf16.msra.mxu3 %v7210_v46  ;;  %v7066_v40 = vor.u32 %v7784_v17, %v7065_v24  ;;  %v6874_v24 = vor.u32 %v7736_v51, %v6873_v8  ;;  %v6497_v17 = vld [vmem:[#allocation9 + $0x48] sm:$0xf]  ;;  %v7465_v8 = vld [vmem:[#allocation9 + $0x7e0] sm:$0xf] }
 0x4d4   : > { %3744 = vst [vmem:[#allocation7 + $0x58] sm:$0xff] %v3728_v4  ;;  %v7657_v4 = vld [vmem:[#allocation9 + $0xd4] sm:$0xf0]  ;;  %v3560_v14 = vpop.f32.mrf.mxu2  ;;  %v6498_v31 = vor.u32 %v7641_v52, %v6497_v17  ;;  %v7466_v55 = vor.u32 %v7884_v60, %v7465_v8  ;;  %v7273_v8 = vld [vmem:[#allocation9 + $0x660] sm:$0xf] }
 0x4d5   : > { %v6562_v38 = vor.u32 %v7657_v4, %v6561_v56  ;;  %5421 = vmatpush.bf16.msrb.mxu1 %v6938_v15  ;;  %v6857_v56 = vld [vmem:[#allocation9 + $0x320] sm:$0xf]  ;;  %v7732_v4 = vld [vmem:[#allocation9 + $0x32c] sm:$0xf0] }
 0x4d6   : > { %5434 = vmatpush.bf16.msrb.mxu2 %v7066_v40  ;;  %v3463_v2 = vpop.f32.mrf.mxu1  ;;  %v6858_v39 = vor.u32 %v7732_v4, %v6857_v56  ;;  %v3796_v19 = vld [vmem:[#allocation8] ss:$8 sm:$0xf]  ;;  %v3800_v58 = vld [vmem:[#allocation8 + $0x1] ss:$8 sm:$0xf] }
 0x4d7   : > { %5447 = vmatpush.bf16.msra.mxu3 %v7194_v5  ;;  %5590 = vmatpush.bf16.msrb.mxu0 %v6562_v38  ;;  %v3561_v0 = vadd.f32 %v3560_v14, %v3463_v2  ;;  %v7130_v38 = vor.u32 %v7800_v6, %v7129_v16  ;;  %v3804_v51 = vld [vmem:[#allocation8 + $0x2] ss:$8 sm:$0xf] }
 0x4d8   : > { %v7089_v56 = vld [vmem:[#allocation9 + $0x4e8] sm:$0xf]  ;;  %v7789_v4 = vld [vmem:[#allocation9 + $0x4f4] sm:$0xf0]  ;;  %v7836_v60 = vld [vmem:[#allocation9 + $0x66c] sm:$0xf0] }
 0x4d9   : > { %5422 = vmatpush.bf16.msrb.mxu1 %v6922_v25  ;;  %v7796_v25 = vld [vmem:[#allocation9 + $0x52c] sm:$0xf0] }
 0x4da   : > { %5435 = vmatpush.bf16.msrb.mxu2 %v7050_v11 }
 0x4db   : > { %v3759_v10 = vld [vmem:[#allocation7 + $0x50] ss:$2 sm:$0xff]  ;;  %v3775_v45 = vld [vmem:[#allocation7 + $0x51] ss:$2 sm:$0xff]  ;;  %5448 = vmatpush.bf16.msra.mxu3 %v7178_v18  ;;  %5591 = vmatpush.bf16.msrb.mxu0 %v6546_v62  ;;  %v6969_v62 = vld [vmem:[#allocation9 + $0x400] sm:$0xf] }
 0x4dc   : > { %v3785_v42 = vmax.f32 %v3759_v10, %v3775_v45  ;;  %v7034_v10 = vor.u32 %v7776_v7, %v7033_v12  ;;  %v6529_v45 = vld [vmem:[#allocation9 + $0x88] sm:$0xf]  ;;  %v7097_v12 = vld [vmem:[#allocation9 + $0x500] sm:$0xf] }
 0x4dd   : > { %v6530_v63 = vor.u32 %v7649_v35, %v6529_v45  ;;  %5423 = vmatpush.bf16.msrb.mxu1 %v6906_v57 }
 0x4de   : > { %3793 = vst [vmem:[#allocation8 + $0x28] sm:$0xff] %v3785_v42  ;;  %v7162_v42 = vor.u32 %v7808_v44, %v7161_v61  ;;  %5436 = vmatpush.bf16.msrb.mxu2 %v7034_v10  ;;  %v6465_v61 = vld [vmem:[#allocation9 + $0x8] sm:$0xf]  ;;  %v7633_v44 = vld [vmem:[#allocation9 + $0x14] sm:$0xf0]  ;;  %v6970_v10 = vor.u32 %v7760_v33, %v6969_v62 }
 0x4df   : > { %5592 = vmatpush.bf16.msrb.mxu0 %v6530_v63  ;;  %v6466_v32 = vor.u32 %v7633_v44, %v6465_v61  ;;  %v7305_v33 = vld [vmem:[#allocation9 + $0x6a0] sm:$0xf]  ;;  %v7057_v44 = vld [vmem:[#allocation9 + $0x4a8] sm:$0xf] }
 0x4e0   : > { %5449 = vmatpush.bf16.msra.mxu3 %v7162_v42 }
 0x4e1   : > { %5424 = vmatpush.bf16.msrb.mxu1 %v6890_v59 }
 0x4e2   : > { %5437 = vmatpush.bf16.msrb.mxu2 %v7018_v37 }
 0x4e3   : > { %5593 = vmatpush.bf16.msrb.mxu0 %v6514_v36  ;;  %v6571_v36 = vld [vmem:[#allocation9 + $0xf0] sm:$0xf0] }
 0x4e4   : > { %5450 = vmatpush.bf16.msra.mxu3 %v7146_v26  ;;  %v7852_v26 = vld [vmem:[#allocation9 + $0x6ec] sm:$0xf0] }
 0x4e5   : > { %v3671_v3 = vpop.f32.mrf.mxu3  ;;  %5425 = vmatpush.bf16.msrb.mxu1 %v6874_v24 }
 0x4e6   : > { %v3693_v28 = vadd.f32 %v3671_v3, %v3559_v41  ;;  %v7113_v41 = vld [vmem:[#allocation9 + $0x520] sm:$0xf]  ;;  %v7637_v3 = vld [vmem:[#allocation9 + $0x34] sm:$0xf0]  ;;  %5438 = vmatpush.bf16.msrb.mxu2 %v7002_v20 }
 0x4e7   : > { %v7114_v2 = vor.u32 %v7796_v25, %v7113_v41  ;;  %5594 = vmatpush.bf16.msrb.mxu0 %v6498_v31  ;;  %v6482_v30 = vor.u32 %v7637_v3, %v6481_v43  ;;  %v7321_v31 = vld [vmem:[#allocation9 + $0x6c0] sm:$0xf]  ;;  %v7848_v41 = vld [vmem:[#allocation9 + $0x6cc] sm:$0xf0]  ;;  %v7654_v3 = vld [vmem:[#allocation9 + $0xc4] sm:$0xf] }
 0x4e8   : > { %v3713_v22 = vadd.f32 %v9506_v50, %v3693_v28  ;;  %v7728_v28 = vld [vmem:[#allocation9 + $0x30c] sm:$0xf0]  ;;  %5451 = vmatpush.bf16.msra.mxu3 %v7130_v38  ;;  %v7449_v25 = vld [vmem:[#allocation9 + $0x7c0] sm:$0xf] }
 0x4e9   : > { %5426 = vmatpush.bf16.msrb.mxu1 %v6858_v39  ;;  %v6842_v7 = vor.u32 %v7728_v28, %v6841_v21  ;;  %v7880_v43 = vld [vmem:[#allocation9 + $0x7cc] sm:$0xf0]  ;;  %v7322_v21 = vor.u32 %v7848_v41, %v7321_v31  ;;  %v7073_v28 = vld [vmem:[#allocation9 + $0x4c8] sm:$0xf]  ;;  %v7638_v41 = vld [vmem:[#allocation9 + $0x44] sm:$0xf] }
 0x4ea   : > { %v3729_v47 = vmax.f32 %v3713_v22, 0.0  ;;  %v7792_v22 = vld [vmem:[#allocation9 + $0x50c] sm:$0xf0]  ;;  %5439 = vmatpush.bf16.msrb.mxu2 %v6986_v23  ;;  %v7090_v23 = vor.u32 %v7789_v4, %v7089_v56 }
 0x4eb   : > { %v7098_v35 = vor.u32 %v7792_v22, %v7097_v12  ;;  %5595 = vmatpush.bf16.msrb.mxu0 %v6482_v30  ;;  %v7844_v30 = vld [vmem:[#allocation9 + $0x6ac] sm:$0xf0]  ;;  %v7433_v12 = vld [vmem:[#allocation9 + $0x7a0] sm:$0xf] }
 0x4ec   : > { %3745 = vst [vmem:[#allocation7 + $0x60] sm:$0xff] %v3729_v47  ;;  %v3563_v40 = vpop.f32.mrf.mxu2  ;;  %5452 = vmatpush.bf16.msra.mxu3 %v7114_v2  ;;  %v7450_v2 = vor.u32 %v7880_v43, %v7449_v25  ;;  %v7876_v22 = vld [vmem:[#allocation9 + $0x7ac] sm:$0xf0]  ;;  %v6491_v25 = vld [vmem:[#allocation9 + $0x50] sm:$0xf0] }
 0x4ed   : > { %v3673_v27 = vpop.f32.mrf.mxu3  ;;  %5427 = vmatpush.bf16.msrb.mxu1 %v6842_v7  ;;  %v6539_v7 = vld [vmem:[#allocation9 + $0xb0] sm:$0xf0]  ;;  %v7832_v4 = vld [vmem:[#allocation9 + $0x64c] sm:$0xf0]  ;;  %v7009_v43 = vld [vmem:[#allocation9 + $0x448] sm:$0xf] }
 0x4ee   : > { %v3694_v48 = vadd.f32 %v3673_v27, %v3561_v0  ;;  %v3466_v46 = vpop.f32.mrf.mxu1  ;;  %5440 = vmatpush.bf16.msrb.mxu2 %v6970_v10  ;;  %v7781_v10 = vld [vmem:[#allocation9 + $0x4b4] sm:$0xf0] }
 0x4ef   : > { %v3564_v13 = vadd.f32 %v3563_v40, %v3466_v46  ;;  %5596 = vmatpush.bf16.msrb.mxu0 %v6466_v32  ;;  %v7658_v46 = vld [vmem:[#allocation9 + $0xe4] sm:$0xf]  ;;  %v7872_v32 = vld [vmem:[#allocation9 + $0x78c] sm:$0xf0] }
 0x4f0   : > { %v3714_v15 = vadd.f32 %v9506_v50, %v3694_v48  ;;  %5453 = vmatpush.bf16.msra.mxu3 %v7098_v35  ;;  %v7337_v48 = vld [vmem:[#allocation9 + $0x6e0] sm:$0xf]  ;;  %v6574_v49 = vor.u32 %v7658_v46, %v6571_v36  ;;  %v7840_v35 = vld [vmem:[#allocation9 + $0x68c] sm:$0xf0] }
 0x4f1   : > { %v7338_v40 = vor.u32 %v7852_v26, %v7337_v48  ;;  %v3816_v26 = vld [vmem:[#allocation8 + $0x5] ss:$8 sm:$0xf]  ;;  %v7401_v46 = vld [vmem:[#allocation9 + $0x760] sm:$0xf] }
 0x4f2   : > { %v3730_v5 = vmax.f32 %v3714_v15, 0.0  ;;  %v7868_v36 = vld [vmem:[#allocation9 + $0x76c] sm:$0xf0] }
 0x4f4   : > { %3746 = vst [vmem:[#allocation7 + $0x68] sm:$0xff] %v3730_v5  ;;  %v3565_v63 = vpop.f32.mrf.mxu2 }
 0x4f6   : > { %v3676_v11 = vpop.f32.mrf.mxu3  ;;  %v3468_v14 = vpop.f32.mrf.mxu1 }
 0x4f7   : > { %v3695_v18 = vadd.f32 %v3676_v11, %v3564_v13  ;;  %v3566_v54 = vadd.f32 %v3565_v63, %v3468_v14  ;;  %v6555_v11 = vld [vmem:[#allocation9 + $0xd0] sm:$0xf0]  ;;  %v7306_v14 = vor.u32 %v7844_v30, %v7305_v33  ;;  %v7417_v63 = vld [vmem:[#allocation9 + $0x780] sm:$0xf]  ;;  %v7634_v33 = vld [vmem:[#allocation9 + $0x24] sm:$0xf] }
 0x4f8   : > { %v6558_v62 = vor.u32 %v7654_v3, %v6555_v11  ;;  %v7769_v3 = vld [vmem:[#allocation9 + $0x454] sm:$0xf0] }
 0x4f9   : > { %v3715_v57 = vadd.f32 %v9506_v50, %v3695_v18  ;;  %v7785_v18 = vld [vmem:[#allocation9 + $0x4d4] sm:$0xf0]  ;;  %v7010_v30 = vor.u32 %v7769_v3, %v7009_v43 }
 0x4fa   : > { %v7074_v61 = vor.u32 %v7785_v18, %v7073_v28  ;;  %v7828_v28 = vld [vmem:[#allocation9 + $0x62c] sm:$0xf0]  ;;  %v6494_v18 = vor.u32 %v7638_v41, %v6491_v25 }
 0x4fb   : > { %v3731_v45 = vmax.f32 %v3715_v57, 0.0  ;;  %v3761_v47 = vld [vmem:[#allocation7 + $0x60] ss:$2 sm:$0xff]  ;;  %v3777_v42 = vld [vmem:[#allocation7 + $0x61] ss:$2 sm:$0xff] }
 0x4fc   : > { %v3786_v53 = vmax.f32 %v3761_v47, %v3777_v42  ;;  %v7650_v57 = vld [vmem:[#allocation9 + $0xa4] sm:$0xf]  ;;  %v7434_v47 = vor.u32 %v7876_v22, %v7433_v12  ;;  %v6475_v12 = vld [vmem:[#allocation9 + $0x30] sm:$0xf0]  ;;  %v6993_v22 = vld [vmem:[#allocation9 + $0x428] sm:$0xf] }
 0x4fd   : > { %3747 = vst [vmem:[#allocation7 + $0x70] sm:$0xff] %v3731_v45  ;;  %v7289_v45 = vld [vmem:[#allocation9 + $0x680] sm:$0xf]  ;;  %v6542_v42 = vor.u32 %v7650_v57, %v6539_v7  ;;  %v7765_v57 = vld [vmem:[#allocation9 + $0x434] sm:$0xf0] }
 0x4fe   : > { %v3678_v0 = vpop.f32.mrf.mxu3  ;;  %3794 = vst [vmem:[#allocation8 + $0x30] sm:$0xff] %v3786_v53  ;;  %v7646_v53 = vld [vmem:[#allocation9 + $0x84] sm:$0xf]  ;;  %v7225_v7 = vld [vmem:[#allocation9 + $0x600] sm:$0xf] }
 0x4ff   : > { %v3696_v59 = vadd.f32 %v3678_v0, %v3566_v54  ;;  %v6523_v54 = vld [vmem:[#allocation9 + $0x90] sm:$0xf0] }
 0x501   : > { %v3716_v9 = vadd.f32 %v9506_v50, %v3696_v59  ;;  %v7058_v59 = vor.u32 %v7781_v10, %v7057_v44  ;;  %v7353_v44 = vld [vmem:[#allocation9 + $0x700] sm:$0xf] }
 0x503   : > { %v3732_v34 = vmax.f32 %v3716_v9, 0.0  ;;  %v3808_v9 = vld [vmem:[#allocation8 + $0x3] ss:$8 sm:$0xf] }
 0x505   : > { %3748 = vst [vmem:[#allocation7 + $0x78] sm:$0xff] %v3732_v34 }
 0x50c   : > { %v3763_v27 = vld [vmem:[#allocation7 + $0x70] ss:$2 sm:$0xff]  ;;  %v3779_v37 = vld [vmem:[#allocation7 + $0x71] ss:$2 sm:$0xff] }
 0x50d   : > { %v3787_v1 = vmax.f32 %v3763_v27, %v3779_v37  ;;  %v7290_v27 = vor.u32 %v7840_v35, %v7289_v45  ;;  %v7041_v37 = vld [vmem:[#allocation9 + $0x488] sm:$0xf]  ;;  %v7856_v45 = vld [vmem:[#allocation9 + $0x70c] sm:$0xf0]  ;;  %v7630_v35 = vld [vmem:[#allocation9 + $0x4] sm:$0xf] }
 0x50f   : > { %3795 = vst [vmem:[#allocation8 + $0x38] sm:$0xff] %v3787_v1  ;;  %v7777_v1 = vld [vmem:[#allocation9 + $0x494] sm:$0xf0] }
 0x516   : > { %v3797_v16 = vld [vmem:[#allocation8] ss:$8 sm:$0xf0]  ;;  %v3801_v6 = vld [vmem:[#allocation8 + $0x1] ss:$8 sm:$0xf0] }
 0x517   : > { %v3798_v15 = vor.u32 %v3797_v16, %v3796_v19  ;;  %v3802_v50 = vor.u32 %v3801_v6, %v3800_v58  ;;  %v3805_v24 = vld [vmem:[#allocation8 + $0x2] ss:$8 sm:$0xf0]  ;;  %v3813_v17 = vld [vmem:[#allocation8 + $0x4] ss:$8 sm:$0xf0]  ;;  %v7418_v19 = vor.u32 %v7872_v32, %v7417_v63  ;;  %v6526_v58 = vor.u32 %v7646_v53, %v6523_v54 }
 0x518   : > { %v3806_v52 = vor.u32 %v3805_v24, %v3804_v51  ;;  %v3814_v20 = vor.u32 %v3813_v17, %v3812_v29  ;;  %v3809_v0 = vld [vmem:[#allocation8 + $0x3] ss:$8 sm:$0xf0]  ;;  %v3817_v34 = vld [vmem:[#allocation8 + $0x5] ss:$8 sm:$0xf0]  ;;  %v7042_v29 = vor.u32 %v7777_v1, %v7041_v37  ;;  %v7274_v17 = vor.u32 %v7836_v60, %v7273_v8 }
 0x519   : > { %v9536_v5 = vpack.c.bf16 %v3798_v15, %v3798_v15  ;;  %v9538_v38 = vpack.c.bf16 %v3802_v50, %v3802_v50  ;;  %v3810_v48 = vor.u32 %v3809_v0, %v3808_v9  ;;  %v3818_v51 = vor.u32 %v3817_v34, %v3816_v26  ;;  %v7642_v16 = vld [vmem:[#allocation9 + $0x64] sm:$0xf]  ;;  %v6507_v6 = vld [vmem:[#allocation9 + $0x70] sm:$0xf0]  ;;  %v7025_v15 = vld [vmem:[#allocation9 + $0x468] sm:$0xf] }
 0x51a   : > { %v9540_v13 = vpack.c.bf16 %v3806_v52, %v3806_v52  ;;  %v9542_v39 = vpack.c.bf16 %v3814_v20, %v3814_v20  ;;  %v7773_v50 = vld [vmem:[#allocation9 + $0x474] sm:$0xf0]  ;;  %v7402_v52 = vor.u32 %v7868_v36, %v7401_v46  ;;  %v6510_v56 = vor.u32 %v7642_v16, %v6507_v6  ;;  %v6977_v63 = vld [vmem:[#allocation9 + $0x408] sm:$0xf]  ;;  %v7690_v53 = vld [vmem:[#allocation9 + $0x1e4] sm:$0xf] }
 0x51b   : > { %5389 = vmatmul.bf16.vlgmr.msra.gmra.mxu1 %v9536_v5  ;;  %5402 = vmatmul.bf16.vlgmr.msra.gmra.mxu2 %v9538_v38  ;;  %v9548_v24 = vpack.c.bf16 %v3810_v48, %v3810_v48  ;;  %v9550_v20 = vpack.c.bf16 %v3818_v51, %v3818_v51  ;;  %v7026_v31 = vor.u32 %v7773_v50, %v7025_v15  ;;  %v7761_v32 = vld [vmem:[#allocation9 + $0x414] sm:$0xf0]  ;;  %v6699_v54 = vld [vmem:[#allocation9 + $0x1f0] sm:$0xf0]  ;;  %v7722_v0 = vld [vmem:[#allocation9 + $0x2e4] sm:$0xf] }
 0x51c   : > { %5415 = vmatmul.bf16.vlgmr.msrb.gmra.mxu3 %v9540_v13  ;;  %5459 = vmatpush.bf16.msra.mxu1 %v7338_v40  ;;  %v7257_v40 = vld [vmem:[#allocation9 + $0x640] sm:$0xf]  ;;  %v6827_v9 = vld [vmem:[#allocation9 + $0x2f0] sm:$0xf0]  ;;  %v7754_v37 = vld [vmem:[#allocation9 + $0x3e4] sm:$0xf]  ;;  %v6702_v60 = vor.u32 %v7690_v53, %v6699_v54 }
 0x51d   : > { %5472 = vmatpush.bf16.msra.mxu2 %v7466_v55  ;;  %5485 = vmatpush.bf16.msrb.mxu3 %v6574_v49  ;;  %v7385_v55 = vld [vmem:[#allocation9 + $0x740] sm:$0xf]  ;;  %v7864_v49 = vld [vmem:[#allocation9 + $0x74c] sm:$0xf0]  ;;  %v7258_v11 = vor.u32 %v7832_v4, %v7257_v40  ;;  %v6955_v48 = vld [vmem:[#allocation9 + $0x3f0] sm:$0xf0]  ;;  %v6830_v16 = vor.u32 %v7722_v0, %v6827_v9 }
 0x51e   : > { %5545 = vmatmul.bf16.vlgmr.msra.gmra.mxu0 %v9542_v39  ;;  %v3820_v34 = vld [vmem:[#allocation8 + $0x6] ss:$8 sm:$0xf]  ;;  %v3825_v1 = vld [vmem:[#allocation8 + $0x7] ss:$8 sm:$0xf0] }
 0x51f   : > { %5641 = vmatpush.bf16.msra.mxu0 %v7090_v23  ;;  %v7386_v23 = vor.u32 %v7864_v49, %v7385_v55  ;;  %v7659_v26 = vld [vmem:[#allocation9 + $0xec] sm:$0xf]  ;;  %v6579_v8 = vld [vmem:[#allocation9 + $0xf8] sm:$0xf0]  ;;  %v7686_v15 = vld [vmem:[#allocation9 + $0x1c4] sm:$0xf] }
 0x520   : > { %5460 = vmatpush.bf16.msra.mxu1 %v7322_v21  ;;  %v7241_v21 = vld [vmem:[#allocation9 + $0x620] sm:$0xf]  ;;  %v3824_v36 = vld [vmem:[#allocation8 + $0x7] ss:$8 sm:$0xf] }
 0x521   : > { %5473 = vmatpush.bf16.msra.mxu2 %v7450_v2  ;;  %5486 = vmatpush.bf16.msrb.mxu3 %v6558_v62  ;;  %v7369_v2 = vld [vmem:[#allocation9 + $0x720] sm:$0xf]  ;;  %v7860_v62 = vld [vmem:[#allocation9 + $0x72c] sm:$0xf0]  ;;  %v3826_v6 = vor.u32 %v3825_v1, %v3824_v36  ;;  %v6683_v50 = vld [vmem:[#allocation9 + $0x1d0] sm:$0xf0] }
 0x522   : > { %v7370_v10 = vor.u32 %v7860_v62, %v7369_v2  ;;  %v7718_v40 = vld [vmem:[#allocation9 + $0x2c4] sm:$0xf]  ;;  %v6939_v55 = vld [vmem:[#allocation9 + $0x3d0] sm:$0xf0]  ;;  %v7655_v49 = vld [vmem:[#allocation9 + $0xcc] sm:$0xf]  ;;  %v6686_v43 = vor.u32 %v7686_v15, %v6683_v50 }
 0x523   : > { %5642 = vmatpush.bf16.msra.mxu0 %v7074_v61  ;;  %v7824_v61 = vld [vmem:[#allocation9 + $0x60c] sm:$0xf0]  ;;  %v7750_v4 = vld [vmem:[#allocation9 + $0x3c4] sm:$0xf]  ;;  %v9558_v25 = vpack.c.bf16 %v3826_v6, %v3826_v6  ;;  %v6795_v2 = vld [vmem:[#allocation9 + $0x2b0] sm:$0xf0] }
 0x524   : > { %5461 = vmatpush.bf16.msra.mxu1 %v7306_v14  ;;  %v7242_v14 = vor.u32 %v7828_v28, %v7241_v21  ;;  %v6942_v21 = vor.u32 %v7750_v4, %v6939_v55  ;;  %v7746_v62 = vld [vmem:[#allocation9 + $0x3a4] sm:$0xf]  ;;  %v6635_v0 = vld [vmem:[#allocation9 + $0x170] sm:$0xf0]  ;;  %v7639_v15 = vld [vmem:[#allocation9 + $0x4c] sm:$0xf] }
 0x525   : > { %5474 = vmatpush.bf16.msra.mxu2 %v7434_v47  ;;  %5487 = vmatpush.bf16.msrb.mxu3 %v6542_v42  ;;  %v6459_v47 = vld [vmem:[#allocation9 + $0x10] sm:$0xf0]  ;;  %v6478_v42 = vor.u32 %v7634_v33, %v6475_v12  ;;  %v6547_v12 = vld [vmem:[#allocation9 + $0xb8] sm:$0xf0]  ;;  %v7674_v54 = vld [vmem:[#allocation9 + $0x164] sm:$0xf] }
 0x526   : > { %v6462_v51 = vor.u32 %v7630_v35, %v6459_v47  ;;  %v6923_v33 = vld [vmem:[#allocation9 + $0x3b0] sm:$0xf0]  ;;  %v7742_v35 = vld [vmem:[#allocation9 + $0x384] sm:$0xf]  ;;  %v6499_v50 = vld [vmem:[#allocation9 + $0x58] sm:$0xf0] }
 0x527   : > { %5643 = vmatpush.bf16.msra.mxu0 %v7058_v59  ;;  %v6994_v59 = vor.u32 %v7765_v57, %v6993_v22  ;;  %v6907_v47 = vld [vmem:[#allocation9 + $0x390] sm:$0xf0]  ;;  %v7702_v36 = vld [vmem:[#allocation9 + $0x244] sm:$0xf]  ;;  %v6502_v55 = vor.u32 %v7639_v15, %v6499_v50 }
 0x528   : > { %5462 = vmatpush.bf16.msra.mxu1 %v7290_v27  ;;  %v3821_v27 = vld [vmem:[#allocation8 + $0x6] ss:$8 sm:$0xf0] }
 0x529   : > { %5475 = vmatpush.bf16.msra.mxu2 %v7418_v19  ;;  %5488 = vmatpush.bf16.msrb.mxu3 %v6526_v58  ;;  %v7226_v19 = vor.u32 %v7824_v61, %v7225_v7  ;;  %v7354_v58 = vor.u32 %v7856_v45, %v7353_v44  ;;  %v3822_v46 = vor.u32 %v3821_v27, %v3820_v34  ;;  %v7678_v7 = vld [vmem:[#allocation9 + $0x184] sm:$0xf]  ;;  %v6651_v61 = vld [vmem:[#allocation9 + $0x190] sm:$0xf0] }
 0x52a   : > { %v6926_v44 = vor.u32 %v7746_v62, %v6923_v33  ;;  %v6779_v45 = vld [vmem:[#allocation9 + $0x290] sm:$0xf0]  ;;  %v7706_v34 = vld [vmem:[#allocation9 + $0x264] sm:$0xf] }
 0x52b   : > { %5644 = vmatpush.bf16.msra.mxu0 %v7042_v29  ;;  %5428 = vmatmul.bf16.vlgmr.msrb.gmra.mxu1 %v9548_v24  ;;  %v6978_v29 = vor.u32 %v7761_v32, %v6977_v63  ;;  %v9556_v41 = vpack.c.bf16 %v3822_v46, %v3822_v46  ;;  %v6531_v63 = vld [vmem:[#allocation9 + $0x98] sm:$0xf0]  ;;  %v6654_v32 = vor.u32 %v7678_v7, %v6651_v61  ;;  %v6763_v27 = vld [vmem:[#allocation9 + $0x270] sm:$0xf0]  ;;  %v7694_v62 = vld [vmem:[#allocation9 + $0x204] sm:$0xf] }
 0x52c   : > { %5441 = vmatmul.bf16.vlgmr.msrb.gmra.mxu2 %v9542_v39  ;;  %5454 = vmatmul.bf16.vlgmr.msra.gmra.mxu3 %v9550_v20  ;;  %v6891_v1 = vld [vmem:[#allocation9 + $0x370] sm:$0xf0]  ;;  %v7631_v7 = vld [vmem:[#allocation9 + $0xc] sm:$0xf]  ;;  %v6467_v61 = vld [vmem:[#allocation9 + $0x18] sm:$0xf0] }
 0x52d   : > { %5463 = vmatpush.bf16.msra.mxu1 %v7274_v17  ;;  %5476 = vmatpush.bf16.msra.mxu2 %v7402_v52  ;;  %v6958_v17 = vor.u32 %v7754_v37, %v6955_v48  ;;  %v6582_v52 = vor.u32 %v7659_v26, %v6579_v8  ;;  %v7738_v37 = vld [vmem:[#allocation9 + $0x364] sm:$0xf]  ;;  %v6638_v48 = vor.u32 %v7674_v54, %v6635_v0  ;;  %v6875_v6 = vld [vmem:[#allocation9 + $0x350] sm:$0xf0] }
 0x52e   : > { %5489 = vmatpush.bf16.msrb.mxu3 %v6510_v56  ;;  %5597 = vmatmul.bf16.vlgmr.msrb.gmra.mxu0 %v9536_v5  ;;  %v6811_v56 = vld [vmem:[#allocation9 + $0x2d0] sm:$0xf0]  ;;  %v6766_v26 = vor.u32 %v7706_v34, %v6763_v27  ;;  %v7670_v8 = vld [vmem:[#allocation9 + $0x144] sm:$0xf]  ;;  %v6470_v0 = vor.u32 %v7631_v7, %v6467_v61 }
 0x52f   : > { %5645 = vmatpush.bf16.msra.mxu0 %v7026_v31  ;;  %v6563_v31 = vld [vmem:[#allocation9 + $0xd8] sm:$0xf0]  ;;  %v6814_v3 = vor.u32 %v7718_v40, %v6811_v56  ;;  %v7666_v40 = vld [vmem:[#allocation9 + $0x124] sm:$0xf]  ;;  %v6603_v56 = vld [vmem:[#allocation9 + $0x130] sm:$0xf0] }
 0x530   : > { %v6566_v28 = vor.u32 %v7655_v49, %v6563_v31  ;;  %v7698_v49 = vld [vmem:[#allocation9 + $0x224] sm:$0xf]  ;;  %v6731_v31 = vld [vmem:[#allocation9 + $0x230] sm:$0xf0] }
 0x531   : > { %5464 = vmatpush.bf16.msra.mxu1 %v7258_v11  ;;  %5477 = vmatpush.bf16.msra.mxu2 %v7386_v23  ;;  %v7682_v11 = vld [vmem:[#allocation9 + $0x1a4] sm:$0xf]  ;;  %v6667_v23 = vld [vmem:[#allocation9 + $0x1b0] sm:$0xf0] }
 0x532   : > { %5490 = vmatpush.bf16.msrb.mxu3 %v6494_v18  ;;  %v7714_v18 = vld [vmem:[#allocation9 + $0x2a4] sm:$0xf]  ;;  %v6670_v22 = vor.u32 %v7682_v11, %v6667_v23  ;;  %v7635_v11 = vld [vmem:[#allocation9 + $0x2c] sm:$0xf]  ;;  %v6483_v23 = vld [vmem:[#allocation9 + $0x38] sm:$0xf0] }
 0x533   : > { %5646 = vmatpush.bf16.msra.mxu0 %v7010_v30  ;;  %v7651_v30 = vld [vmem:[#allocation9 + $0xac] sm:$0xf]  ;;  %v6798_v57 = vor.u32 %v7714_v18, %v6795_v2  ;;  %v6734_v18 = vor.u32 %v7698_v49, %v6731_v31  ;;  %v6587_v2 = vld [vmem:[#allocation9 + $0x110] sm:$0xf0]  ;;  %v7814_v34 = vld [vmem:[#allocation9 + $0x5c4] sm:$0xf] }
 0x534   : > { %v6715_v33 = vld [vmem:[#allocation9 + $0x210] sm:$0xf0]  ;;  %v7842_v15 = vld [vmem:[#allocation9 + $0x6a4] sm:$0xf] }
 0x535   : > { %5465 = vmatpush.bf16.msra.mxu1 %v7242_v14  ;;  %5478 = vmatpush.bf16.msra.mxu2 %v7370_v10  ;;  %v6550_v14 = vor.u32 %v7651_v30, %v6547_v12  ;;  %v7710_v10 = vld [vmem:[#allocation9 + $0x284] sm:$0xf]  ;;  %v6486_v12 = vor.u32 %v7635_v11, %v6483_v23  ;;  %v7195_v27 = vld [vmem:[#allocation9 + $0x5d0] sm:$0xf0] }
 0x536   : > { %5491 = vmatpush.bf16.msrb.mxu3 %v6478_v42  ;;  %v7647_v42 = vld [vmem:[#allocation9 + $0x8c] sm:$0xf]  ;;  %v6782_v53 = vor.u32 %v7710_v10, %v6779_v45  ;;  %v7850_v10 = vld [vmem:[#allocation9 + $0x6e4] sm:$0xf]  ;;  %v7339_v45 = vld [vmem:[#allocation9 + $0x6f0] sm:$0xf0] }
 0x537   : > { %5647 = vmatpush.bf16.msra.mxu0 %v6994_v59  ;;  %v6910_v59 = vor.u32 %v7742_v35, %v6907_v47  ;;  %v6534_v9 = vor.u32 %v7647_v42, %v6531_v63  ;;  %v7882_v35 = vld [vmem:[#allocation9 + $0x7e4] sm:$0xf]  ;;  %v6718_v42 = vor.u32 %v7694_v62, %v6715_v33  ;;  %v7467_v63 = vld [vmem:[#allocation9 + $0x7f0] sm:$0xf0] }
 0x538   : > { %v7307_v50 = vld [vmem:[#allocation9 + $0x6b0] sm:$0xf0]  ;;  %v7806_v49 = vld [vmem:[#allocation9 + $0x584] sm:$0xf] }
 0x539   : > { %5466 = vmatpush.bf16.msra.mxu1 %v7226_v19  ;;  %5479 = vmatpush.bf16.msra.mxu2 %v7354_v58  ;;  %v7643_v19 = vld [vmem:[#allocation9 + $0x6c] sm:$0xf]  ;;  %v6515_v58 = vld [vmem:[#allocation9 + $0x78] sm:$0xf0]  ;;  %v7163_v31 = vld [vmem:[#allocation9 + $0x590] sm:$0xf0] }
 0x53a   : > { %5492 = vmatpush.bf16.msrb.mxu3 %v6462_v51  ;;  %v6619_v51 = vld [vmem:[#allocation9 + $0x150] sm:$0xf0]  ;;  %v6518_v46 = vor.u32 %v7643_v19, %v6515_v58  ;;  %v7846_v19 = vld [vmem:[#allocation9 + $0x6c4] sm:$0xf]  ;;  %v7166_v62 = vor.u32 %v7806_v49, %v7163_v31  ;;  %v6979_v49 = vld [vmem:[#allocation9 + $0x418] sm:$0xf0] }
 0x53b   : > { %5648 = vmatpush.bf16.msra.mxu0 %v6978_v29  ;;  %v6747_v29 = vld [vmem:[#allocation9 + $0x250] sm:$0xf0]  ;;  %v7838_v11 = vld [vmem:[#allocation9 + $0x684] sm:$0xf]  ;;  %v6705_v31 = vld [vmem:[#allocation9 + $0x1e8] sm:$0xf] }
 0x53c   : > { %5467 = vmatmul.bf16.vlgmr.msra.gmra.mxu1 %v9556_v41  ;;  %5480 = vmatmul.bf16.vlgmr.msra.gmra.mxu2 %v9558_v25  ;;  %v7323_v58 = vld [vmem:[#allocation9 + $0x6d0] sm:$0xf0]  ;;  %v7802_v33 = vld [vmem:[#allocation9 + $0x564] sm:$0xf] }
 0x53d   : > { %5498 = vmatpush.bf16.msrb.mxu1 %v6702_v60  ;;  %5511 = vmatpush.bf16.msrb.mxu2 %v6830_v16  ;;  %v6894_v60 = vor.u32 %v7738_v37, %v6891_v1  ;;  %v7734_v16 = vld [vmem:[#allocation9 + $0x344] sm:$0xf]  ;;  %v7470_v37 = vor.u32 %v7882_v35, %v7467_v63  ;;  %v7291_v23 = vld [vmem:[#allocation9 + $0x690] sm:$0xf0] }
 0x53e   : > { %5524 = vmatpush.bf16.msra.mxu3 %v6958_v17  ;;  %5649 = vmatmul.bf16.vlgmr.msra.gmra.mxu0 %v9542_v39  ;;  %v6622_v17 = vor.u32 %v7670_v8, %v6619_v51  ;;  %v6878_v4 = vor.u32 %v7734_v16, %v6875_v6  ;;  %v7783_v8 = vld [vmem:[#allocation9 + $0x4cc] sm:$0xf]  ;;  %v7075_v51 = vld [vmem:[#allocation9 + $0x4d8] sm:$0xf0]  ;;  %v7275_v7 = vld [vmem:[#allocation9 + $0x670] sm:$0xf0] }
 0x53f   : > { %5693 = vmatpush.bf16.msrb.mxu0 %v6582_v52  ;;  %5493 = vmatmul.bf16.vlgmr.msrb.gmra.mxu3 %v9536_v5  ;;  %v6750_v52 = vor.u32 %v7702_v36, %v6747_v29  ;;  %v7810_v36 = vld [vmem:[#allocation9 + $0x5a4] sm:$0xf]  ;;  %v7179_v29 = vld [vmem:[#allocation9 + $0x5b0] sm:$0xf0]  ;;  %v7078_v6 = vor.u32 %v7783_v8, %v7075_v51 }
 0x540   : > { %v7866_v61 = vld [vmem:[#allocation9 + $0x764] sm:$0xf]  ;;  %v7243_v8 = vld [vmem:[#allocation9 + $0x630] sm:$0xf0] }
 0x541   : > { %5499 = vmatpush.bf16.msrb.mxu1 %v6686_v43  ;;  %5512 = vmatpush.bf16.msrb.mxu2 %v6814_v3  ;;  %v7730_v43 = vld [vmem:[#allocation9 + $0x324] sm:$0xf]  ;;  %v6859_v3 = vld [vmem:[#allocation9 + $0x330] sm:$0xf0] }
 0x542   : > { %5525 = vmatpush.bf16.msra.mxu3 %v6942_v21  ;;  %v7662_v21 = vld [vmem:[#allocation9 + $0x104] sm:$0xf]  ;;  %v6862_v30 = vor.u32 %v7730_v43, %v6859_v3 }
 0x543   : > { %5694 = vmatpush.bf16.msrb.mxu0 %v6566_v28  ;;  %v6606_v28 = vor.u32 %v7666_v40, %v6603_v56  ;;  %v6590_v47 = vor.u32 %v7662_v21, %v6587_v2  ;;  %v7779_v40 = vld [vmem:[#allocation9 + $0x4ac] sm:$0xf]  ;;  %v7059_v56 = vld [vmem:[#allocation9 + $0x4b8] sm:$0xf0]  ;;  %v7870_v21 = vld [vmem:[#allocation9 + $0x784] sm:$0xf] }
 0x544   : > { %v7062_v3 = vor.u32 %v7779_v40, %v7059_v56  ;;  %v7043_v2 = vld [vmem:[#allocation9 + $0x498] sm:$0xf0]  ;;  %v7858_v51 = vld [vmem:[#allocation9 + $0x724] sm:$0xf]  ;;  %v7227_v40 = vld [vmem:[#allocation9 + $0x610] sm:$0xf0] }
 0x545   : > { %5500 = vmatpush.bf16.msrb.mxu1 %v6670_v22  ;;  %5513 = vmatpush.bf16.msrb.mxu2 %v6798_v57  ;;  %v7726_v22 = vld [vmem:[#allocation9 + $0x304] sm:$0xf]  ;;  %v6843_v57 = vld [vmem:[#allocation9 + $0x310] sm:$0xf0] }
 0x546   : > { %5526 = vmatpush.bf16.msra.mxu3 %v6926_v44  ;;  %v7818_v44 = vld [vmem:[#allocation9 + $0x5e4] sm:$0xf]  ;;  %v6846_v54 = vor.u32 %v7726_v22, %v6843_v57 }
 0x547   : > { %5695 = vmatpush.bf16.msrb.mxu0 %v6550_v14  ;;  %v7211_v14 = vld [vmem:[#allocation9 + $0x5f0] sm:$0xf0]  ;;  %v7834_v57 = vld [vmem:[#allocation9 + $0x664] sm:$0xf] }
 0x548   : > { %v7278_v35 = vor.u32 %v7834_v57, %v7275_v7  ;;  %v7854_v56 = vld [vmem:[#allocation9 + $0x704] sm:$0xf]  ;;  %v6817_v57 = vld [vmem:[#allocation9 + $0x2c8] sm:$0xf]  ;;  %v7721_v7 = vld [vmem:[#allocation9 + $0x2d4] sm:$0xf0] }
 0x549   : > { %5501 = vmatpush.bf16.msrb.mxu1 %v6654_v32  ;;  %5514 = vmatpush.bf16.msrb.mxu2 %v6782_v53  ;;  %v7787_v32 = vld [vmem:[#allocation9 + $0x4ec] sm:$0xf]  ;;  %v7091_v53 = vld [vmem:[#allocation9 + $0x4f8] sm:$0xf0] }
 0x54a   : > { %5527 = vmatpush.bf16.msra.mxu3 %v6910_v59  ;;  %v7214_v59 = vor.u32 %v7818_v44, %v7211_v14  ;;  %v7094_v1 = vor.u32 %v7787_v32, %v7091_v53  ;;  %v7403_v44 = vld [vmem:[#allocation9 + $0x770] sm:$0xf0]  ;;  %v7771_v14 = vld [vmem:[#allocation9 + $0x46c] sm:$0xf]  ;;  %v7830_v53 = vld [vmem:[#allocation9 + $0x644] sm:$0xf] }
 0x54b   : > { %5696 = vmatpush.bf16.msrb.mxu0 %v6534_v9  ;;  %v7342_v9 = vor.u32 %v7850_v10, %v7339_v45  ;;  %v7027_v10 = vld [vmem:[#allocation9 + $0x478] sm:$0xf0]  ;;  %v7406_v63 = vor.u32 %v7866_v61, %v7403_v44  ;;  %v6945_v61 = vld [vmem:[#allocation9 + $0x3c8] sm:$0xf]  ;;  %v7753_v44 = vld [vmem:[#allocation9 + $0x3d4] sm:$0xf0] }
 0x54c   : > { %v7030_v32 = vor.u32 %v7771_v14, %v7027_v10  ;;  %v6818_v10 = vor.u32 %v7721_v7, %v6817_v57  ;;  %v7729_v57 = vld [vmem:[#allocation9 + $0x314] sm:$0xf0]  ;;  %v7217_v7 = vld [vmem:[#allocation9 + $0x5e8] sm:$0xf] }
 0x54d   : > { %5502 = vmatpush.bf16.msrb.mxu1 %v6638_v48  ;;  %5515 = vmatpush.bf16.msrb.mxu2 %v6766_v26  ;;  %v7878_v48 = vld [vmem:[#allocation9 + $0x7c4] sm:$0xf]  ;;  %v7451_v26 = vld [vmem:[#allocation9 + $0x7d0] sm:$0xf0] }
 0x54e   : > { %5528 = vmatpush.bf16.msra.mxu3 %v6894_v60  ;;  %v7198_v60 = vor.u32 %v7814_v34, %v7195_v27  ;;  %v7454_v16 = vor.u32 %v7878_v48, %v7451_v26  ;;  %v7011_v34 = vld [vmem:[#allocation9 + $0x458] sm:$0xf0]  ;;  %v7826_v26 = vld [vmem:[#allocation9 + $0x624] sm:$0xf] }
 0x54f   : > { %5697 = vmatpush.bf16.msrb.mxu0 %v6518_v46  ;;  %v7326_v46 = vor.u32 %v7846_v19, %v7323_v58  ;;  %v7115_v19 = vld [vmem:[#allocation9 + $0x530] sm:$0xf0] }
 0x551   : > { %5503 = vmatpush.bf16.msrb.mxu1 %v6622_v17  ;;  %5516 = vmatpush.bf16.msrb.mxu2 %v6750_v52  ;;  %v7874_v17 = vld [vmem:[#allocation9 + $0x7a4] sm:$0xf]  ;;  %v7435_v52 = vld [vmem:[#allocation9 + $0x7b0] sm:$0xf0] }
 0x552   : > { %5529 = vmatpush.bf16.msra.mxu3 %v6878_v4  ;;  %v7182_v4 = vor.u32 %v7810_v36, %v7179_v29  ;;  %v7438_v43 = vor.u32 %v7874_v17, %v7435_v52  ;;  %v6995_v36 = vld [vmem:[#allocation9 + $0x438] sm:$0xf0] }
 0x553   : > { %5698 = vmatpush.bf16.msrb.mxu0 %v6502_v55  ;;  %v7310_v55 = vor.u32 %v7842_v15, %v7307_v50  ;;  %v7099_v15 = vld [vmem:[#allocation9 + $0x510] sm:$0xf0]  ;;  %v7822_v50 = vld [vmem:[#allocation9 + $0x604] sm:$0xf] }
 0x555   : > { %5504 = vmatpush.bf16.msrb.mxu1 %v6606_v28  ;;  %5517 = vmatpush.bf16.msrb.mxu2 %v6734_v18  ;;  %v7419_v28 = vld [vmem:[#allocation9 + $0x790] sm:$0xf0]  ;;  %v7775_v18 = vld [vmem:[#allocation9 + $0x48c] sm:$0xf] }
 0x556   : > { %5530 = vmatpush.bf16.msra.mxu3 %v6862_v30  ;;  %v7147_v30 = vld [vmem:[#allocation9 + $0x570] sm:$0xf0]  ;;  %v7046_v22 = vor.u32 %v7775_v18, %v7043_v2  ;;  %v7757_v18 = vld [vmem:[#allocation9 + $0x3f4] sm:$0xf0] }
 0x557   : > { %5699 = vmatpush.bf16.msrb.mxu0 %v6486_v12  ;;  %v7422_v12 = vor.u32 %v7870_v21, %v7419_v28  ;;  %v7150_v45 = vor.u32 %v7802_v33, %v7147_v30  ;;  %v7230_v21 = vor.u32 %v7822_v50, %v7227_v40  ;;  %v6961_v28 = vld [vmem:[#allocation9 + $0x3e8] sm:$0xf]  ;;  %v7673_v50 = vld [vmem:[#allocation9 + $0x154] sm:$0xf0] }
 0x558   : > { %v6689_v30 = vld [vmem:[#allocation9 + $0x1c8] sm:$0xf] }
 0x559   : > { %5505 = vmatpush.bf16.msrb.mxu1 %v6590_v47  ;;  %5518 = vmatpush.bf16.msrb.mxu2 %v6718_v42  ;;  %v7798_v47 = vld [vmem:[#allocation9 + $0x544] sm:$0xf]  ;;  %v7131_v42 = vld [vmem:[#allocation9 + $0x550] sm:$0xf0]  ;;  %v6881_v40 = vld [vmem:[#allocation9 + $0x348] sm:$0xf] }
 0x55a   : > { %5531 = vmatpush.bf16.msra.mxu3 %v6846_v54  ;;  %v7259_v54 = vld [vmem:[#allocation9 + $0x650] sm:$0xf0]  ;;  %v7134_v27 = vor.u32 %v7798_v47, %v7131_v42  ;;  %v7685_v47 = vld [vmem:[#allocation9 + $0x1b4] sm:$0xf0]  ;;  %v6801_v42 = vld [vmem:[#allocation9 + $0x2a8] sm:$0xf] }
 0x55b   : > { %5700 = vmatpush.bf16.msrb.mxu0 %v6470_v0  ;;  %v7862_v0 = vld [vmem:[#allocation9 + $0x744] sm:$0xf] }
 0x55c   : > { %5506 = vmatmul.bf16.vlgmr.msrb.gmra.mxu1 %v9538_v38  ;;  %5519 = vmatmul.bf16.vlgmr.msrb.gmra.mxu2 %v9540_v13 }
 0x55d   : > { %5550 = vmatpush.bf16.msra.mxu1 %v7214_v59  ;;  %5563 = vmatpush.bf16.msra.mxu2 %v7342_v9  ;;  %v7387_v59 = vld [vmem:[#allocation9 + $0x750] sm:$0xf0]  ;;  %v7767_v9 = vld [vmem:[#allocation9 + $0x44c] sm:$0xf] }
 0x55e   : > { %5576 = vmatpush.bf16.msrb.mxu3 %v7470_v37  ;;  %5701 = vmatmul.bf16.vlgmr.msrb.gmra.mxu0 %v9536_v5  ;;  %v7294_v5 = vor.u32 %v7838_v11, %v7291_v23  ;;  %v7262_v37 = vor.u32 %v7830_v53, %v7259_v54  ;;  %v7390_v58 = vor.u32 %v7862_v0, %v7387_v59  ;;  %v7725_v11 = vld [vmem:[#allocation9 + $0x2f4] sm:$0xf0]  ;;  %v6657_v59 = vld [vmem:[#allocation9 + $0x188] sm:$0xf] }
 0x55f   : > { %5745 = vmatpush.bf16.msra.mxu0 %v7094_v1  ;;  %5532 = vmatmul.bf16.vlgmr.msra.gmra.mxu3 %v9548_v24  ;;  %v7794_v1 = vld [vmem:[#allocation9 + $0x524] sm:$0xf]  ;;  %v7014_v48 = vor.u32 %v7767_v9, %v7011_v34  ;;  %v7749_v53 = vld [vmem:[#allocation9 + $0x3b4] sm:$0xf0] }
 0x560   : > { %v7118_v29 = vor.u32 %v7794_v1, %v7115_v19  ;;  %v7681_v34 = vld [vmem:[#allocation9 + $0x194] sm:$0xf0]  ;;  %v6913_v1 = vld [vmem:[#allocation9 + $0x388] sm:$0xf] }
 0x561   : > { %5551 = vmatpush.bf16.msra.mxu1 %v7198_v60  ;;  %5564 = vmatpush.bf16.msra.mxu2 %v7326_v46  ;;  %v7371_v60 = vld [vmem:[#allocation9 + $0x730] sm:$0xf0]  ;;  %v7763_v46 = vld [vmem:[#allocation9 + $0x42c] sm:$0xf]  ;;  %v7745_v19 = vld [vmem:[#allocation9 + $0x394] sm:$0xf0] }
 0x562   : > { %5577 = vmatpush.bf16.msrb.mxu3 %v7454_v16  ;;  %v7246_v16 = vor.u32 %v7826_v26, %v7243_v8  ;;  %v7374_v17 = vor.u32 %v7858_v51, %v7371_v60  ;;  %v6998_v52 = vor.u32 %v7763_v46, %v6995_v36  ;;  %v6641_v26 = vld [vmem:[#allocation9 + $0x168] sm:$0xf]  ;;  %v6914_v8 = vor.u32 %v7745_v19, %v6913_v1  ;;  %v7709_v60 = vld [vmem:[#allocation9 + $0x274] sm:$0xf0] }
 0x563   : > { %5746 = vmatpush.bf16.msra.mxu0 %v7078_v6  ;;  %v7790_v6 = vld [vmem:[#allocation9 + $0x504] sm:$0xf]  ;;  %v6769_v51 = vld [vmem:[#allocation9 + $0x268] sm:$0xf]  ;;  %v7741_v36 = vld [vmem:[#allocation9 + $0x374] sm:$0xf0] }
 0x564   : > { %v7102_v23 = vor.u32 %v7790_v6, %v7099_v15  ;;  %v6897_v46 = vld [vmem:[#allocation9 + $0x368] sm:$0xf]  ;;  %v7891_v19 = vld [vmem:[%s9769_s15 + $0x28] sm:$0xff] }
 0x565   : > { %5552 = vmatpush.bf16.msra.mxu1 %v7182_v4  ;;  %5565 = vmatpush.bf16.msra.mxu2 %v7310_v55  ;;  %v7355_v4 = vld [vmem:[#allocation9 + $0x710] sm:$0xf0]  ;;  %v7759_v55 = vld [vmem:[#allocation9 + $0x40c] sm:$0xf]  ;;  %v6625_v6 = vld [vmem:[#allocation9 + $0x148] sm:$0xf]  ;;  %v6898_v15 = vor.u32 %v7741_v36, %v6897_v46 }
 0x566   : > { %5578 = vmatpush.bf16.msrb.mxu3 %v7438_v43  ;;  %v7693_v43 = vld [vmem:[#allocation9 + $0x1f4] sm:$0xf0]  ;;  %v7358_v2 = vor.u32 %v7854_v56, %v7355_v4  ;;  %v6626_v4 = vor.u32 %v7673_v50, %v6625_v6  ;;  %v7890_v36 = vld [vmem:[%s9769_s15 + $0x20] sm:$0xff]  ;;  %v7169_v50 = vld [vmem:[#allocation9 + $0x588] sm:$0xf] }
 0x567   : > { %5747 = vmatpush.bf16.msra.mxu0 %v7062_v3  ;;  %v6833_v3 = vld [vmem:[#allocation9 + $0x2e8] sm:$0xf]  ;;  %v7737_v56 = vld [vmem:[#allocation9 + $0x354] sm:$0xf0] }
 0x568   : > { %v6834_v33 = vor.u32 %v7725_v11, %v6833_v3  ;;  %v6737_v3 = vld [vmem:[#allocation9 + $0x228] sm:$0xf]  ;;  %v7701_v11 = vld [vmem:[#allocation9 + $0x234] sm:$0xf0] }
 0x569   : > { %5553 = vmatpush.bf16.msra.mxu1 %v7166_v62  ;;  %5566 = vmatpush.bf16.msra.mxu2 %v7294_v5  ;;  %v6982_v62 = vor.u32 %v7759_v55, %v6979_v49  ;;  %v6706_v5 = vor.u32 %v7693_v43, %v6705_v31  ;;  %v6609_v49 = vld [vmem:[#allocation9 + $0x128] sm:$0xf]  ;;  %v6882_v31 = vor.u32 %v7737_v56, %v6881_v40  ;;  %v7669_v43 = vld [vmem:[#allocation9 + $0x134] sm:$0xf0] }
 0x56a   : > { %5579 = vmatpush.bf16.msrb.mxu3 %v7422_v12  ;;  %v6962_v12 = vor.u32 %v7757_v18, %v6961_v28  ;;  %v7893_v28 = vld [vmem:[%s9769_s15 + $0x38] sm:$0xff]  ;;  %v7877_v46 = vld [vmem:[#allocation9 + $0x7b4] sm:$0xf0] }
 0x56b   : > { %5748 = vmatpush.bf16.msra.mxu0 %v7046_v22  ;;  %v7689_v22 = vld [vmem:[#allocation9 + $0x1d4] sm:$0xf0]  ;;  %v6593_v18 = vld [vmem:[#allocation9 + $0x108] sm:$0xf] }
 0x56c   : > { %v6690_v14 = vor.u32 %v7689_v22, %v6689_v30  ;;  %v7697_v30 = vld [vmem:[#allocation9 + $0x214] sm:$0xf0]  ;;  %v6849_v22 = vld [vmem:[#allocation9 + $0x308] sm:$0xf] }
 0x56d   : > { %5554 = vmatpush.bf16.msra.mxu1 %v7150_v45  ;;  %5567 = vmatpush.bf16.msra.mxu2 %v7278_v35  ;;  %v6673_v45 = vld [vmem:[#allocation9 + $0x1a8] sm:$0xf]  ;;  %v6946_v35 = vor.u32 %v7753_v44, %v6945_v61  ;;  %v7821_v61 = vld [vmem:[#allocation9 + $0x5f4] sm:$0xf0] }
 0x56e   : > { %5580 = vmatpush.bf16.msrb.mxu3 %v7406_v63  ;;  %v7717_v63 = vld [vmem:[#allocation9 + $0x2b4] sm:$0xf0]  ;;  %v6674_v54 = vor.u32 %v7685_v47, %v6673_v45  ;;  %v7345_v44 = vld [vmem:[#allocation9 + $0x6e8] sm:$0xf] }
 0x56f   : > { %5749 = vmatpush.bf16.msra.mxu0 %v7030_v32  ;;  %v6929_v32 = vld [vmem:[#allocation9 + $0x3a8] sm:$0xf]  ;;  %v6802_v0 = vor.u32 %v7717_v63, %v6801_v42  ;;  %v6850_v63 = vor.u32 %v7729_v57, %v6849_v22  ;;  %v7841_v40 = vld [vmem:[#allocation9 + $0x694] sm:$0xf0] }
 0x570   : > { %v6930_v9 = vor.u32 %v7749_v53, %v6929_v32  ;;  %v7473_v45 = vld [vmem:[#allocation9 + $0x7e8] sm:$0xf]  ;;  %v7218_v32 = vor.u32 %v7821_v61, %v7217_v7  ;;  %v7801_v61 = vld [vmem:[#allocation9 + $0x554] sm:$0xf0] }
 0x571   : > { %5555 = vmatpush.bf16.msra.mxu1 %v7134_v27  ;;  %5568 = vmatpush.bf16.msra.mxu2 %v7262_v37  ;;  %v6785_v27 = vld [vmem:[#allocation9 + $0x288] sm:$0xf]  ;;  %v7713_v37 = vld [vmem:[#allocation9 + $0x294] sm:$0xf0] }
 0x572   : > { %5581 = vmatpush.bf16.msrb.mxu3 %v7390_v58  ;;  %v6658_v58 = vor.u32 %v7681_v34, %v6657_v59  ;;  %v7817_v59 = vld [vmem:[#allocation9 + $0x5d4] sm:$0xf0]  ;;  %v7425_v56 = vld [vmem:[#allocation9 + $0x788] sm:$0xf] }
 0x573   : > { %5750 = vmatpush.bf16.msra.mxu0 %v7014_v48  ;;  %v6786_v48 = vor.u32 %v7713_v37, %v6785_v27  ;;  %v7849_v34 = vld [vmem:[#allocation9 + $0x6d4] sm:$0xf0]  ;;  %v7457_v27 = vld [vmem:[#allocation9 + $0x7c8] sm:$0xf] }
 0x574   : > { %v7881_v37 = vld [vmem:[#allocation9 + $0x7d4] sm:$0xf0]  ;;  %v7137_v7 = vld [vmem:[#allocation9 + $0x548] sm:$0xf] }
 0x575   : > { %5556 = vmatpush.bf16.msra.mxu1 %v7118_v29  ;;  %5569 = vmatpush.bf16.msra.mxu2 %v7246_v16  ;;  %v6770_v16 = vor.u32 %v7709_v60, %v6769_v51  ;;  %v7845_v51 = vld [vmem:[#allocation9 + $0x6b4] sm:$0xf0]  ;;  %v7441_v60 = vld [vmem:[#allocation9 + $0x7a8] sm:$0xf] }
 0x576   : > { %5582 = vmatpush.bf16.msrb.mxu3 %v7374_v17  ;;  %v6753_v17 = vld [vmem:[#allocation9 + $0x248] sm:$0xf] }
 0x577   : > { %5751 = vmatpush.bf16.msra.mxu0 %v6998_v52  ;;  %v7705_v52 = vld [vmem:[#allocation9 + $0x254] sm:$0xf0] }
 0x578   : > { %v6754_v55 = vor.u32 %v7705_v52, %v6753_v17  ;;  %v7809_v17 = vld [vmem:[#allocation9 + $0x594] sm:$0xf0]  ;;  %v7297_v52 = vld [vmem:[#allocation9 + $0x688] sm:$0xf] }
 0x579   : > { %5557 = vmatpush.bf16.msra.mxu1 %v7102_v23  ;;  %5570 = vmatpush.bf16.msra.mxu2 %v7230_v21  ;;  %v6865_v23 = vld [vmem:[#allocation9 + $0x328] sm:$0xf]  ;;  %v7733_v21 = vld [vmem:[#allocation9 + $0x334] sm:$0xf0] }
 0x57a   : > { %5583 = vmatpush.bf16.msrb.mxu3 %v7358_v2  ;;  %v6610_v2 = vor.u32 %v7669_v43, %v6609_v49  ;;  %v7889_v49 = vld [vmem:[%s9769_s15 + $0x18] sm:$0xff]  ;;  %v7298_v43 = vor.u32 %v7841_v40, %v7297_v52  ;;  %v6707_v52 = vld [vmem:[#allocation9 + $0x1f8] sm:$0xf0] }
 0x57b   : > { %5752 = vmatpush.bf16.msra.mxu0 %v6982_v62  ;;  %v6738_v62 = vor.u32 %v7701_v11, %v6737_v3  ;;  %v7153_v11 = vld [vmem:[#allocation9 + $0x568] sm:$0xf]  ;;  %v7723_v40 = vld [vmem:[#allocation9 + $0x2ec] sm:$0xf] }
 0x57c   : > { %5558 = vmatmul.bf16.vlgmr.msra.gmra.mxu1 %v9550_v20  ;;  %5571 = vmatmul.bf16.vlgmr.msra.gmra.mxu2 %v9556_v41 }
 0x57d   : > { %5602 = vmatpush.bf16.msrb.mxu1 %v6706_v5  ;;  %5615 = vmatpush.bf16.msrb.mxu2 %v6834_v33  ;;  %v7665_v5 = vld [vmem:[#allocation9 + $0x114] sm:$0xf0]  ;;  %v6721_v33 = vld [vmem:[#allocation9 + $0x208] sm:$0xf] }
 0x57e   : > { %5628 = vmatpush.bf16.msra.mxu3 %v6962_v12  ;;  %5753 = vmatmul.bf16.vlgmr.msra.gmra.mxu0 %v9542_v39  ;;  %v7677_v39 = vld [vmem:[#allocation9 + $0x174] sm:$0xf0]  ;;  %v6866_v12 = vor.u32 %v7733_v21, %v6865_v23  ;;  %v6594_v47 = vor.u32 %v7665_v5, %v6593_v18  ;;  %v6722_v42 = vor.u32 %v7697_v30, %v6721_v33  ;;  %v7281_v21 = vld [vmem:[#allocation9 + $0x668] sm:$0xf]  ;;  %v7888_v33 = vld [vmem:[%s9769_s15 + $0x10] sm:$0xff] }
 0x57f   : > { %5584 = vmatmul.bf16.vlgmr.msrb.gmra.mxu3 %v9558_v25  ;;  %v6642_v29 = vor.u32 %v7677_v39, %v6641_v26  ;;  %6065 = vmatpush.bf16.msrb.mxu0 %v7893_v28  ;;  %v7185_v26 = vld [vmem:[#allocation9 + $0x5a8] sm:$0xf]  ;;  %v7805_v23 = vld [vmem:[#allocation9 + $0x574] sm:$0xf0] }
 0x580   : > { %v7313_v39 = vld [vmem:[#allocation9 + $0x6a8] sm:$0xf]  ;;  %v7837_v18 = vld [vmem:[#allocation9 + $0x674] sm:$0xf0]  ;;  %v7154_v30 = vor.u32 %v7805_v23, %v7153_v11 }
 0x581   : > { %5603 = vmatpush.bf16.msrb.mxu1 %v6690_v14  ;;  %5616 = vmatpush.bf16.msrb.mxu2 %v6818_v10  ;;  %v7892_v14 = vld [vmem:[%s9769_s15 + $0x30] sm:$0xff]  ;;  %v7853_v10 = vld [vmem:[#allocation9 + $0x6f4] sm:$0xf0]  ;;  %v7314_v6 = vor.u32 %v7845_v51, %v7313_v39  ;;  %v7282_v22 = vor.u32 %v7837_v18, %v7281_v21  ;;  %v7105_v39 = vld [vmem:[#allocation9 + $0x508] sm:$0xf] }
 0x582   : > { %5629 = vmatpush.bf16.msra.mxu3 %v6946_v35  ;;  %v7885_v35 = vld [vmem:[#allocation9 + $0x7f4] sm:$0xf0]  ;;  %v7346_v53 = vor.u32 %v7853_v10, %v7345_v44  ;;  %v7265_v44 = vld [vmem:[#allocation9 + $0x648] sm:$0xf]  ;;  %v7687_v18 = vld [vmem:[#allocation9 + $0x1cc] sm:$0xf] }
 0x583   : > { %6066 = vmatpush.bf16.msrb.mxu0 %v7892_v14  ;;  %v7833_v14 = vld [vmem:[#allocation9 + $0x654] sm:$0xf0]  ;;  %v7393_v10 = vld [vmem:[#allocation9 + $0x748] sm:$0xf] }
 0x585   : > { %5604 = vmatpush.bf16.msrb.mxu1 %v6674_v54  ;;  %5617 = vmatpush.bf16.msrb.mxu2 %v6802_v0  ;;  %v7474_v54 = vor.u32 %v7885_v35, %v7473_v45  ;;  %v7201_v0 = vld [vmem:[#allocation9 + $0x5c8] sm:$0xf]  ;;  %v7865_v45 = vld [vmem:[#allocation9 + $0x754] sm:$0xf0] }
 0x586   : > { %5630 = vmatpush.bf16.msra.mxu3 %v6930_v9  ;;  %v7329_v9 = vld [vmem:[#allocation9 + $0x6c8] sm:$0xf]  ;;  %v7202_v1 = vor.u32 %v7817_v59, %v7201_v0  ;;  %v7887_v59 = vld [vmem:[%s9769_s15 + $0x8] sm:$0xff] }
 0x587   : > { %6067 = vmatpush.bf16.msrb.mxu0 %v7891_v19  ;;  %v7249_v0 = vld [vmem:[#allocation9 + $0x628] sm:$0xf]  ;;  %v7886_v19 = vld [vmem:[%s9769_s15] sm:$0xff] }
 0x589   : > { %5605 = vmatpush.bf16.msrb.mxu1 %v6658_v58  ;;  %5618 = vmatpush.bf16.msrb.mxu2 %v6786_v48  ;;  %v7330_v58 = vor.u32 %v7849_v34, %v7329_v9  ;;  %v7458_v48 = vor.u32 %v7881_v37, %v7457_v27  ;;  %v7829_v34 = vld [vmem:[#allocation9 + $0x634] sm:$0xf0]  ;;  %v7377_v27 = vld [vmem:[#allocation9 + $0x728] sm:$0xf] }
 0x58a   : > { %5631 = vmatpush.bf16.msra.mxu3 %v6914_v8  ;;  %v7813_v8 = vld [vmem:[#allocation9 + $0x5b4] sm:$0xf0]  ;;  %v7250_v51 = vor.u32 %v7829_v34, %v7249_v0  ;;  %v7679_v34 = vld [vmem:[#allocation9 + $0x18c] sm:$0xf] }
 0x58b   : > { %6068 = vmatpush.bf16.msrb.mxu0 %v7890_v36  ;;  %v7861_v37 = vld [vmem:[#allocation9 + $0x734] sm:$0xf0]  ;;  %v7233_v36 = vld [vmem:[#allocation9 + $0x608] sm:$0xf] }
 0x58d   : > { %5606 = vmatpush.bf16.msrb.mxu1 %v6642_v29  ;;  %5619 = vmatpush.bf16.msrb.mxu2 %v6770_v16  ;;  %v7186_v29 = vor.u32 %v7813_v8, %v7185_v26 }
 0x58e   : > { %5632 = vmatpush.bf16.msra.mxu3 %v6898_v15  ;;  %v7442_v15 = vor.u32 %v7877_v46, %v7441_v60  ;;  %v7378_v60 = vor.u32 %v7861_v37, %v7377_v27  ;;  %v7793_v46 = vld [vmem:[#allocation9 + $0x514] sm:$0xf0] }
 0x58f   : > { %6069 = vmatpush.bf16.msrb.mxu0 %v7889_v49  ;;  %v7106_v49 = vor.u32 %v7793_v46, %v7105_v39  ;;  %v7743_v39 = vld [vmem:[#allocation9 + $0x38c] sm:$0xf] }
 0x591   : > { %5607 = vmatpush.bf16.msrb.mxu1 %v6626_v4  ;;  %5620 = vmatpush.bf16.msrb.mxu2 %v6754_v55  ;;  %v7873_v4 = vld [vmem:[#allocation9 + $0x794] sm:$0xf0] }
 0x592   : > { %5633 = vmatpush.bf16.msra.mxu3 %v6882_v31  ;;  %v7170_v31 = vor.u32 %v7809_v17, %v7169_v50  ;;  %v7426_v3 = vor.u32 %v7873_v4, %v7425_v56  ;;  %v7691_v50 = vld [vmem:[#allocation9 + $0x1ec] sm:$0xf]  ;;  %v6835_v56 = vld [vmem:[#allocation9 + $0x2f8] sm:$0xf0] }
 0x593   : > { %6070 = vmatpush.bf16.msrb.mxu0 %v7888_v33  ;;  %v6710_v23 = vor.u32 %v7691_v50, %v6707_v52  ;;  %v6838_v21 = vor.u32 %v7723_v40, %v6835_v56  ;;  %v7707_v50 = vld [vmem:[#allocation9 + $0x26c] sm:$0xf]  ;;  %v6899_v40 = vld [vmem:[#allocation9 + $0x378] sm:$0xf0] }
 0x594   : > { %v7739_v52 = vld [vmem:[#allocation9 + $0x36c] sm:$0xf] }
 0x595   : > { %5608 = vmatpush.bf16.msrb.mxu1 %v6610_v2  ;;  %5621 = vmatpush.bf16.msrb.mxu2 %v6738_v62  ;;  %v7409_v2 = vld [vmem:[#allocation9 + $0x768] sm:$0xf]  ;;  %v7869_v62 = vld [vmem:[#allocation9 + $0x774] sm:$0xf0] }
 0x596   : > { %5634 = vmatpush.bf16.msra.mxu3 %v6866_v12  ;;  %v7410_v57 = vor.u32 %v7869_v62, %v7409_v2 }
 0x597   : > { %6071 = vmatpush.bf16.msrb.mxu0 %v7887_v59 }
 0x598   : > { %v9587_v16 = vpop.f32.mrf.mxu1 }
 0x599   : > { %5609 = vmatpush.bf16.msrb.mxu1 %v6594_v47  ;;  %5622 = vmatpush.bf16.msrb.mxu2 %v6722_v42  ;;  %v9604_v47 = vld [vmem:[%s9768_s14] sm:$0xf]  ;;  %v7138_v42 = vor.u32 %v7801_v61, %v7137_v7  ;;  %v7751_v61 = vld [vmem:[#allocation9 + $0x3cc] sm:$0xf] }
 0x59a   : > { %5635 = vmatpush.bf16.msra.mxu3 %v6850_v63  ;;  %v7121_v63 = vld [vmem:[#allocation9 + $0x528] sm:$0xf]  ;;  %v4095_v8 = vperm.slane %v9604_v47, 2 }
 0x59b   : > { %v9589_v55 = vpop.f32.mrf.mxu0  ;;  %6072 = vmatpush.bf16.msrb.mxu0 %v7886_v19 }
 0x59c   : > { %5610 = vmatmul.bf16.vlgmr.msrb.gmra.mxu1 %v9538_v38  ;;  %5623 = vmatmul.bf16.vlgmr.msrb.gmra.mxu2 %v9540_v13 }
 0x59d   : > { %5654 = vmatpush.bf16.msra.mxu1 %v7218_v32  ;;  %5667 = vmatpush.bf16.msra.mxu2 %v7346_v53  ;;  %v7266_v32 = vor.u32 %v7833_v14, %v7265_v44  ;;  %v7394_v53 = vor.u32 %v7865_v45, %v7393_v10  ;;  %v6947_v44 = vld [vmem:[#allocation9 + $0x3d8] sm:$0xf0] }
 0x59e   : > { %5680 = vmatpush.bf16.msrb.mxu3 %v7474_v54  ;;  %v9594_v28 = vpop.f32.mrf.mxu2  ;;  %v7797_v54 = vld [vmem:[#allocation9 + $0x534] sm:$0xf0] }
 0x59f   : > { %5636 = vmatmul.bf16.vlgmr.msra.gmra.mxu3 %v9548_v24  ;;  %v9596_v5 = vpop.f32.mrf.mxu3 }
 0x5a0   : > { %v5392_v12 = vpop.f32.mrf.mxu1 }
 0x5a1   : > { %5655 = vmatpush.bf16.msra.mxu1 %v7202_v1  ;;  %5668 = vmatpush.bf16.msra.mxu2 %v7330_v58  ;;  %v4093_v58 = vperm.slane %v9604_v47, 0  ;;  %v6691_v12 = vld [vmem:[#allocation9 + $0x1d8] sm:$0xf0] }
 0x5a2   : > { %5681 = vmatpush.bf16.msrb.mxu3 %v7458_v48  ;;  %v7122_v48 = vor.u32 %v7797_v54, %v7121_v63  ;;  %v6694_v10 = vor.u32 %v7687_v18, %v6691_v12  ;;  %v6675_v63 = vld [vmem:[#allocation9 + $0x1b8] sm:$0xf0] }
 0x5a3   : > { %v5548_v35 = vpop.f32.mrf.mxu0  ;;  %v5391_v2 = vadd.f32 %v9587_v16, %v4093_v58  ;;  %v6931_v54 = vld [vmem:[#allocation9 + $0x3b8] sm:$0xf0] }
 0x5a4   : > { %v7683_v35 = vld [vmem:[#allocation9 + $0x1ac] sm:$0xf]  ;;  %v6659_v58 = vld [vmem:[#allocation9 + $0x198] sm:$0xf0] }
 0x5a5   : > { %5656 = vmatpush.bf16.msra.mxu1 %v7186_v29  ;;  %5669 = vmatpush.bf16.msra.mxu2 %v7314_v6  ;;  %v7825_v29 = vld [vmem:[#allocation9 + $0x614] sm:$0xf0]  ;;  %v7361_v6 = vld [vmem:[#allocation9 + $0x708] sm:$0xf]  ;;  %v5404_v14 = vadd.f32 %v9594_v28, %v5391_v2  ;;  %v7747_v28 = vld [vmem:[#allocation9 + $0x3ac] sm:$0xf]  ;;  %v6678_v59 = vor.u32 %v7683_v35, %v6675_v63  ;;  %v6662_v46 = vor.u32 %v7679_v34, %v6659_v58 }
 0x5a6   : > { %5682 = vmatpush.bf16.msrb.mxu3 %v7442_v15  ;;  %v5405_v9 = vpop.f32.mrf.mxu2  ;;  %v7857_v15 = vld [vmem:[#allocation9 + $0x714] sm:$0xf0]  ;;  %v6934_v37 = vor.u32 %v7747_v28, %v6931_v54  ;;  %v6755_v18 = vld [vmem:[#allocation9 + $0x258] sm:$0xf0]  ;;  %v7699_v35 = vld [vmem:[#allocation9 + $0x22c] sm:$0xf] }
 0x5a7   : > { %v5418_v1 = vpop.f32.mrf.mxu3  ;;  %v7362_v11 = vor.u32 %v7857_v15, %v7361_v6  ;;  %v5417_v0 = vadd.f32 %v9596_v5, %v5404_v14  ;;  %v6643_v15 = vld [vmem:[#allocation9 + $0x178] sm:$0xf0]  ;;  %v7663_v54 = vld [vmem:[#allocation9 + $0x10c] sm:$0xf] }
 0x5a8   : > { %v9613_v26 = vpop.f32.mrf.mxu1  ;;  %v6867_v63 = vld [vmem:[#allocation9 + $0x338] sm:$0xf0] }
 0x5a9   : > { %5657 = vmatpush.bf16.msra.mxu1 %v7170_v31  ;;  %5670 = vmatpush.bf16.msra.mxu2 %v7298_v43  ;;  %v7755_v31 = vld [vmem:[#allocation9 + $0x3ec] sm:$0xf]  ;;  %v6963_v43 = vld [vmem:[#allocation9 + $0x3f8] sm:$0xf0]  ;;  %v5430_v27 = vadd.f32 %v9613_v26, %v5417_v0 }
 0x5aa   : > { %5683 = vmatpush.bf16.msrb.mxu3 %v7426_v3  ;;  %v7234_v3 = vor.u32 %v7825_v29, %v7233_v36  ;;  %v6966_v62 = vor.u32 %v7755_v31, %v6963_v43  ;;  %v7675_v29 = vld [vmem:[#allocation9 + $0x16c] sm:$0xf]  ;;  %v6595_v0 = vld [vmem:[#allocation9 + $0x118] sm:$0xf0] }
 0x5ab   : > { %v5598_v17 = vpop.f32.mrf.mxu0  ;;  %v7671_v43 = vld [vmem:[#allocation9 + $0x14c] sm:$0xf]  ;;  %v6723_v34 = vld [vmem:[#allocation9 + $0x218] sm:$0xf0] }
 0x5ac   : > { %v9616_v4 = vadd.f32 %v5598_v17, %v4095_v8  ;;  %v6787_v8 = vld [vmem:[#allocation9 + $0x298] sm:$0xf0] }
 0x5ad   : > { %5658 = vmatpush.bf16.msra.mxu1 %v7154_v30  ;;  %5671 = vmatpush.bf16.msra.mxu2 %v7282_v22  ;;  %v7719_v22 = vld [vmem:[#allocation9 + $0x2cc] sm:$0xf]  ;;  %v6771_v17 = vld [vmem:[#allocation9 + $0x278] sm:$0xf0] }
 0x5ae   : > { %5684 = vmatpush.bf16.msrb.mxu3 %v7410_v57  ;;  %v6819_v57 = vld [vmem:[#allocation9 + $0x2d8] sm:$0xf0]  ;;  %v6774_v31 = vor.u32 %v7707_v50, %v6771_v17  ;;  %v7815_v50 = vld [vmem:[#allocation9 + $0x5cc] sm:$0xf] }
 0x5af   : > { %v5442_v33 = vpop.f32.mrf.mxu2  ;;  %v5455_v30 = vpop.f32.mrf.mxu3  ;;  %v6822_v45 = vor.u32 %v7719_v22, %v6819_v57  ;;  %v7219_v58 = vld [vmem:[#allocation9 + $0x5f8] sm:$0xf0] }
 0x5b0   : > { %v5431_v7 = vpop.f32.mrf.mxu1  ;;  %v7203_v17 = vld [vmem:[#allocation9 + $0x5d8] sm:$0xf0] }
 0x5b1   : > { %5659 = vmatpush.bf16.msra.mxu1 %v7138_v42  ;;  %5672 = vmatpush.bf16.msra.mxu2 %v7266_v32  ;;  %v6950_v42 = vor.u32 %v7751_v61, %v6947_v44  ;;  %v7715_v32 = vld [vmem:[#allocation9 + $0x2ac] sm:$0xf]  ;;  %v6611_v44 = vld [vmem:[#allocation9 + $0x138] sm:$0xf0] }
 0x5b2   : > { %5685 = vmatpush.bf16.msrb.mxu3 %v7394_v53  ;;  %v6803_v53 = vld [vmem:[#allocation9 + $0x2b8] sm:$0xf0]  ;;  %v7667_v61 = vld [vmem:[#allocation9 + $0x12c] sm:$0xf] }
 0x5b3   : > { %v5600_v16 = vpop.f32.mrf.mxu0  ;;  %v6806_v9 = vor.u32 %v7715_v32, %v6803_v53  ;;  %v6614_v53 = vor.u32 %v7667_v61, %v6611_v44  ;;  %v7839_v61 = vld [vmem:[#allocation9 + $0x68c] sm:$0xf]  ;;  %v7299_v44 = vld [vmem:[#allocation9 + $0x698] sm:$0xf0] }
 0x5b4   : > { %v6739_v16 = vld [vmem:[#allocation9 + $0x238] sm:$0xf0] }
 0x5b5   : > { %5660 = vmatpush.bf16.msra.mxu1 %v7122_v48  ;;  %5673 = vmatpush.bf16.msra.mxu2 %v7250_v51  ;;  %v7711_v48 = vld [vmem:[#allocation9 + $0x28c] sm:$0xf]  ;;  %v6915_v51 = vld [vmem:[#allocation9 + $0x398] sm:$0xf0]  ;;  %v6742_v28 = vor.u32 %v7699_v35, %v6739_v16  ;;  %v7302_v35 = vor.u32 %v7839_v61, %v7299_v44  ;;  %v7900_v44 = vld [vmem:[%s9769_s15 + $0x70] sm:$0xff] }
 0x5b6   : > { %5686 = vmatpush.bf16.msrb.mxu3 %v7378_v60  ;;  %v5443_v60 = vadd.f32 %v5442_v33, %v5430_v27  ;;  %v6790_v36 = vor.u32 %v7711_v48, %v6787_v8  ;;  %v6918_v26 = vor.u32 %v7743_v39, %v6915_v51  ;;  %v6883_v33 = vld [vmem:[#allocation9 + $0x358] sm:$0xf0]  ;;  %v7727_v27 = vld [vmem:[#allocation9 + $0x30c] sm:$0xf] }
 0x5b7   : > { %v5444_v1 = vpop.f32.mrf.mxu2  ;;  %v5457_v19 = vpop.f32.mrf.mxu3  ;;  %v7851_v48 = vld [vmem:[#allocation9 + $0x6ec] sm:$0xf]  ;;  %v7347_v39 = vld [vmem:[#allocation9 + $0x6f8] sm:$0xf0] }
 0x5b8   : > { %v5456_v56 = vadd.f32 %v5455_v30, %v5443_v60  ;;  %v7819_v19 = vld [vmem:[#allocation9 + $0x5ec] sm:$0xf]  ;;  %v7475_v60 = vld [vmem:[#allocation9 + $0x7f8] sm:$0xf0] }
 0x5b9   : > { %5661 = vmatpush.bf16.msra.mxu1 %v7106_v49  ;;  %5674 = vmatpush.bf16.msra.mxu2 %v7234_v3  ;;  %v5468_v5 = vpop.f32.mrf.mxu1  ;;  %v6646_v49 = vor.u32 %v7675_v29, %v6643_v15  ;;  %v7883_v51 = vld [vmem:[#allocation9 + $0x7ec] sm:$0xf]  ;;  %v7222_v29 = vor.u32 %v7819_v19, %v7219_v58 }
 0x5ba   : > { %5687 = vmatpush.bf16.msrb.mxu3 %v7362_v11  ;;  %v5469_v3 = vadd.f32 %v5468_v5, %v5456_v56  ;;  %v6902_v11 = vor.u32 %v7739_v52, %v6899_v40  ;;  %v6598_v5 = vor.u32 %v7663_v54, %v6595_v0  ;;  %v7478_v15 = vor.u32 %v7883_v51, %v7475_v60  ;;  %v7847_v52 = vld [vmem:[#allocation9 + $0x6cc] sm:$0xf]  ;;  %v7331_v40 = vld [vmem:[#allocation9 + $0x6d8] sm:$0xf0] }
 0x5bb   : > { %v9625_v6 = vpop.f32.mrf.mxu0  ;;  %v7879_v56 = vld [vmem:[#allocation9 + $0x7cc] sm:$0xf]  ;;  %v7411_v0 = vld [vmem:[#allocation9 + $0x778] sm:$0xf0] }
 0x5bc   : > { %5662 = vmatmul.bf16.vlgmr.msra.gmra.mxu1 %v9550_v20  ;;  %5675 = vmatmul.bf16.vlgmr.msra.gmra.mxu2 %v9556_v41  ;;  %v7867_v54 = vld [vmem:[#allocation9 + $0x76c] sm:$0xf] }
 0x5bd   : > { %5706 = vmatpush.bf16.msrb.mxu1 %v6710_v23  ;;  %5719 = vmatpush.bf16.msrb.mxu2 %v6838_v21  ;;  %v6627_v23 = vld [vmem:[#allocation9 + $0x158] sm:$0xf0]  ;;  %v7703_v21 = vld [vmem:[#allocation9 + $0x24c] sm:$0xf] }
 0x5be   : > { %5732 = vmatpush.bf16.msra.mxu3 %v6966_v62  ;;  %v7735_v62 = vld [vmem:[#allocation9 + $0x34c] sm:$0xf]  ;;  %v6630_v57 = vor.u32 %v7671_v43, %v6627_v23  ;;  %v6758_v7 = vor.u32 %v7703_v21, %v6755_v18  ;;  %v7334_v43 = vor.u32 %v7847_v52, %v7331_v40  ;;  %v7187_v23 = vld [vmem:[#allocation9 + $0x5b8] sm:$0xf0] }
 0x5bf   : > { %5688 = vmatmul.bf16.vlgmr.msrb.gmra.mxu3 %v9558_v25  ;;  %v5481_v2 = vpop.f32.mrf.mxu2  ;;  %v7843_v21 = vld [vmem:[#allocation9 + $0x6ac] sm:$0xf]  ;;  %v7315_v18 = vld [vmem:[#allocation9 + $0x6b8] sm:$0xf0] }
 0x5c0   : > { %v5482_v12 = vadd.f32 %v5481_v2, %v5469_v3  ;;  %v7875_v2 = vld [vmem:[#allocation9 + $0x7ac] sm:$0xf]  ;;  %v7251_v40 = vld [vmem:[#allocation9 + $0x638] sm:$0xf0] }
 0x5c1   : > { %5707 = vmatpush.bf16.msrb.mxu1 %v6694_v10  ;;  %5720 = vmatpush.bf16.msrb.mxu2 %v6822_v45  ;;  %v5470_v30 = vpop.f32.mrf.mxu1  ;;  %v6886_v45 = vor.u32 %v7735_v62, %v6883_v33  ;;  %v7443_v62 = vld [vmem:[#allocation9 + $0x7b8] sm:$0xf0]  ;;  %v7831_v19 = vld [vmem:[#allocation9 + $0x64c] sm:$0xf] }
 0x5c2   : > { %5733 = vmatpush.bf16.msra.mxu3 %v6950_v42  ;;  %v9627_v22 = vpop.f32.mrf.mxu3  ;;  %v5797_v14 = vmax.f32 %v5482_v12, 0.0  ;;  %v7731_v42 = vld [vmem:[#allocation9 + $0x32c] sm:$0xf]  ;;  %v7318_v12 = vor.u32 %v7843_v21, %v7315_v18  ;;  %v7446_v30 = vor.u32 %v7875_v2, %v7443_v62  ;;  %v7107_v21 = vld [vmem:[#allocation9 + $0x518] sm:$0xf0] }
 0x5c3   : > { %v5652_v10 = vpop.f32.mrf.mxu0  ;;  %v7823_v18 = vld [vmem:[#allocation9 + $0x60c] sm:$0xf]  ;;  %v7235_v2 = vld [vmem:[#allocation9 + $0x618] sm:$0xf0] }
 0x5c4   : > { %v5801_v32 = vpack.c.bf16 %v5797_v14, %v5797_v14  ;;  %v7871_v14 = vld [vmem:[#allocation9 + $0x78c] sm:$0xf]  ;;  %v7427_v10 = vld [vmem:[#allocation9 + $0x798] sm:$0xf0] }
 0x5c5   : > { %5708 = vmatpush.bf16.msrb.mxu1 %v6678_v59  ;;  %5721 = vmatpush.bf16.msrb.mxu2 %v6806_v9  ;;  %v7695_v59 = vld [vmem:[#allocation9 + $0x20c] sm:$0xf]  ;;  %v6870_v9 = vor.u32 %v7731_v42, %v6867_v63  ;;  %v7430_v16 = vor.u32 %v7871_v14, %v7427_v10  ;;  %v7155_v63 = vld [vmem:[#allocation9 + $0x578] sm:$0xf0] }
 0x5c6   : > { %5734 = vmatpush.bf16.msra.mxu3 %v6934_v37  ;;  %6073 = vmatmul.bf16.vlgmr.msrb.gmra.mxu0 %v5801_v32  ;;  %v6851_v37 = vld [vmem:[#allocation9 + $0x318] sm:$0xf0]  ;;  %v7803_v42 = vld [vmem:[#allocation9 + $0x56c] sm:$0xf] }
 0x5c7   : > { %v5483_v1 = vpop.f32.mrf.mxu2  ;;  %v7835_v32 = vld [vmem:[#allocation9 + $0x66c] sm:$0xf]  ;;  %v7899_v14 = vld [vmem:[%s9769_s15 + $0x68] sm:$0xff] }
 0x5c8   : > { %v7139_v1 = vld [vmem:[#allocation9 + $0x558] sm:$0xf0]  ;;  %v7855_v62 = vld [vmem:[#allocation9 + $0x70c] sm:$0xf] }
 0x5c9   : > { %5709 = vmatpush.bf16.msrb.mxu1 %v6662_v46  ;;  %5722 = vmatpush.bf16.msrb.mxu2 %v6790_v36  ;;  %v6726_v46 = vor.u32 %v7695_v59, %v6723_v34  ;;  %v6854_v36 = vor.u32 %v7727_v27, %v6851_v37  ;;  %v7414_v27 = vor.u32 %v7867_v54, %v7411_v0  ;;  %v7799_v37 = vld [vmem:[#allocation9 + $0x54c] sm:$0xf] }
 0x5ca   : > { %5735 = vmatpush.bf16.msra.mxu3 %v6918_v26  ;;  %v5496_v8 = vpop.f32.mrf.mxu3  ;;  %v7350_v26 = vor.u32 %v7851_v48, %v7347_v39  ;;  %v7267_v48 = vld [vmem:[#allocation9 + $0x658] sm:$0xf0] }
 0x5cb   : > { %v7863_v8 = vld [vmem:[#allocation9 + $0x74c] sm:$0xf]  ;;  %v7395_v39 = vld [vmem:[#allocation9 + $0x758] sm:$0xf0] }
 0x5cd   : > { %5710 = vmatpush.bf16.msrb.mxu1 %v6646_v49  ;;  %5723 = vmatpush.bf16.msrb.mxu2 %v6774_v31  ;;  %v7459_v49 = vld [vmem:[#allocation9 + $0x7d8] sm:$0xf0]  ;;  %v7206_v31 = vor.u32 %v7815_v50, %v7203_v17  ;;  %v7827_v50 = vld [vmem:[#allocation9 + $0x62c] sm:$0xf] }
 0x5ce   : > { %5736 = vmatpush.bf16.msra.mxu3 %v6902_v11  ;;  %v7462_v3 = vor.u32 %v7879_v56, %v7459_v49  ;;  %v7811_v11 = vld [vmem:[#allocation9 + $0x5ac] sm:$0xf]  ;;  %v7379_v49 = vld [vmem:[#allocation9 + $0x738] sm:$0xf0] }
 0x5cf   : > { %v7190_v33 = vor.u32 %v7811_v11, %v7187_v23  ;;  %v7859_v56 = vld [vmem:[#allocation9 + $0x72c] sm:$0xf] }
 0x5d0   : > { %v7382_v11 = vor.u32 %v7859_v56, %v7379_v49  ;;  %v7791_v23 = vld [vmem:[#allocation9 + $0x50c] sm:$0xf] }
 0x5d1   : > { %5711 = vmatpush.bf16.msrb.mxu1 %v6630_v57  ;;  %5724 = vmatpush.bf16.msrb.mxu2 %v6758_v7  ;;  %v7807_v57 = vld [vmem:[#allocation9 + $0x58c] sm:$0xf]  ;;  %v7171_v7 = vld [vmem:[#allocation9 + $0x598] sm:$0xf0] }
 0x5d2   : > { %5737 = vmatpush.bf16.msra.mxu3 %v6886_v45  ;;  %v7174_v45 = vor.u32 %v7807_v57, %v7171_v7  ;;  %v7110_v57 = vor.u32 %v7791_v23, %v7107_v21  ;;  %v7238_v7 = vor.u32 %v7823_v18, %v7235_v2  ;;  %v7914_v21 = vld [vmem:[%s9769_s15 + $0xe0] sm:$0xff] }
 0x5d5   : > { %5712 = vmatpush.bf16.msrb.mxu1 %v6614_v53  ;;  %5725 = vmatpush.bf16.msrb.mxu2 %v6742_v28  ;;  %v7283_v28 = vld [vmem:[#allocation9 + $0x678] sm:$0xf0] }
 0x5d6   : > { %5738 = vmatpush.bf16.msra.mxu3 %v6870_v9  ;;  %v7286_v34 = vor.u32 %v7835_v32, %v7283_v28  ;;  %v7895_v32 = vld [vmem:[%s9769_s15 + $0x48] sm:$0xff]  ;;  %v7908_v28 = vld [vmem:[%s9769_s15 + $0xb0] sm:$0xff] }
 0x5d9   : > { %5713 = vmatpush.bf16.msrb.mxu1 %v6598_v5  ;;  %5726 = vmatpush.bf16.msrb.mxu2 %v6726_v46  ;;  %v7142_v46 = vor.u32 %v7799_v37, %v7139_v1  ;;  %v7905_v1 = vld [vmem:[%s9769_s15 + $0x98] sm:$0xff] }
 0x5da   : > { %5739 = vmatpush.bf16.msra.mxu3 %v6854_v36  ;;  %v7270_v36 = vor.u32 %v7831_v19, %v7267_v48 }
 0x5db   : > { %v5702_v53 = vpop.f32.mrf.mxu0 }
 0x5dc   : > { %5714 = vmatmul.bf16.vlgmr.msrb.gmra.mxu1 %v9538_v38  ;;  %5727 = vmatmul.bf16.vlgmr.msrb.gmra.mxu2 %v9540_v13  ;;  %v4096_v38 = vperm.slane %v9604_v47, 3  ;;  %v4094_v13 = vperm.slane %v9604_v47, 1  ;;  %v7158_v47 = vor.u32 %v7803_v42, %v7155_v63 }
 0x5dd   : > { %5758 = vmatpush.bf16.msra.mxu1 %v7222_v29  ;;  %5771 = vmatpush.bf16.msra.mxu2 %v7350_v26  ;;  %v7398_v29 = vor.u32 %v7863_v8, %v7395_v39  ;;  %v7795_v26 = vld [vmem:[#allocation9 + $0x52c] sm:$0xf]  ;;  %v7903_v39 = vld [vmem:[%s9769_s15 + $0x88] sm:$0xff] }
 0x5de   : > { %5784 = vmatpush.bf16.msrb.mxu3 %v7478_v15  ;;  %v9634_v59 = vadd.f32 %v5702_v53, %v4096_v38  ;;  %v5495_v9 = vadd.f32 %v9627_v22, %v4094_v13  ;;  %v7123_v15 = vld [vmem:[#allocation9 + $0x538] sm:$0xf0]  ;;  %v7898_v38 = vld [vmem:[%s9769_s15 + $0x60] sm:$0xff] }
 0x5df   : > { %5740 = vmatmul.bf16.vlgmr.msra.gmra.mxu3 %v9548_v24  ;;  %v5507_v24 = vpop.f32.mrf.mxu1  ;;  %v5520_v51 = vpop.f32.mrf.mxu2 }
 0x5e0   : > { %v5508_v58 = vadd.f32 %v5507_v24, %v5495_v9  ;;  %v7909_v24 = vld [vmem:[%s9769_s15 + $0xb8] sm:$0xff]  ;;  %v7907_v9 = vld [vmem:[%s9769_s15 + $0xa8] sm:$0xff] }
 0x5e1   : > { %5759 = vmatpush.bf16.msra.mxu1 %v7206_v31  ;;  %5772 = vmatpush.bf16.msra.mxu2 %v7334_v43  ;;  %v7126_v31 = vor.u32 %v7795_v26, %v7123_v15 }
 0x5e2   : > { %5785 = vmatpush.bf16.msrb.mxu3 %v7462_v3  ;;  %v5521_v60 = vadd.f32 %v5520_v51, %v5508_v58  ;;  %v5533_v5 = vpop.f32.mrf.mxu3  ;;  %v7254_v3 = vor.u32 %v7827_v50, %v7251_v40  ;;  %v7904_v58 = vld [vmem:[%s9769_s15 + $0x90] sm:$0xff]  ;;  %v7917_v40 = vld [vmem:[%s9769_s15 + $0xf8] sm:$0xff] }
 0x5e3   : > { %v5704_v52 = vpop.f32.mrf.mxu0 }
 0x5e4   : > { %v5534_v17 = vadd.f32 %v5533_v5, %v5521_v60  ;;  %v7902_v60 = vld [vmem:[%s9769_s15 + $0x80] sm:$0xff] }
 0x5e5   : > { %5760 = vmatpush.bf16.msra.mxu1 %v7190_v33  ;;  %5773 = vmatpush.bf16.msra.mxu2 %v7318_v12  ;;  %v7363_v33 = vld [vmem:[#allocation9 + $0x718] sm:$0xf0] }
 0x5e6   : > { %5786 = vmatpush.bf16.msrb.mxu3 %v7446_v30  ;;  %v5547_v43 = vadd.f32 %v9589_v55, %v5534_v17  ;;  %v7366_v61 = vor.u32 %v7855_v62, %v7363_v33  ;;  %v7901_v55 = vld [vmem:[%s9769_s15 + $0x78] sm:$0xff] }
 0x5e7   : > { %v5509_v22 = vpop.f32.mrf.mxu1  ;;  %v5522_v12 = vpop.f32.mrf.mxu2  ;;  %v7913_v62 = vld [vmem:[%s9769_s15 + $0xd8] sm:$0xff] }
 0x5e8   : > { %v7912_v12 = vld [vmem:[%s9769_s15 + $0xd0] sm:$0xff] }
 0x5e9   : > { %5761 = vmatpush.bf16.msra.mxu1 %v7174_v45  ;;  %5774 = vmatpush.bf16.msra.mxu2 %v7302_v35 }
 0x5ea   : > { %5787 = vmatpush.bf16.msrb.mxu3 %v7430_v16  ;;  %v5535_v30 = vpop.f32.mrf.mxu3  ;;  %v7896_v16 = vld [vmem:[%s9769_s15 + $0x50] sm:$0xff] }
 0x5ed   : > { %5762 = vmatpush.bf16.msra.mxu1 %v7158_v47  ;;  %5775 = vmatpush.bf16.msra.mxu2 %v7286_v34  ;;  %v7894_v47 = vld [vmem:[%s9769_s15 + $0x40] sm:$0xff] }
 0x5ee   : > { %5788 = vmatpush.bf16.msrb.mxu3 %v7414_v27  ;;  %v7906_v27 = vld [vmem:[%s9769_s15 + $0xa0] sm:$0xff] }
 0x5f1   : > { %5763 = vmatpush.bf16.msra.mxu1 %v7142_v46  ;;  %5776 = vmatpush.bf16.msra.mxu2 %v7270_v36 }
 0x5f2   : > { %5789 = vmatpush.bf16.msrb.mxu3 %v7398_v29 }
 0x5f5   : > { %5764 = vmatpush.bf16.msra.mxu1 %v7126_v31  ;;  %5777 = vmatpush.bf16.msra.mxu2 %v7254_v3 }
 0x5f6   : > { %5790 = vmatpush.bf16.msrb.mxu3 %v7382_v11 }
 0x5f9   : > { %5765 = vmatpush.bf16.msra.mxu1 %v7110_v57  ;;  %5778 = vmatpush.bf16.msra.mxu2 %v7238_v7  ;;  %v5559_v10 = vpop.f32.mrf.mxu1  ;;  %v7911_v57 = vld [vmem:[%s9769_s15 + $0xc8] sm:$0xff] }
 0x5fa   : > { %5791 = vmatpush.bf16.msrb.mxu3 %v7366_v61 }
 0x5fb   : > { %v9653_v13 = vpop.f32.mrf.mxu0 }
 0x5fc   : > { %5766 = vmatmul.bf16.vlgmr.msra.gmra.mxu1 %v9550_v20  ;;  %5779 = vmatmul.bf16.vlgmr.msra.gmra.mxu2 %v9556_v41  ;;  %v7897_v20 = vld [vmem:[%s9769_s15 + $0x58] sm:$0xff]  ;;  %v5560_v41 = vadd.f32 %v5559_v10, %v5547_v43 }
 0x5fd   : > { %6078 = vmatpush.bf16.msrb.mxu1 %v7901_v55  ;;  %5792 = vmatmul.bf16.vlgmr.msrb.gmra.mxu3 %v9558_v25  ;;  %v7910_v55 = vld [vmem:[%s9769_s15 + $0xc0] sm:$0xff] }
 0x5fe   : > { %6091 = vmatpush.bf16.msrb.mxu2 %v7909_v24  ;;  %6104 = vmatpush.bf16.msra.mxu3 %v7917_v40 }
 0x5ff   : > { %v5572_v25 = vpop.f32.mrf.mxu2 }
 0x600   : > { %v5573_v42 = vadd.f32 %v5572_v25, %v5560_v41 }
 0x601   : > { %6079 = vmatpush.bf16.msrb.mxu1 %v7900_v44  ;;  %v5561_v35 = vpop.f32.mrf.mxu1 }
 0x602   : > { %v5585_v45 = vpop.f32.mrf.mxu3  ;;  %6092 = vmatpush.bf16.msrb.mxu2 %v7908_v28 }
 0x603   : > { %v5756_v63 = vpop.f32.mrf.mxu0  ;;  %v5586_v53 = vadd.f32 %v5585_v45, %v5573_v42 }
 0x605   : > { %6080 = vmatpush.bf16.msrb.mxu1 %v7899_v14  ;;  %v5798_v34 = vmax.f32 %v5586_v53, 0.0 }
 0x606   : > { %6093 = vmatpush.bf16.msrb.mxu2 %v7907_v9 }
 0x607   : > { %v5574_v54 = vpop.f32.mrf.mxu2  ;;  %v5802_v37 = vpack.c.bf16 %v5798_v34, %v5798_v34 }
 0x609   : > { %6081 = vmatpush.bf16.msrb.mxu1 %v7898_v38 }
 0x60a   : > { %v5587_v0 = vpop.f32.mrf.mxu3  ;;  %6094 = vmatpush.bf16.msrb.mxu2 %v7906_v27 }
 0x60d   : > { %6082 = vmatpush.bf16.msrb.mxu1 %v7897_v20 }
 0x60e   : > { %6095 = vmatpush.bf16.msrb.mxu2 %v7905_v1 }
 0x611   : > { %6083 = vmatpush.bf16.msrb.mxu1 %v7896_v16 }
 0x612   : > { %6096 = vmatpush.bf16.msrb.mxu2 %v7904_v58 }
 0x615   : > { %6084 = vmatpush.bf16.msrb.mxu1 %v7895_v32 }
 0x616   : > { %6097 = vmatpush.bf16.msrb.mxu2 %v7903_v39 }
 0x619   : > { %6085 = vmatpush.bf16.msrb.mxu1 %v7894_v47  ;;  %v5611_v19 = vpop.f32.mrf.mxu1 }
 0x61a   : > { %6098 = vmatpush.bf16.msrb.mxu2 %v7902_v60  ;;  %v5612_v22 = vadd.f32 %v5611_v19, %v9616_v4  ;;  %v7916_v4 = vld [vmem:[%s9769_s15 + $0xf0] sm:$0xff] }
 0x61b   : > { %6105 = vmatpush.bf16.msra.mxu3 %v7916_v4 }
 0x61c   : > { %6086 = vmatmul.bf16.vlgmr.msrb.gmra.mxu1 %v5802_v37 }
 0x61f   : > { %v5624_v48 = vpop.f32.mrf.mxu2 }
 0x620   : > { %v5625_v36 = vadd.f32 %v5624_v48, %v5612_v22 }
 0x621   : > { %v5613_v51 = vpop.f32.mrf.mxu1 }
 0x622   : > { %v5637_v8 = vpop.f32.mrf.mxu3 }
 0x623   : > { %v5638_v29 = vadd.f32 %v5637_v8, %v5625_v36 }
 0x625   : > { %v5651_v15 = vadd.f32 %v9625_v6, %v5638_v29  ;;  %v7915_v6 = vld [vmem:[%s9769_s15 + $0xe8] sm:$0xff] }
 0x626   : > { %6106 = vmatpush.bf16.msra.mxu3 %v7915_v6 }
 0x627   : > { %v5626_v5 = vpop.f32.mrf.mxu2 }
 0x62a   : > { %v5639_v46 = vpop.f32.mrf.mxu3  ;;  %6107 = vmatpush.bf16.msra.mxu3 %v7914_v21 }
 0x62e   : > { %6108 = vmatpush.bf16.msra.mxu3 %v7913_v62 }
 0x632   : > { %6109 = vmatpush.bf16.msra.mxu3 %v7912_v12 }
 0x636   : > { %6110 = vmatpush.bf16.msra.mxu3 %v7911_v57 }
 0x639   : > { %v5663_v26 = vpop.f32.mrf.mxu1 }
 0x63a   : > { %v5664_v50 = vadd.f32 %v5663_v26, %v5651_v15  ;;  %6111 = vmatpush.bf16.msra.mxu3 %v7910_v55 }
 0x63f   : > { %v5676_v17 = vpop.f32.mrf.mxu2 }
 0x640   : > { %v5677_v56 = vadd.f32 %v5676_v17, %v5664_v50 }
 0x641   : > { %v5665_v49 = vpop.f32.mrf.mxu1 }
 0x642   : > { %v5689_v52 = vpop.f32.mrf.mxu3 }
 0x643   : > { %v5690_v31 = vadd.f32 %v5689_v52, %v5677_v56  ;;  %v6074_v18 = vpop.f32.mrf.mxu0 }
 0x645   : > { %v5799_v43 = vmax.f32 %v5690_v31, 0.0 }
 0x647   : > { %v5803_v3 = vpack.c.bf16 %v5799_v43, %v5799_v43  ;;  %v5678_v11 = vpop.f32.mrf.mxu2 }
 0x649   : > { %6099 = vmatmul.bf16.vlgmr.msrb.gmra.mxu2 %v5803_v3 }
 0x64a   : > { %v5691_v23 = vpop.f32.mrf.mxu3 }
 0x64b   : > { %v6076_v2 = vpop.f32.mrf.mxu0 }
 0x659   : > { %v5715_v33 = vpop.f32.mrf.mxu1 }
 0x65a   : > { %v5716_v10 = vadd.f32 %v5715_v33, %v9634_v59  ;;  %v8133_v59 = vld [vmem:[%s9770_s16] ss:$0 sm:$0xff] }
 0x65b   : > { %v6075_v0 = vadd.f32 %v8133_v59, %v6074_v18 }
 0x65f   : > { %v5728_v30 = vpop.f32.mrf.mxu2 }
 0x660   : > { %v5729_v38 = vadd.f32 %v5728_v30, %v5716_v10 }
 0x661   : > { %v5717_v61 = vpop.f32.mrf.mxu1 }
 0x662   : > { %v5741_v7 = vpop.f32.mrf.mxu3 }
 0x663   : > { %v5742_v20 = vadd.f32 %v5741_v7, %v5729_v38 }
 0x665   : > { %v5755_v25 = vadd.f32 %v9653_v13, %v5742_v20 }
 0x667   : > { %v5730_v44 = vpop.f32.mrf.mxu2 }
 0x66a   : > { %v5743_v14 = vpop.f32.mrf.mxu3 }
 0x679   : > { %v5767_v41 = vpop.f32.mrf.mxu1 }
 0x67a   : > { %v5768_v45 = vadd.f32 %v5767_v41, %v5755_v25 }
 0x67f   : > { %v5780_v24 = vpop.f32.mrf.mxu2 }
 0x680   : > { %v5793_v35 = vpop.f32.mrf.mxu3  ;;  %v5781_v16 = vadd.f32 %v5780_v24, %v5768_v45 }
 0x681   : > { %v5769_v42 = vpop.f32.mrf.mxu1 }
 0x682   : > { %v5794_v63 = vadd.f32 %v5793_v35, %v5781_v16 }
 0x684   : > { %v5800_v32 = vmax.f32 %v5794_v63, 0.0 }
 0x686   : > { %v5804_v53 = vpack.c.bf16 %v5800_v32, %v5800_v32 }
 0x687   : > { %v5782_v28 = vpop.f32.mrf.mxu2 }
 0x688   : > { %v5795_v54 = vpop.f32.mrf.mxu3  ;;  %6112 = vmatmul.bf16.vlgmr.msra.gmra.mxu3 %v5804_v53 }
 0x699   : > { %v6087_v9 = vpop.f32.mrf.mxu1 }
 0x69a   : > { %v6088_v13 = vadd.f32 %v6087_v9, %v6075_v0 }
 0x6a1   : > { %v6089_v47 = vpop.f32.mrf.mxu1 }
 0x6cc   : > { %v6100_v34 = vpop.f32.mrf.mxu2 }
 0x6cd   : > { %v6101_v37 = vadd.f32 %v6100_v34, %v6088_v13 }
 0x6d4   : > { %v6102_v27 = vpop.f32.mrf.mxu2 }
 0x70b   : > { %v6113_v1 = vpop.f32.mrf.mxu3 }
 0x70c   : > { %v6114_v19 = vadd.f32 %v6113_v1, %v6101_v37 }
 0x70e   : > { %6117 = vst [vmem:[%s561_s26] sm:$0xff] %v6114_v19 }
 0x70f   : > { %8193 = shalt.err (!%p8190_p8)
}
 0x710   : > { %8081 = dma.vmem_to_hbm [thread:$0]  (%p8366_p5), %s6132_s18, 128, %s6134_s0, %s6119_s23  }
 0x713   : > { %v6115_v58 = vpop.f32.mrf.mxu3 }
 0x714 PF: > { %p8093_p9 = scmp.ge.s32.totalorder %s8232_s27, 2  ;;  %s6145_s30 = sand.u32 1, %s8220_s24  }
 0x715   : > { %s6146_s26 = scalar_lea.sflag [#allocation11], %s6145_s30 }
 0x716   : > { %p8088_p10 = pnand %p8093_p9, %p8370_p6 }
 0x718   : > { %p8089_p11 = pneg %p8088_p10 }
 0x71a   : > { %8215 = dma.done.wait (%p8089_p11), %s6146_s26, 128  }
 0x71b   : > { %8217 = vsyncadd (%p8089_p11), %s6146_s26, 4294967168  ;;  %s9811_s27 = sld [smem:[#allocation16_spill]]  ;;  %s9814_s24 = smov %s8224_s25 }
 0x71c   : > { %s9812_s2 = sld [smem:[#allocation15_spill]] }
 0x71d   : > { %s9813_s26 = sld [smem:[#allocation17_spill]] }
 0x721   : > { %p28_p12 = scmp.ge.s32.totalorder %s9811_s27, 4  }
 0x722   : > { %s9815_s25 = smov %s9812_s2 }
 0x723   :  { %30 = sbr.rel (!%p28_p12) target bundleno = 9 (0x9), region = 244 }
 0x728   :  { %6152 = vsyncpa [#allocation10], 1 }
 0x729   :  { %6154 = vsyncpa [#allocation10 + $0x1], 1 }
 0x72a   :  { %6155 = vsyncpa [#allocation11], 1 }
 0x72b   :  { %6157 = vsyncpa [#allocation11 + $0x1], 1 }

</bundles_post_ra>
